<compile_context>
chip_gen: v7x
topology: tpu7x:2x2x1
jax: 0.10.0
libtpu: 0.0.40
codegen_flags: <defaults>
</compile_context>

<pallas_src>
import jax
import jax.numpy as jnp
from jax.experimental import pallas as pl
from jax.experimental.pallas import tpu as pltpu

_HAS_BUFFERED = hasattr(pl, "Buffered")


def _round_up(n, m):
    return ((n + m - 1) // m) * m


# --------------------------------------------------------------------------
# Kernels
# --------------------------------------------------------------------------
def _mlp_resident_kernel(x_ref, w1_ref, b1_ref, w2_ref, b2_ref, o_ref):
    """out = relu(x @ W1 + b1) @ W2 + b2 + x ; bf16 MXU operands, f32 accum."""
    x = x_ref[...]                                              # (tm, D)
    h = jnp.dot(x.astype(jnp.bfloat16), w1_ref[...],
                preferred_element_type=jnp.float32)             # (tm, H) f32
    h = jnp.maximum(h + b1_ref[...].astype(jnp.float32), 0.0)
    y = jnp.dot(h.astype(jnp.bfloat16), w2_ref[...],
                preferred_element_type=jnp.float32)             # (tm, D) f32
    y = y + b2_ref[...].astype(jnp.float32) + x.astype(jnp.float32)
    o_ref[...] = y.astype(o_ref.dtype)


def _mlp_streaming_kernel(x_ref, w1_ref, b1_ref, w2_ref, b2_ref, o_ref, acc_ref):
    """Hidden-dim-tiled variant: accumulate partial fc2 products in f32 scratch."""
    h_idx = pl.program_id(1)
    x = x_ref[...]                                              # (tm, D)

    @pl.when(h_idx == 0)
    def _init():
        # Seed the accumulator with residual + fc2 bias; each h-step adds its
        # exact slice of relu(x@W1+b1) @ W2, so the decomposition is exact.
        acc_ref[...] = x.astype(jnp.float32) + b2_ref[...].astype(jnp.float32)

    hblk = jnp.dot(x.astype(jnp.bfloat16), w1_ref[...],
                   preferred_element_type=jnp.float32)          # (tm, th) f32
    hblk = jnp.maximum(hblk + b1_ref[...].astype(jnp.float32), 0.0)
    acc_ref[...] += jnp.dot(hblk.astype(jnp.bfloat16), w2_ref[...],
                            preferred_element_type=jnp.float32)

    @pl.when(h_idx == pl.num_programs(1) - 1)
    def _finalize():
        o_ref[...] = acc_ref[...].astype(o_ref.dtype)


# --------------------------------------------------------------------------
# Wrapper
# --------------------------------------------------------------------------
def mlp_forward(x, w1, b1, w2, b2, *, tm=None, th=None, force_stream=False):
    """x: (..., D); w1: (D, H); b1: (1, H) or (H,); w2: (H, D); b2: (1, D) or (D,)."""
    orig_shape = x.shape
    D = int(orig_shape[-1])
    x2 = x.reshape(-1, D)
    B = int(x2.shape[0])
    H = int(w1.shape[-1])

    # bf16 weights (half the HBM traffic / VMEM residency); f32 accumulation in
    # the kernel keeps accuracy. Biases stay f32.
    w1b = w1.astype(jnp.bfloat16)
    w2b = w2.astype(jnp.bfloat16)
    b1f = jnp.asarray(b1, jnp.float32).reshape(1, H)
    b2f = jnp.asarray(b2, jnp.float32).reshape(1, D)

    # ---- generation-aware VMEM budget / core count ----
    try:
        vmem_cap = int(pltpu.get_tpu_info().vmem_capacity_bytes)
    except Exception:
        vmem_cap = 64 * 1024 * 1024          # conservative (v7x-sized) fallback
    vmem_budget = (vmem_cap * 3) // 4        # sizing budget (compiler headroom)
    vmem_hard_cap = (vmem_cap * 7) // 8      # ceiling for vmem_limit_bytes
    # Heuristic: 64 MiB/TC => v7x (2 TensorCores/chip); 128 MiB => v5e/v6e (1).
    num_cores = 2 if vmem_cap <= 64 * 1024 * 1024 else 1

    xb = x2.dtype.itemsize
    w_bytes = 2 * D * H * 2                  # bf16 W1 + W2
    bias_bytes = (H + D) * 4

    def resident_need(tm_, wbuf):
        act = 2 * tm_ * D * xb * 2                    # x + out tiles, double-buffered
        tmp = tm_ * H * (4 + 2) + tm_ * D * 4         # hidden f32 + bf16 copy + y f32
        return wbuf * (w_bytes + bias_bytes) + act + tmp

    def stream_need(tm_, th_):
        wt = 2 * (2 * D * th_ * 2 + th_ * 4)          # dbl-buffered W1/W2/b1 tiles
        act = 2 * tm_ * D * xb * 2                    # x + out tiles, double-buffered
        acc = tm_ * D * 4                             # f32 accumulator scratch
        tmp = tm_ * th_ * (4 + 2) + tm_ * D * 4
        return wt + act + acc + tmp + 2 * D * 4

    Bpad = _round_up(max(B, 1), 8)

    def split_for_cores(tm_):
        # On dual-TC parts, make the "parallel" batch axis an even number of
        # >= num_cores tiles so both cores get work (no idle tail step).
        if num_cores > 1 and Bpad > 8:
            n = pl.cdiv(Bpad, tm_)
            if n < num_cores or n % num_cores:
                n = _round_up(max(n, num_cores), num_cores)
                tm_ = _round_up(pl.cdiv(Bpad, n), 8)
        return max(8, min(tm_, Bpad))

    if tm is not None:
        tm_sel = max(8, min(_round_up(tm, 8), Bpad))
    else:
        tm_sel = min(1024, Bpad)
        while tm_sel > 8 and resident_need(tm_sel, 1) > vmem_budget:
            tm_sel = _round_up(tm_sel // 2, 8)
        tm_sel = split_for_cores(tm_sel)

    use_resident = (not force_stream) and resident_need(tm_sel, 1) <= vmem_budget

    cost = pl.CostEstimate(flops=4 * B * D * H, transcendentals=0,
                           bytes_accessed=2 * B * D * xb + w_bytes + bias_bytes)

    # ---------------------------------------------------------------------
    # Path 1: resident weights (single-buffered), 1-D grid over batch tiles.
    # ---------------------------------------------------------------------
    if use_resident:
        n_m = pl.cdiv(B, tm_sel)
        vmem_limit = int(min(max(2 * resident_need(tm_sel, 2), 32 * 1024 * 1024),
                             vmem_hard_cap))

        def const_spec(shape, single):
            ndims = len(shape)

            def idx(i):
                return (0,) * ndims

            if single and _HAS_BUFFERED:
                try:
                    return pl.BlockSpec(shape, idx, pipeline_mode=pl.Buffered(1))
                except TypeError:  # older BlockSpec signature
                    pass
            return pl.BlockSpec(shape, idx)

        def build(single_buffer_weights):
            return pl.pallas_call(
                _mlp_resident_kernel,
                out_shape=jax.ShapeDtypeStruct((B, D), x2.dtype),
                grid_spec=pltpu.PrefetchScalarGridSpec(
                    num_scalar_prefetch=0,
                    grid=(n_m,),
                    in_specs=[
                        pl.BlockSpec((tm_sel, D), lambda i: (i, 0)),   # x tile
                        const_spec((D, H), single_buffer_weights),     # W1
                        const_spec((1, H), single_buffer_weights),     # b1
                        const_spec((H, D), single_buffer_weights),     # W2
                        const_spec((1, D), single_buffer_weights),     # b2
                    ],
                    out_specs=pl.BlockSpec((tm_sel, D), lambda i: (i, 0)),
                ),
                compiler_params=pltpu.CompilerParams(
                    dimension_semantics=("parallel",),   # batch axis -> megacore
                    vmem_limit_bytes=vmem_limit,
                ),
                cost_estimate=cost,
            )

        if _HAS_BUFFERED:
            try:
                out2 = build(True)(x2, w1b, b1f, w2b, b2f)
            except Exception:
                # Narrow fallback: only retry with default (double) buffering if
                # that configuration still fits the budget; otherwise the
                # failure is genuine (e.g. VMEM OOM) and must surface.
                if resident_need(tm_sel, 2) > vmem_budget:
                    raise
                out2 = build(False)(x2, w1b, b1f, w2b, b2f)
        else:
            out2 = build(False)(x2, w1b, b1f, w2b, b2f)
        return out2.reshape(orig_shape)

    # ---------------------------------------------------------------------
    # Path 2: stream the hidden dimension (2-D grid, f32 accumulator scratch).
    # ---------------------------------------------------------------------
    if tm is None:
        tm_sel = min(_round_up(B, 8), 512)
    if th is not None:
        th_sel = max(128, min(_round_up(th, 128), _round_up(H, 128)))
    else:
        th_sel = min(_round_up(H, 128), 2048)

    while th_sel > 128 and stream_need(tm_sel, th_sel) > vmem_budget:
        th_sel = _round_up(th_sel // 2, 128)
    while tm_sel > 8 and stream_need(tm_sel, th_sel) > vmem_budget:
        tm_sel = _round_up(tm_sel // 2, 8)
    tm_sel = split_for_cores(tm_sel)

    Hp = _round_up(H, th_sel)
    if Hp != H:
        # One-time zero-pad of the hidden dim (exact: relu(0) rows contribute 0).
        w1b = jnp.pad(w1b, ((0, 0), (0, Hp - H)))
        b1f = jnp.pad(b1f, ((0, 0), (0, Hp - H)))
        w2b = jnp.pad(w2b, ((0, Hp - H), (0, 0)))

    n_m = pl.cdiv(B, tm_sel)
    n_h = Hp // th_sel
    vmem_limit = int(min(max(2 * stream_need(tm_sel, th_sel), 32 * 1024 * 1024),
                         vmem_hard_cap))

    out2 = pl.pallas_call(
        _mlp_streaming_kernel,
        out_shape=jax.ShapeDtypeStruct((B, D), x2.dtype),
        grid_spec=pltpu.PrefetchScalarGridSpec(
            num_scalar_prefetch=0,
            grid=(n_m, n_h),
            in_specs=[
                pl.BlockSpec((tm_sel, D), lambda i, h: (i, 0)),    # x tile (const over h)
                pl.BlockSpec((D, th_sel), lambda i, h: (0, h)),    # W1 h-tile
                pl.BlockSpec((1, th_sel), lambda i, h: (0, h)),    # b1 h-tile
                pl.BlockSpec((th_sel, D), lambda i, h: (h, 0)),    # W2 h-tile
                pl.BlockSpec((1, D), lambda i, h: (0, 0)),         # b2
            ],
            out_specs=pl.BlockSpec((tm_sel, D), lambda i, h: (i, 0)),
            scratch_shapes=[pltpu.VMEM((tm_sel, D), jnp.float32)],
        ),
        compiler_params=pltpu.CompilerParams(
            dimension_semantics=("parallel", "arbitrary"),
            vmem_limit_bytes=vmem_limit,
        ),
        cost_estimate=cost,
    )(x2, w1b, b1f, w2b, b2f)
    return out2.reshape(orig_shape)


# --------------------------------------------------------------------------
# Params init (torch.nn.Linear default: U(-1/sqrt(fan_in), 1/sqrt(fan_in)))
# --------------------------------------------------------------------------
def init_params(key, in_features, hidden_size, dtype=jnp.float32):
    k1, k2, k3, k4 = jax.random.split(key, 4)
    bound1 = 1.0 / (in_features ** 0.5)
    bound2 = 1.0 / (hidden_size ** 0.5)
    w1 = jax.random.uniform(k1, (in_features, hidden_size), dtype, -bound1, bound1)
    b1 = jax.random.uniform(k2, (1, hidden_size), dtype, -bound1, bound1)
    w2 = jax.random.uniform(k3, (hidden_size, in_features), dtype, -bound2, bound2)
    b2 = jax.random.uniform(k4, (1, in_features), dtype, -bound2, bound2)
    return w1, b1, w2, b2


if __name__ == "__main__":
    key = jax.random.PRNGKey(0)
    kx, kp = jax.random.split(key)

    batch, in_features, hidden_size = 512, 128, 512
    x = jax.random.normal(kx, (batch, in_features), jnp.float32)
    w1, b1, w2, b2 = init_params(kp, in_features, hidden_size)

    # Reference with matching precision semantics (bf16 MXU operands, f32 accum).
    h_ref = jnp.maximum(
        jnp.dot(x.astype(jnp.bfloat16), w1.astype(jnp.bfloat16),
                preferred_element_type=jnp.float32) + b1, 0.0)
    ref = (jnp.dot(h_ref.astype(jnp.bfloat16), w2.astype(jnp.bfloat16),
                   preferred_element_type=jnp.float32) + b2 + x)

    # 1) Auto-tuned (weights-resident) path.
    out = jax.block_until_ready(mlp_forward(x, w1, b1, w2, b2))
    assert out.shape == (batch, in_features)
    assert jnp.allclose(out, ref, atol=2e-3, rtol=2e-3), "resident path mismatch"

    # 2) Hidden-dim streaming path with a ragged batch tile (exercises the
    #    accumulator grid axis and OOB-row masking; no jnp.pad of activations).
    out_s = jax.block_until_ready(
        mlp_forward(x[:300], w1, b1, w2, b2, force_stream=True, tm=128, th=128))
    assert out_s.shape == (300, in_features)
    assert jnp.allclose(out_s, ref[:300], atol=2e-3, rtol=2e-3), "streaming path mismatch"

    # Loose sanity check against full-f32 math (bf16 rounding noise only).
    # TODO(synk): bf16 MXU operands are a deliberate precision trade-off vs the
    # f32 PyTorch module; drop the .astype(jnp.bfloat16) casts if exact f32 is required.
    ref_f32 = jnp.maximum(x @ w1 + b1, 0.0) @ w2 + b2 + x
    assert jnp.allclose(out, ref_f32, atol=5e-2, rtol=5e-2), "mismatch vs f32 reference"

    print("KERNEL_OK")
</pallas_src>

<mosaic_0001>
module attributes {stable_mosaic.version = 11 : i64} {
  func.func @_mlp_resident_kernel(%arg0: i32, %arg1: memref<256x128xf32, #tpu.memory_space<vmem>>, %arg2: memref<128x512xbf16, #tpu.memory_space<vmem>>, %arg3: memref<1x512xf32, #tpu.memory_space<vmem>>, %arg4: memref<512x128xbf16, #tpu.memory_space<vmem>>, %arg5: memref<1x128xf32, #tpu.memory_space<vmem>>, %arg6: memref<256x128xf32, #tpu.memory_space<vmem>>) attributes {dimension_semantics = [#tpu.dimension_semantics<parallel>], iteration_bounds = array<i64: 2>, scalar_prefetch = 0 : i64, scratch_operands = 0 : i64, tpu.core_type = #tpu.core_type<tc>, window_params = [{transform_indices = @transform_0, window_bounds = array<i64: 256, 128>}, {pipeline_mode = #tpu.pipeline_mode<synchronous>, transform_indices = @transform_1, window_bounds = array<i64: 128, 512>}, {pipeline_mode = #tpu.pipeline_mode<synchronous>, transform_indices = @transform_2, window_bounds = array<i64: 1, 512>}, {pipeline_mode = #tpu.pipeline_mode<synchronous>, transform_indices = @transform_3, window_bounds = array<i64: 512, 128>}, {pipeline_mode = #tpu.pipeline_mode<synchronous>, transform_indices = @transform_4, window_bounds = array<i64: 1, 128>}, {transform_indices = @transform_5, window_bounds = array<i64: 256, 128>}]} {
    %c0 = arith.constant 0 : index
    %c0_0 = arith.constant 0 : index
    %0 = vector.load %arg1[%c0, %c0_0] : memref<256x128xf32, #tpu.memory_space<vmem>>, vector<256x128xf32>
    %1 = arith.truncf %0 : vector<256x128xf32> to vector<256x128xbf16>
    %c0_1 = arith.constant 0 : index
    %c0_2 = arith.constant 0 : index
    %2 = vector.load %arg2[%c0_1, %c0_2] : memref<128x512xbf16, #tpu.memory_space<vmem>>, vector<128x512xbf16>
    %cst = arith.constant dense<0.000000e+00> : vector<256x512xf32>
    %3 = tpu.matmul %1, %2, %cst {dimension_numbers = #tpu.dot_dimension_numbers<[1], [0], [0], [1], [0, 0, 1, 1], [], []>} : vector<256x128xbf16>, vector<128x512xbf16>, vector<256x512xf32> -> vector<256x512xf32>
    %c0_3 = arith.constant 0 : index
    %c0_4 = arith.constant 0 : index
    %4 = vector.load %arg3[%c0_3, %c0_4] : memref<1x512xf32, #tpu.memory_space<vmem>>, vector<1x512xf32>
    %5 = vector.broadcast %4 : vector<1x512xf32> to vector<256x512xf32>
    %6 = arith.addf %3, %5 : vector<256x512xf32>
    %cst_5 = arith.constant 0.000000e+00 : f32
    %7 = vector.broadcast %cst_5 : f32 to vector<256x512xf32>
    %8 = arith.maximumf %6, %7 : vector<256x512xf32>
    %9 = arith.truncf %8 : vector<256x512xf32> to vector<256x512xbf16>
    %c0_6 = arith.constant 0 : index
    %c0_7 = arith.constant 0 : index
    %10 = vector.load %arg4[%c0_6, %c0_7] : memref<512x128xbf16, #tpu.memory_space<vmem>>, vector<512x128xbf16>
    %cst_8 = arith.constant dense<0.000000e+00> : vector<256x128xf32>
    %11 = tpu.matmul %9, %10, %cst_8 {dimension_numbers = #tpu.dot_dimension_numbers<[1], [0], [0], [1], [0, 0, 1, 1], [], []>} : vector<256x512xbf16>, vector<512x128xbf16>, vector<256x128xf32> -> vector<256x128xf32>
    %c0_9 = arith.constant 0 : index
    %c0_10 = arith.constant 0 : index
    %12 = vector.load %arg5[%c0_9, %c0_10] : memref<1x128xf32, #tpu.memory_space<vmem>>, vector<1x128xf32>
    %13 = vector.broadcast %12 : vector<1x128xf32> to vector<256x128xf32>
    %14 = arith.addf %11, %13 : vector<256x128xf32>
    %15 = arith.addf %14, %0 : vector<256x128xf32>
    %c0_11 = arith.constant 0 : index
    %c0_12 = arith.constant 0 : index
    %16 = vector.load %arg6[%c0_11, %c0_12] : memref<256x128xf32, #tpu.memory_space<vmem>>, vector<256x128xf32>
    tpu.vector_store %arg6[%c0_11, %c0_12], %15 {strides = array<i32>} : memref<256x128xf32, #tpu.memory_space<vmem>>, vector<256x128xf32>,
    return
  }
  func.func @transform_0(%arg0: i32) -> (i32, i32) {
    %c0_i32 = arith.constant 0 : i32
    %c0_i32_0 = arith.constant 0 : i32
    return %arg0, %c0_i32 : i32, i32
  }
  func.func @transform_1(%arg0: i32) -> (i32, i32) {
    %c0_i32 = arith.constant 0 : i32
    %c0_i32_0 = arith.constant 0 : i32
    %c0_i32_1 = arith.constant 0 : i32
    return %c0_i32, %c0_i32_0 : i32, i32
  }
  func.func @transform_2(%arg0: i32) -> (i32, i32) {
    %c0_i32 = arith.constant 0 : i32
    %c0_i32_0 = arith.constant 0 : i32
    %c0_i32_1 = arith.constant 0 : i32
    return %c0_i32, %c0_i32_0 : i32, i32
  }
  func.func @transform_3(%arg0: i32) -> (i32, i32) {
    %c0_i32 = arith.constant 0 : i32
    %c0_i32_0 = arith.constant 0 : i32
    %c0_i32_1 = arith.constant 0 : i32
    return %c0_i32, %c0_i32_0 : i32, i32
  }
  func.func @transform_4(%arg0: i32) -> (i32, i32) {
    %c0_i32 = arith.constant 0 : i32
    %c0_i32_0 = arith.constant 0 : i32
    %c0_i32_1 = arith.constant 0 : i32
    return %c0_i32, %c0_i32_0 : i32, i32
  }
  func.func @transform_5(%arg0: i32) -> (i32, i32) {
    %c0_i32 = arith.constant 0 : i32
    %c0_i32_0 = arith.constant 0 : i32
    return %arg0, %c0_i32 : i32, i32
  }
}

module attributes {stable_mosaic.version = 11 : i64} {
  func.func @_mlp_resident_kernel(%arg0: i32, %arg1: memref<256x128xf32, #tpu.memory_space<vmem>>, %arg2: memref<128x512xbf16, #tpu.memory_space<vmem>>, %arg3: memref<1x512xf32, #tpu.memory_space<vmem>>, %arg4: memref<512x128xbf16, #tpu.memory_space<vmem>>, %arg5: memref<1x128xf32, #tpu.memory_space<vmem>>, %arg6: memref<256x128xf32, #tpu.memory_space<vmem>>) attributes {dimension_semantics = [#tpu.dimension_semantics<parallel>], iteration_bounds = array<i64: 2>, scalar_prefetch = 0 : i64, scratch_operands = 0 : i64, tpu.core_type = #tpu.core_type<tc>, window_params = [{transform_indices = @transform_0, window_bounds = array<i64: 256, 128>}, {pipeline_mode = #tpu.pipeline_mode<synchronous>, transform_indices = @transform_1, window_bounds = array<i64: 128, 512>}, {pipeline_mode = #tpu.pipeline_mode<synchronous>, transform_indices = @transform_2, window_bounds = array<i64: 1, 512>}, {pipeline_mode = #tpu.pipeline_mode<synchronous>, transform_indices = @transform_3, window_bounds = array<i64: 512, 128>}, {pipeline_mode = #tpu.pipeline_mode<synchronous>, transform_indices = @transform_4, window_bounds = array<i64: 1, 128>}, {transform_indices = @transform_5, window_bounds = array<i64: 256, 128>}]} {
    %c0 = arith.constant 0 : index
    %c0_0 = arith.constant 0 : index
    %0 = vector.load %arg1[%c0, %c0_0] : memref<256x128xf32, #tpu.memory_space<vmem>>, vector<256x128xf32>
    %1 = arith.truncf %0 : vector<256x128xf32> to vector<256x128xbf16>
    %c0_1 = arith.constant 0 : index
    %c0_2 = arith.constant 0 : index
    %2 = vector.load %arg2[%c0_1, %c0_2] : memref<128x512xbf16, #tpu.memory_space<vmem>>, vector<128x512xbf16>
    %cst = arith.constant dense<0.000000e+00> : vector<256x512xf32>
    %3 = tpu.matmul %1, %2, %cst {dimension_numbers = #tpu.dot_dimension_numbers<[1], [0], [0], [1], [0, 0, 1, 1], [], []>} : vector<256x128xbf16>, vector<128x512xbf16>, vector<256x512xf32> -> vector<256x512xf32>
    %c0_3 = arith.constant 0 : index
    %c0_4 = arith.constant 0 : index
    %4 = vector.load %arg3[%c0_3, %c0_4] : memref<1x512xf32, #tpu.memory_space<vmem>>, vector<1x512xf32>
    %5 = vector.broadcast %4 : vector<1x512xf32> to vector<256x512xf32>
    %6 = arith.addf %3, %5 : vector<256x512xf32>
    %cst_5 = arith.constant 0.000000e+00 : f32
    %7 = vector.broadcast %cst_5 : f32 to vector<256x512xf32>
    %8 = arith.maximumf %6, %7 : vector<256x512xf32>
    %9 = arith.truncf %8 : vector<256x512xf32> to vector<256x512xbf16>
    %c0_6 = arith.constant 0 : index
    %c0_7 = arith.constant 0 : index
    %10 = vector.load %arg4[%c0_6, %c0_7] : memref<512x128xbf16, #tpu.memory_space<vmem>>, vector<512x128xbf16>
    %cst_8 = arith.constant dense<0.000000e+00> : vector<256x128xf32>
    %11 = tpu.matmul %9, %10, %cst_8 {dimension_numbers = #tpu.dot_dimension_numbers<[1], [0], [0], [1], [0, 0, 1, 1], [], []>} : vector<256x512xbf16>, vector<512x128xbf16>, vector<256x128xf32> -> vector<256x128xf32>
    %c0_9 = arith.constant 0 : index
    %c0_10 = arith.constant 0 : index
    %12 = vector.load %arg5[%c0_9, %c0_10] : memref<1x128xf32, #tpu.memory_space<vmem>>, vector<1x128xf32>
    %13 = vector.broadcast %12 : vector<1x128xf32> to vector<256x128xf32>
    %14 = arith.addf %11, %13 : vector<256x128xf32>
    %15 = arith.addf %14, %0 : vector<256x128xf32>
    %c0_11 = arith.constant 0 : index
    %c0_12 = arith.constant 0 : index
    %16 = vector.load %arg6[%c0_11, %c0_12] : memref<256x128xf32, #tpu.memory_space<vmem>>, vector<256x128xf32>
    tpu.vector_store %arg6[%c0_11, %c0_12], %15 {strides = array<i32>} : memref<256x128xf32, #tpu.memory_space<vmem>>, vector<256x128xf32>,
    return
  }
  func.func @transform_0(%arg0: i32) -> (i32, i32) {
    %c0_i32 = arith.constant 0 : i32
    %c0_i32_0 = arith.constant 0 : i32
    return %arg0, %c0_i32 : i32, i32
  }
  func.func @transform_1(%arg0: i32) -> (i32, i32) {
    %c0_i32 = arith.constant 0 : i32
    %c0_i32_0 = arith.constant 0 : i32
    %c0_i32_1 = arith.constant 0 : i32
    return %c0_i32, %c0_i32_0 : i32, i32
  }
  func.func @transform_2(%arg0: i32) -> (i32, i32) {
    %c0_i32 = arith.constant 0 : i32
    %c0_i32_0 = arith.constant 0 : i32
    %c0_i32_1 = arith.constant 0 : i32
    return %c0_i32, %c0_i32_0 : i32, i32
  }
  func.func @transform_3(%arg0: i32) -> (i32, i32) {
    %c0_i32 = arith.constant 0 : i32
    %c0_i32_0 = arith.constant 0 : i32
    %c0_i32_1 = arith.constant 0 : i32
    return %c0_i32, %c0_i32_0 : i32, i32
  }
  func.func @transform_4(%arg0: i32) -> (i32, i32) {
    %c0_i32 = arith.constant 0 : i32
    %c0_i32_0 = arith.constant 0 : i32
    %c0_i32_1 = arith.constant 0 : i32
    return %c0_i32, %c0_i32_0 : i32, i32
  }
  func.func @transform_5(%arg0: i32) -> (i32, i32) {
    %c0_i32 = arith.constant 0 : i32
    %c0_i32_0 = arith.constant 0 : i32
    return %arg0, %c0_i32 : i32, i32
  }
}

</mosaic_0001>

<bundles_post_ra>
// kernel: tpu_custom_call.1
= control target key start
LH: loop header
LB: loop body
LE: loop exit
PB: predicated region body
PF: predicated region fallthrough
CT: control target
= control target key end

     0   :  { %10 = vsyncpa [#allocation3], 0  ;;  %s3115_s0 = inlined_call_operand.hbm [shape: f32[512,128], index: 0, kind: input, shape index: {}]   ;;  %s3116_s1 = inlined_call_operand.hbm [shape: bf16[128,512], index: 1, kind: input, shape index: {}]   ;;  %s3117_s2 = inlined_call_operand.vmem [shape: f32[1,512], index: 2, kind: input, shape index: {}]   ;;  %s3118_s3 = inlined_call_operand.hbm [shape: bf16[512,128], index: 3, kind: input, shape index: {}]   ;;  %s3119_s4 = inlined_call_operand.vmem [shape: f32[1,128], index: 4, kind: input, shape index: {}]   ;;  %s3120_s5 = inlined_call_operand.hbm [shape: f32[512,128], index: 5, kind: output, shape index: {}]  }
   0x1   :  { %12 = vsyncpa [#allocation3 + $0x1], 0 }
   0x2   :  { %13 = vsyncpa [#allocation6], 0 }
   0x3   :  { %14 = vsyncpa [#allocation4], 0 }
   0x4   :  { %16 = vsyncpa [#allocation4 + $0x1], 0  ;;  %s2568_s18 = smov 0   ;;  %s2570_s19 = smov 0  }
   0x5   :  { %s2572_s20 = smov 0   ;;  %s2574_s21 = smov 0  }
   0x6 LB: > { %s2589_s22 = sadd.s32 4294967295, %s2523_s21   ;;  %s1870_s23 = sadd.s32 4294967294, %s2523_s21   ;;  %s2523_s21 = sphi %s2574_s21, %s3140_s21   ;;  %s2519_s20 = sphi %s2572_s20, %s3139_s20   ;;  %s2515_s19 = sphi %s2570_s19, %s3138_s19   ;;  %s2511_s18 = sphi %s2568_s18, %s3137_s18  }
   0x7   : > { %p42_p0 = scmp.ne.s32.totalorder %s2515_s19, %s2511_s18  ;;  %p3121_p1 = scmp.eq.s32.totalorder %s2589_s22, 0 }
   0x8   : > { %p156_p3 = scmp.eq.s32.totalorder %s1870_s23, 1  ;;  %p1871_p5 = scmp.ge.s32.totalorder %s2523_s21, 1 }
   0x9   : > { %p2598_p4 = por %p3121_p1, %p42_p0  ;;  %p163_p7 = scmp.lt.s32.totalorder %s2523_s21, 3 }
   0xa   : > { %p2603_p6 = por %p156_p3, %p42_p0  ;;  %s2525_s27 = smov [#allocation5]  }
   0xb   : > { %s3124_s24 = scalar_select %p2598_p4, 1, 0 }
   0xc   : > { %s3125_s25 = scalar_select %p2603_p6, 1, 0 }
   0xd   : > { %p2608_p8 = pnand %p1871_p5, %p163_p7  ;;  %s175_s28 = sshll.u32 %s2525_s27, 4  ;;  %s2612_s28 = int_to_ptr.vmem [resolvable:$true] %s175_s28 }
   0xe   : > { %s2526_s30 = smov [#allocation7]   ;;  %s2367_s9 = scalar_lea.hbm %s3116_s1, 4096 }
   0xf   : > { %p2191_p9 = pneg %p2608_p8  ;;  %s191_s6 = sshll.u32 %s2526_s30, 4  ;;  %s2623_s6 = int_to_ptr.vmem [resolvable:$true] %s191_s6 }
  0x10   : > { %p2368_p12 = scmp.ne.s32.totalorder %s3116_s1, %s2367_s9  ;;  %p2374_p5 = scmp.lt.u32.totalorder %s2367_s9, %s3116_s1 }
  0x11   : > { %p2619_p11 = pnand %p2191_p9, %p3121_p1 }
  0x13   : > { %p2369_p13 = pneg %p2619_p11 }
  0x15   : > { %p2370_p0 = pnand %p2369_p13, %p2368_p12 }
  0x17   : > { %p2371_p3 = pneg %p2370_p0 }
  0x19   : > { %p2376_p7 = pnand %p2374_p5, %p2371_p3 }
  0x1b   : > { %2379 = shalt.err (!%p2376_p7)
}
  0x1c   : > { %s2380_s14 = scalar_lea.vmem %s2612_s28, 4096  ;;  %p2388_p2 = scmp.lt.s32.totalorder %s2612_s28, %s2612_s28 }
  0x1d   : > { %p2381_p9 = scmp.ne.s32.totalorder %s2612_s28, %s2380_s14  ;;  %p2389_p12 = scmp.lt.s32.totalorder %s2380_s14, %s2380_s14 }
  0x1f   : > { %p2383_p10 = pnand %p2381_p9, %p2369_p13  ;;  %p2390_p0 = por %p2389_p12, %p2388_p2 }
  0x21   : > { %p2384_p1 = pneg %p2383_p10 }
  0x23   : > { %p2391_p6 = pnand %p2390_p0, %p2384_p1 }
  0x25   : > { %2394 = shalt.err (!%p2391_p6)
}
  0x26   : > { %s2527_s15 = smov 256   ;;  %s2528_s16 = smov 16  }
  0x27   : > { %2194 = dma.hbm_to_vmem [thread:$0]  (!%p2619_p11), %s3116_s1, 4096, %s2612_s28, [#allocation6], %s2527_s15, %s2527_s15, %s2528_s16  }
  0x28   : > { %s2395_s7 = scalar_lea.hbm %s3118_s3, 4096 }
  0x29   : > { %p2396_p2 = scmp.ne.s32.totalorder %s3118_s3, %s2395_s7  ;;  %p2402_p10 = scmp.lt.u32.totalorder %s2395_s7, %s3118_s3 }
  0x2b   : > { %p2398_p1 = pnand %p2396_p2, %p2369_p13 }
  0x2d   : > { %p2399_p6 = pneg %p2398_p1 }
  0x2f   : > { %p2404_p3 = pnand %p2402_p10, %p2399_p6 }
  0x31   : > { %2407 = shalt.err (!%p2404_p3)
}
  0x32   : > { %s2408_s28 = scalar_lea.vmem %s2623_s6, 4096  ;;  %p2416_p12 = scmp.lt.s32.totalorder %s2623_s6, %s2623_s6 }
  0x33   : > { %p2409_p5 = scmp.ne.s32.totalorder %s2623_s6, %s2408_s28  ;;  %p2417_p0 = scmp.lt.s32.totalorder %s2408_s28, %s2408_s28 }
  0x35   : > { %p2411_p7 = pnand %p2409_p5, %p2369_p13  ;;  %p2418_p2 = por %p2417_p0, %p2416_p12 }
  0x37   : > { %p2412_p9 = pneg %p2411_p7 }
  0x39   : > { %p2419_p1 = pnand %p2418_p2, %p2412_p9 }
  0x3b   : > { %2422 = shalt.err (!%p2419_p1)
}
  0x3c   : > { %s2529_s12 = smov 64   ;;  %s2530_s13 = smov 4  }
  0x3d   : > { %2197 = dma.hbm_to_vmem [thread:$0]  (!%p2619_p11), %s3118_s3, 4096, %s2623_s6, [#allocation6], %s2529_s12, %s2529_s12, %s2530_s13  }
  0x3e   : > { %s2678_s16 = sadd.s32 1, %s2523_s21   ;;  %s29_s23 = sadd.s32 1, %s2519_s20 }
  0x3f   : > { %s26_s17 = ssub.s32 %s2523_s21, %s2678_s16  ;;  %p36_p6 = scmp.ne.s32.totalorder %s2519_s20, %s2515_s19 }
  0x40   : > { %p27_p13 = scmp.eq.s32.totalorder %s26_s17, 0  ;;  %p37_p10 = scmp.eq.s32.totalorder %s2523_s21, 0 }
  0x41   : > { %p3128_p5 = scmp.eq.s32.totalorder %s2589_s22, 1  ;;  %p2208_p9 = scmp.lt.s32.totalorder %s2523_s21, 2 }
  0x42   : > { %s2687_s27 = scalar_select %p27_p13, %s2519_s20, %s29_s23  }
  0x43   : > { %p38_p3 = por %p37_p10, %p36_p6  ;;  %p2691_p7 = por %p3128_p5, %p36_p6 }
  0x44   : > { %s208_s29 = sand.u32 1, %s2519_s20   ;;  %s1953_s6 = sshll.u32 %s2523_s21, 12 }
  0x45   : > { %s3129_s30 = scalar_select %p2691_p7, 1, 0 }
  0x46   : > { %s1875_s7 = sshll.u32 %s208_s29, 8  ;;  %s2701_s10 = scalar_lea.hbm %s3115_s0, %s1953_s6 }
  0x47   : > { %s212_s11 = scalar_lea.vmem [#allocation2], %s1875_s7  ;;  %p2705_p11 = pnand %p2208_p9, %p38_p3 }
  0x48   : > { %s219_s28 = sshll.u32 %s212_s11, 4  ;;  %s2709_s13 = scalar_lea.sflag [#allocation3], %s208_s29  ;;  %s2703_s28 = int_to_ptr.vmem [resolvable:$true] %s219_s28 }
  0x49   : > { %s2423_s14 = scalar_lea.hbm %s2701_s10, 4096  ;;  %p2425_p0 = pneg %p2705_p11 }
  0x4a   : > { %p2424_p12 = scmp.ne.s32.totalorder %s2701_s10, %s2423_s14  ;;  %s2428_s23 = scalar_lea.hbm %s3115_s0, 8192 }
  0x4b   : > { %p2429_p13 = scmp.lt.u32.totalorder %s2701_s10, %s3115_s0  ;;  %p2430_p6 = scmp.lt.u32.totalorder %s2428_s23, %s2423_s14 }
  0x4c   : > { %p2426_p2 = pnand %p2425_p0, %p2424_p12  ;;  %p2432_p3 = scmp.lt.u32.totalorder %s2423_s14, %s2701_s10 }
  0x4d   : > { %p2431_p10 = por %p2430_p6, %p2429_p13 }
  0x4e   : > { %p2427_p1 = pneg %p2426_p2 }
  0x4f   : > { %p2433_p5 = por %p2432_p3, %p2431_p10 }
  0x51   : > { %p2434_p9 = pnand %p2433_p5, %p2427_p1 }
  0x53   : > { %2437 = shalt.err (!%p2434_p9)
}
  0x54   : > { %s2438_s29 = scalar_lea.vmem %s2703_s28, 4096  ;;  %s2531_s8 = smov [#allocation2]  }
  0x55   : > { %p2439_p12 = scmp.ne.s32.totalorder %s2703_s28, %s2438_s29  ;;  %s2443_s9 = sshll.u32 %s2531_s8, 4  ;;  %s2444_s9 = int_to_ptr.vmem [resolvable:$false] %s2443_s9 }
  0x56   : > { %s2445_s11 = scalar_lea.vmem %s2444_s9, 8192  ;;  %p2446_p4 = scmp.lt.s32.totalorder %s2703_s28, %s2444_s9 }
  0x57   : > { %p2441_p2 = pnand %p2439_p12, %p2425_p0  ;;  %p2447_p13 = scmp.lt.s32.totalorder %s2445_s11, %s2438_s29 }
  0x59   : > { %p2442_p7 = pneg %p2441_p2  ;;  %p2448_p6 = por %p2447_p13, %p2446_p4 }
  0x5b   : > { %p2449_p10 = pnand %p2448_p6, %p2442_p7 }
  0x5d   : > { %2452 = shalt.err (!%p2449_p10)
}
  0x5e   : > { %s2532_s14 = smov 128   ;;  %s2533_s15 = smov 8  }
  0x5f   : > { %2201 = dma.hbm_to_vmem [thread:$0]  (!%p2705_p11), %s2701_s10, 4096, %s2703_s28, %s2709_s13, %s2532_s14, %s2532_s14, %s2533_s15  }
  0x60   : > { %231 = sbr.rel (%p2608_p8) target bundleno = 721 (0x2d1), region = 40  ;;  %s2740_s17 = sand.u32 (!%p2608_p8), 1, %s2515_s19  }
  0x61   : > { %s1879_s23 = sshll.u32 (!%p2608_p8), %s2740_s17, 8  ;;  %s234_s7 = scalar_lea.sflag (!%p2608_p8), [#allocation3], %s2740_s17 }
  0x62   : > { %s2746_s6 = scalar_lea.vmem (!%p2608_p8), [#allocation2], %s1879_s23  ;;  %p3131_p4 = scmp.ne.s32.totalorder (!%p2608_p8), %s3124_s24, 0 }
  0x67   : > { %2498 = dma.done.wait (%p3131_p4), %s234_s7, 4096  }
  0x68   : > { %2500 = vsyncadd (%p3131_p4), %s234_s7, 4294963200  ;;  %p3132_p7 = scmp.eq.s32.totalorder %s2589_s22, 0 }
  0x6a   : > { %2502 = dma.done.wait (%p3132_p7), [#allocation6], 8192   ;;  %p3133_p8 = pmov %p3132_p7 }
  0x6b   : > { %v2534_v0 = vmov 0   ;;  %v2255_v1 = vld [vmem:[#allocation5 + $0x4] ss:$16 sps:$4 sm:$0xff]   ;;  %v2257_v2 = vld [vmem:[#allocation5 + $0xc] ss:$16 sps:$4 sm:$0xff]   ;;  %s2969_s12 = scalar_lea.vmem [#allocation8], %s1879_s23 }
  0x6c   : > { %2504 = vsyncadd (%p3133_p8), [#allocation6], 4294959104  ;;  %569 = vmatprep.mubr.bf16.mxu0 %v2534_v0  ;;  %762 = vmatprep.mubr.bf16.mxu1 %v2534_v0  ;;  %v2259_v3 = vld [vmem:[#allocation5] ss:$16 sps:$4 sm:$0xff]   ;;  %v2260_v4 = vld [vmem:[#allocation5 + $0x8] ss:$16 sps:$4 sm:$0xff]  }
  0x6d   : > { %537 = vmatprep.subr.bf16.mxu0 %v2255_v1  ;;  %730 = vmatprep.subr.bf16.mxu1 %v2257_v2  ;;  %v2261_v5 = vld [vmem:[#allocation5 + $0x24] ss:$16 sps:$4 sm:$0xff]   ;;  %v2263_v6 = vld [vmem:[#allocation5 + $0x2c] ss:$16 sps:$4 sm:$0xff]   ;;  %v2265_v7 = vld [vmem:[#allocation5 + $0x20] ss:$16 sps:$4 sm:$0xff]  }
  0x6e   : > { %538 = vmatpush1.bf16.msra.mxu0 %v2259_v3  ;;  %731 = vmatpush1.bf16.msra.mxu1 %v2260_v4  ;;  %v2266_v8 = vld [vmem:[#allocation5 + $0x28] ss:$16 sps:$4 sm:$0xff]   ;;  %v2267_v9 = vld [vmem:[#allocation5 + $0x44] ss:$16 sps:$4 sm:$0xff]   ;;  %v2269_v10 = vld [vmem:[#allocation5 + $0x4c] ss:$16 sps:$4 sm:$0xff]  }
  0x6f   : > { %539 = vmatprep.subr.bf16.mxu0 %v2261_v5  ;;  %732 = vmatprep.subr.bf16.mxu1 %v2263_v6  ;;  %v2271_v11 = vld [vmem:[#allocation5 + $0x40] ss:$16 sps:$4 sm:$0xff]   ;;  %v2272_v12 = vld [vmem:[#allocation5 + $0x48] ss:$16 sps:$4 sm:$0xff]   ;;  %v2273_v13 = vld [vmem:[#allocation5 + $0x64] ss:$16 sps:$4 sm:$0xff]  }
  0x70   : > { %v2275_v14 = vld [vmem:[#allocation5 + $0x6c] ss:$16 sps:$4 sm:$0xff]   ;;  %v2277_v15 = vld [vmem:[#allocation5 + $0x60] ss:$16 sps:$4 sm:$0xff]   ;;  %v2278_v16 = vld [vmem:[#allocation5 + $0x68] ss:$16 sps:$4 sm:$0xff]  }
  0x71   : > { %v2279_v17 = vld [vmem:[#allocation5 + $0x84] ss:$16 sps:$4 sm:$0xff]   ;;  %v2281_v18 = vld [vmem:[#allocation5 + $0x8c] ss:$16 sps:$4 sm:$0xff]   ;;  %v2283_v19 = vld [vmem:[#allocation5 + $0x80] ss:$16 sps:$4 sm:$0xff]  }
  0x72   : > { %540 = vmatpush1.bf16.msra.mxu0 %v2265_v7  ;;  %733 = vmatpush1.bf16.msra.mxu1 %v2266_v8  ;;  %v2284_v20 = vld [vmem:[#allocation5 + $0x88] ss:$16 sps:$4 sm:$0xff]   ;;  %v2285_v21 = vld [vmem:[#allocation5 + $0xa4] ss:$16 sps:$4 sm:$0xff]   ;;  %v2287_v22 = vld [vmem:[#allocation5 + $0xac] ss:$16 sps:$4 sm:$0xff]  }
  0x73   : > { %541 = vmatprep.subr.bf16.mxu0 %v2267_v9  ;;  %734 = vmatprep.subr.bf16.mxu1 %v2269_v10  ;;  %v2289_v23 = vld [vmem:[#allocation5 + $0xa0] ss:$16 sps:$4 sm:$0xff]   ;;  %v2290_v24 = vld [vmem:[#allocation5 + $0xa8] ss:$16 sps:$4 sm:$0xff]   ;;  %v2291_v25 = vld [vmem:[#allocation5 + $0xc4] ss:$16 sps:$4 sm:$0xff]  }
  0x74   : > { %v2293_v26 = vld [vmem:[#allocation5 + $0xcc] ss:$16 sps:$4 sm:$0xff]   ;;  %v2295_v27 = vld [vmem:[#allocation5 + $0xc0] ss:$16 sps:$4 sm:$0xff]   ;;  %v2296_v28 = vld [vmem:[#allocation5 + $0xc8] ss:$16 sps:$4 sm:$0xff]  }
  0x75   : > { %v2297_v29 = vld [vmem:[#allocation5 + $0xe4] ss:$16 sps:$4 sm:$0xff]   ;;  %v2299_v30 = vld [vmem:[#allocation5 + $0xec] ss:$16 sps:$4 sm:$0xff]   ;;  %v2301_v31 = vld [vmem:[#allocation5 + $0xe0] ss:$16 sps:$4 sm:$0xff]  }
  0x76   : > { %542 = vmatpush1.bf16.msra.mxu0 %v2271_v11  ;;  %735 = vmatpush1.bf16.msra.mxu1 %v2272_v12  ;;  %v2302_v32 = vld [vmem:[#allocation5 + $0xe8] ss:$16 sps:$4 sm:$0xff]   ;;  %v275_v33 = vld [vmem:[%s2746_s6] sm:$0xff]  ;;  %v277_v40 = vld [vmem:[%s2746_s6 + $0x10] sm:$0xff]  ;;  %s1954_s13 = sshll.u32 %s2589_s22, 12  ;;  %s1778_s29 = sshll.u32 %s2969_s12, 4  ;;  %s3068_s29 = int_to_ptr.vmem [resolvable:$true] %s1778_s29 }
  0x77   : > { %543 = vmatprep.subr.bf16.mxu0 %v2273_v13  ;;  %736 = vmatprep.subr.bf16.mxu1 %v2275_v14  ;;  %v276_v34 = vld [vmem:[%s2746_s6 + $0x8] sm:$0xff]  ;;  %v2303_v35 = vld [vmem:[#allocation7 + $0x40] sm:$0xff]   ;;  %v278_v42 = vld [vmem:[%s2746_s6 + $0x18] sm:$0xff]  ;;  %s3066_s11 = scalar_lea.hbm %s3120_s5, %s1954_s13  ;;  %s1765_s14 = scalar_lea.sflag [#allocation4], %s2740_s17 }
  0x78   : > { %v307_v36 = vpack.c.bf16 %v276_v34, %v275_v33  ;;  %v2304_v37 = vld [vmem:[#allocation7] sm:$0xff]   ;;  %v2307_v41 = vld [vmem:[#allocation7 + $0x48] sm:$0xff]   ;;  %v308_v45 = vpack.c.bf16 %v278_v42, %v277_v40  ;;  %v2311_v47 = vld [vmem:[#allocation7 + $0x50] sm:$0xff]   ;;  %s2453_s22 = scalar_lea.vmem %s3068_s29, 4096  ;;  %p3134_p0 = scmp.ne.s32.totalorder %s3129_s30, 0 }
  0x79   : > { %v2305_v38 = vld [vmem:[#allocation7 + $0xc0] sm:$0xff]   ;;  %v2308_v43 = vld [vmem:[#allocation7 + $0x8] sm:$0xff]   ;;  %v2312_v48 = vld [vmem:[#allocation7 + $0x10] sm:$0xff]   ;;  %p2454_p11 = scmp.ne.s32.totalorder %s3068_s29, %s2453_s22  ;;  %s2535_s15 = smov [#allocation8]  }
  0x7a   : > { %544 = vmatpush1.bf16.msra.mxu0 %v2277_v15  ;;  %737 = vmatpush1.bf16.msra.mxu1 %v2278_v16  ;;  %v2306_v39 = vld [vmem:[#allocation7 + $0x80] sm:$0xff]   ;;  %v2309_v44 = vld [vmem:[#allocation7 + $0xc8] sm:$0xff]   ;;  %v2313_v51 = vld [vmem:[#allocation7 + $0xd0] sm:$0xff]   ;;  %s2457_s23 = sshll.u32 %s2535_s15, 4  ;;  %s2458_s23 = int_to_ptr.vmem [resolvable:$false] %s2457_s23 }
  0x7b   : > { %545 = vmatprep.subr.bf16.mxu0 %v2279_v17  ;;  %738 = vmatprep.subr.bf16.mxu1 %v2281_v18  ;;  %v2310_v46 = vld [vmem:[#allocation7 + $0x88] sm:$0xff]   ;;  %v279_v49 = vld [vmem:[%s2746_s6 + $0x20] sm:$0xff]  ;;  %v2314_v52 = vld [vmem:[#allocation7 + $0x90] sm:$0xff]   ;;  %p2455_p1 = pnand %p2454_p11, %p3134_p0  ;;  %s2459_s7 = scalar_lea.vmem %s2458_s23, 8192 }
  0x7c   : > { %v280_v50 = vld [vmem:[%s2746_s6 + $0x28] sm:$0xff]  ;;  %v2315_v53 = vld [vmem:[#allocation7 + $0x58] sm:$0xff]   ;;  %v2319_v58 = vld [vmem:[#allocation7 + $0x60] sm:$0xff]   ;;  %p2460_p5 = scmp.lt.s32.totalorder %s3068_s29, %s2458_s23  ;;  %p2461_p9 = scmp.lt.s32.totalorder %s2459_s7, %s2453_s22 }
  0x7d   : > { %v2316_v54 = vld [vmem:[#allocation7 + $0x18] sm:$0xff]   ;;  %v309_v56 = vpack.c.bf16 %v280_v50, %v279_v49  ;;  %v2320_v59 = vld [vmem:[#allocation7 + $0x20] sm:$0xff]   ;;  %v281_v60 = vld [vmem:[%s2746_s6 + $0x30] sm:$0xff]  ;;  %v357_v50 = vlaneseq  ;;  %p2456_p3 = pneg %p2455_p1 }
  0x7e   : > { %546 = vmatpush1.bf16.msra.mxu0 %v2283_v19  ;;  %739 = vmatpush1.bf16.msra.mxu1 %v2284_v20  ;;  %v2317_v55 = vld [vmem:[#allocation7 + $0xd8] sm:$0xff]   ;;  %v2321_v62 = vld [vmem:[#allocation7 + $0xe0] sm:$0xff]   ;;  %v2323_v1 = vld [vmem:[#allocation7 + $0x68] sm:$0xff]   ;;  %p2462_p12 = por %p2461_p9, %p2460_p5 }
  0x7f   : > { %547 = vmatprep.subr.bf16.mxu0 %v2285_v21  ;;  %740 = vmatprep.subr.bf16.mxu1 %v2287_v22  ;;  %v2318_v57 = vld [vmem:[#allocation7 + $0x98] sm:$0xff]   ;;  %v2322_v63 = vld [vmem:[#allocation7 + $0xa0] sm:$0xff]   ;;  %v2324_v2 = vld [vmem:[#allocation7 + $0x28] sm:$0xff]  }
  0x80   : > { %v282_v61 = vld [vmem:[%s2746_s6 + $0x38] sm:$0xff]  ;;  %v2325_v3 = vld [vmem:[#allocation7 + $0xe8] sm:$0xff]   ;;  %v2327_v6 = vld [vmem:[#allocation7 + $0x70] sm:$0xff]   ;;  %p2463_p2 = pnand %p2462_p12, %p2456_p3 }
  0x81   : > { %v310_v4 = vpack.c.bf16 %v282_v61, %v281_v60  ;;  %v2326_v5 = vld [vmem:[#allocation7 + $0xa8] sm:$0xff]   ;;  %v2328_v7 = vld [vmem:[#allocation7 + $0x30] sm:$0xff]   ;;  %v283_v8 = vld [vmem:[%s2746_s6 + $0x40] sm:$0xff] }
  0x82   : > { %548 = vmatpush1.bf16.msra.mxu0 %v2289_v23  ;;  %741 = vmatpush1.bf16.msra.mxu1 %v2290_v24  ;;  %v284_v9 = vld [vmem:[%s2746_s6 + $0x48] sm:$0xff]  ;;  %v2329_v10 = vld [vmem:[#allocation7 + $0xf0] sm:$0xff]   ;;  %v2331_v12 = vld [vmem:[#allocation7 + $0x78] sm:$0xff]  }
  0x83   : > { %549 = vmatprep.subr.bf16.mxu0 %v2291_v25  ;;  %742 = vmatprep.subr.bf16.mxu1 %v2293_v26  ;;  %v2330_v11 = vld [vmem:[#allocation7 + $0xb0] sm:$0xff]   ;;  %v2332_v13 = vld [vmem:[#allocation7 + $0x38] sm:$0xff]   ;;  %v311_v15 = vpack.c.bf16 %v284_v9, %v283_v8  ;;  %v287_v20 = vld [vmem:[%s2746_s6 + $0x60] sm:$0xff] }
  0x84   : > { %v2333_v14 = vld [vmem:[#allocation7 + $0xf8] sm:$0xff]   ;;  %v285_v17 = vld [vmem:[%s2746_s6 + $0x50] sm:$0xff]  ;;  %v288_v21 = vld [vmem:[%s2746_s6 + $0x68] sm:$0xff] }
  0x85   : > { %v2334_v16 = vld [vmem:[#allocation7 + $0xb8] sm:$0xff]   ;;  %v313_v22 = vpack.c.bf16 %v288_v21, %v287_v20  ;;  %v289_v23 = vld [vmem:[%s2746_s6 + $0x70] sm:$0xff]  ;;  %v291_v26 = vld [vmem:[%s2746_s6 + $0x80] sm:$0xff] }
  0x86   : > { %550 = vmatpush1.bf16.msra.mxu0 %v2295_v27  ;;  %743 = vmatpush1.bf16.msra.mxu1 %v2296_v28  ;;  %v286_v18 = vld [vmem:[%s2746_s6 + $0x58] sm:$0xff]  ;;  %v292_v27 = vld [vmem:[%s2746_s6 + $0x88] sm:$0xff] }
  0x87   : > { %551 = vmatprep.subr.bf16.mxu0 %v2297_v29  ;;  %744 = vmatprep.subr.bf16.mxu1 %v2299_v30  ;;  %v312_v19 = vpack.c.bf16 %v286_v18, %v285_v17  ;;  %v290_v24 = vld [vmem:[%s2746_s6 + $0x78] sm:$0xff]  ;;  %v315_v28 = vpack.c.bf16 %v292_v27, %v291_v26  ;;  %v293_v29 = vld [vmem:[%s2746_s6 + $0x90] sm:$0xff]  ;;  %v296_v33 = vld [vmem:[%s2746_s6 + $0xa8] sm:$0xff] }
  0x88   : > { %v314_v25 = vpack.c.bf16 %v290_v24, %v289_v23  ;;  %v294_v30 = vld [vmem:[%s2746_s6 + $0x98] sm:$0xff] }
  0x89   : > { %v302_v42 = vld [vmem:[%s2746_s6 + $0xd8] sm:$0xff] }
  0x8a   : > { %552 = vmatpush1.bf16.msra.mxu0 %v2301_v31  ;;  %745 = vmatpush1.bf16.msra.mxu1 %v2302_v32  ;;  %v316_v31 = vpack.c.bf16 %v294_v30, %v293_v29  ;;  %v295_v32 = vld [vmem:[%s2746_s6 + $0xa0] sm:$0xff] }
  0x8b   : > { %1955 = vmatprep.subr.bf16.mxu0 %v2303_v35  ;;  %2067 = vmatprep.subr.bf16.mxu1 %v2305_v38  ;;  %v317_v34 = vpack.c.bf16 %v296_v33, %v295_v32  ;;  %v297_v35 = vld [vmem:[%s2746_s6 + $0xb0] sm:$0xff]  ;;  %v299_v38 = vld [vmem:[%s2746_s6 + $0xc0] sm:$0xff] }
  0x8d   : > { %570 = vmatmul.mubr.bf16.vlgmr.msra.gmra.mrb[0].mxu0 %v307_v36  ;;  %763 = vmatmul.mubr.bf16.vlgmr.msra.gmra.mrb[0].mxu1 %v307_v36  ;;  %v298_v36 = vld [vmem:[%s2746_s6 + $0xb8] sm:$0xff] }
  0x8e   : > { %579 = vmatprep.mubr.bf16.mxu0 %v2534_v0  ;;  %772 = vmatprep.mubr.bf16.mxu1 %v2534_v0 }
  0x8f   : > { %1956 = vmatpush3.bf16.msra.mxu0 %v2304_v37  ;;  %2068 = vmatpush3.bf16.msra.mxu1 %v2306_v39  ;;  %v318_v37 = vpack.c.bf16 %v298_v36, %v297_v35  ;;  %v300_v39 = vld [vmem:[%s2746_s6 + $0xc8] sm:$0xff] }
  0x90   : > { %1957 = vmatprep.subr.bf16.mxu0 %v2307_v41  ;;  %2069 = vmatprep.subr.bf16.mxu1 %v2309_v44  ;;  %v319_v40 = vpack.c.bf16 %v300_v39, %v299_v38  ;;  %v301_v41 = vld [vmem:[%s2746_s6 + $0xd0] sm:$0xff]  ;;  %v303_v44 = vld [vmem:[%s2746_s6 + $0xe0] sm:$0xff] }
  0x93   : > { %1958 = vmatpush3.bf16.msra.mxu0 %v2308_v43  ;;  %2070 = vmatpush3.bf16.msra.mxu1 %v2310_v46  ;;  %v320_v43 = vpack.c.bf16 %v302_v42, %v301_v41 }
  0x94   : > { %1959 = vmatprep.subr.bf16.mxu0 %v2311_v47  ;;  %2071 = vmatprep.subr.bf16.mxu1 %v2313_v51  ;;  %v305_v47 = vld [vmem:[%s2746_s6 + $0xf0] sm:$0xff]  ;;  %v358_v51 = vshrl.u32 %v357_v50, 7 }
  0x95   : > { %580 = vmatmul.mubr.bf16.gmra.mrb[4].mxu0 %v308_v45  ;;  %773 = vmatmul.mubr.bf16.gmra.mrb[4].mxu1 %v308_v45  ;;  %v304_v45 = vld [vmem:[%s2746_s6 + $0xe8] sm:$0xff] }
  0x96   : > { %589 = vmatprep.mubr.bf16.mxu0 %v2534_v0  ;;  %782 = vmatprep.mubr.bf16.mxu1 %v2534_v0  ;;  %v321_v46 = vpack.c.bf16 %v304_v45, %v303_v44 }
  0x97   : > { %1960 = vmatpush3.bf16.msra.mxu0 %v2312_v48  ;;  %2072 = vmatpush3.bf16.msra.mxu1 %v2314_v52  ;;  %v306_v48 = vld [vmem:[%s2746_s6 + $0xf8] sm:$0xff]  ;;  %v359_v52 = vsub.s32 0, %v358_v51 }
  0x98   : > { %1961 = vmatprep.subr.bf16.mxu0 %v2315_v53  ;;  %2073 = vmatprep.subr.bf16.mxu1 %v2317_v55  ;;  %v322_v49 = vpack.c.bf16 %v306_v48, %v305_v47  ;;  %v367_v53 = vsub.s32 2, %v358_v51  ;;  %v363_v55 = vsub.s32 1, %v358_v51 }
  0x9b   : > { %1962 = vmatpush3.bf16.msra.mxu0 %v2316_v54  ;;  %2074 = vmatpush3.bf16.msra.mxu1 %v2318_v57  ;;  %v355_v54 = vld [vmem:[%s3117_s2] sm:$0xf] }
  0x9c   : > { %1963 = vmatprep.subr.bf16.mxu0 %v2319_v58  ;;  %2075 = vmatprep.subr.bf16.mxu1 %v2321_v62  ;;  %v2823_v57 = vrot.slane %v355_v54, %v359_v52  ;;  %v2825_v58 = vrot.slane %v355_v54, %v367_v53 }
  0x9d   : > { %590 = vmatmul.mubr.bf16.gmra.mrb[8].mxu0 %v309_v56  ;;  %783 = vmatmul.mubr.bf16.gmra.mrb[8].mxu1 %v309_v56  ;;  %v371_v56 = vsub.s32 3, %v358_v51 }
  0x9e   : > { %599 = vmatprep.mubr.bf16.mxu0 %v2534_v0  ;;  %792 = vmatprep.mubr.bf16.mxu1 %v2534_v0 }
  0x9f   : > { %1964 = vmatpush3.bf16.msra.mxu0 %v2320_v59  ;;  %2076 = vmatpush3.bf16.msra.mxu1 %v2322_v63  ;;  %v2829_v59 = vrot.slane %v355_v54, %v371_v56 }
  0xa0   : > { %1965 = vmatprep.subr.bf16.mxu0 %v2323_v1  ;;  %2077 = vmatprep.subr.bf16.mxu1 %v2325_v3 }
  0xa3   : > { %1966 = vmatpush3.bf16.msra.mxu0 %v2324_v2  ;;  %2078 = vmatpush3.bf16.msra.mxu1 %v2326_v5 }
  0xa4   : > { %1967 = vmatprep.subr.bf16.mxu0 %v2327_v6  ;;  %2079 = vmatprep.subr.bf16.mxu1 %v2329_v10 }
  0xa5   : > { %600 = vmatmul.mubr.bf16.gmra.mrb[12].mxu0 %v310_v4  ;;  %793 = vmatmul.mubr.bf16.gmra.mrb[12].mxu1 %v310_v4 }
  0xa6   : > { %609 = vmatprep.mubr.bf16.mxu0 %v2534_v0  ;;  %802 = vmatprep.mubr.bf16.mxu1 %v2534_v0 }
  0xa7   : > { %1968 = vmatpush3.bf16.msra.mxu0 %v2328_v7  ;;  %2080 = vmatpush3.bf16.msra.mxu1 %v2330_v11 }
  0xa8   : > { %1969 = vmatprep.subr.bf16.mxu0 %v2331_v12  ;;  %2081 = vmatprep.subr.bf16.mxu1 %v2333_v14 }
  0xab   : > { %1970 = vmatpush3.bf16.msra.mxu0 %v2332_v13  ;;  %2082 = vmatpush3.bf16.msra.mxu1 %v2334_v16 }
  0xad   : > { %610 = vmatmul.mubr.bf16.gmra.mrb[16].mxu0 %v311_v15  ;;  %803 = vmatmul.mubr.bf16.gmra.mrb[16].mxu1 %v311_v15 }
  0xae   : > { %619 = vmatprep.mubr.bf16.mxu0 %v2534_v0  ;;  %812 = vmatprep.mubr.bf16.mxu1 %v2534_v0 }
  0xb5   : > { %620 = vmatmul.mubr.bf16.gmra.mrb[20].mxu0 %v312_v19  ;;  %813 = vmatmul.mubr.bf16.gmra.mrb[20].mxu1 %v312_v19 }
  0xb6   : > { %629 = vmatprep.mubr.bf16.mxu0 %v2534_v0  ;;  %822 = vmatprep.mubr.bf16.mxu1 %v2534_v0 }
  0xbd   : > { %630 = vmatmul.mubr.bf16.gmra.mrb[24].mxu0 %v313_v22  ;;  %823 = vmatmul.mubr.bf16.gmra.mrb[24].mxu1 %v313_v22 }
  0xbe   : > { %639 = vmatprep.mubr.bf16.mxu0 %v2534_v0  ;;  %832 = vmatprep.mubr.bf16.mxu1 %v2534_v0 }
  0xc5   : > { %640 = vmatmul.mubr.bf16.gmra.mrb[28].mxu0 %v314_v25  ;;  %833 = vmatmul.mubr.bf16.gmra.mrb[28].mxu1 %v314_v25 }
  0xc6   : > { %649 = vmatprep.mubr.bf16.mxu0 %v2534_v0  ;;  %842 = vmatprep.mubr.bf16.mxu1 %v2534_v0 }
  0xcd   : > { %650 = vmatmul.mubr.bf16.gmra.mrb[32].mxu0 %v315_v28  ;;  %843 = vmatmul.mubr.bf16.gmra.mrb[32].mxu1 %v315_v28 }
  0xce   : > { %659 = vmatprep.mubr.bf16.mxu0 %v2534_v0  ;;  %852 = vmatprep.mubr.bf16.mxu1 %v2534_v0 }
  0xd5   : > { %660 = vmatmul.mubr.bf16.gmra.mrb[36].mxu0 %v316_v31  ;;  %853 = vmatmul.mubr.bf16.gmra.mrb[36].mxu1 %v316_v31 }
  0xd6   : > { %669 = vmatprep.mubr.bf16.mxu0 %v2534_v0  ;;  %862 = vmatprep.mubr.bf16.mxu1 %v2534_v0 }
  0xdd   : > { %670 = vmatmul.mubr.bf16.gmra.mrb[40].mxu0 %v317_v34  ;;  %863 = vmatmul.mubr.bf16.gmra.mrb[40].mxu1 %v317_v34 }
  0xde   : > { %679 = vmatprep.mubr.bf16.mxu0 %v2534_v0  ;;  %872 = vmatprep.mubr.bf16.mxu1 %v2534_v0 }
  0xe5   : > { %680 = vmatmul.mubr.bf16.gmra.mrb[44].mxu0 %v318_v37  ;;  %873 = vmatmul.mubr.bf16.gmra.mrb[44].mxu1 %v318_v37 }
  0xe6   : > { %689 = vmatprep.mubr.bf16.mxu0 %v2534_v0  ;;  %882 = vmatprep.mubr.bf16.mxu1 %v2534_v0 }
  0xed   : > { %690 = vmatmul.mubr.bf16.gmra.mrb[48].mxu0 %v319_v40  ;;  %883 = vmatmul.mubr.bf16.gmra.mrb[48].mxu1 %v319_v40 }
  0xee   : > { %699 = vmatprep.mubr.bf16.mxu0 %v2534_v0  ;;  %892 = vmatprep.mubr.bf16.mxu1 %v2534_v0 }
  0xf5   : > { %700 = vmatmul.mubr.bf16.gmra.mrb[52].mxu0 %v320_v43  ;;  %893 = vmatmul.mubr.bf16.gmra.mrb[52].mxu1 %v320_v43 }
  0xf6   : > { %709 = vmatprep.mubr.bf16.mxu0 %v2534_v0  ;;  %902 = vmatprep.mubr.bf16.mxu1 %v2534_v0 }
  0xfd   : > { %710 = vmatmul.mubr.bf16.gmra.mrb[56].mxu0 %v321_v46  ;;  %903 = vmatmul.mubr.bf16.gmra.mrb[56].mxu1 %v321_v46 }
  0xfe   : > { %719 = vmatprep.mubr.bf16.mxu0 %v2534_v0  ;;  %912 = vmatprep.mubr.bf16.mxu1 %v2534_v0  ;;  %v2827_v0 = vrot.slane %v355_v54, %v363_v55 }
 0x105   : > { %720 = vmatmul.mubr.bf16.gmra.mrb[60].mxu0 %v322_v49  ;;  %913 = vmatmul.mubr.bf16.gmra.mrb[60].mxu1 %v322_v49 }
 0x160   : > { %v571_v60 = vpop.f32.mrb[0].mxu0  ;;  %v764_v61 = vpop.f32.mrb[0].mxu1 }
 0x161   : > { %v572_v62 = vadd.f32 %v571_v60, %v2823_v57  ;;  %v765_v63 = vadd.f32 %v764_v61, %v2825_v58  ;;  %v573_v1 = vpop.f32.mrb[1].mxu0  ;;  %v766_v2 = vpop.f32.mrb[1].mxu1 }
 0x162   : > { %v574_v3 = vadd.f32 %v573_v1, %v2827_v0  ;;  %v767_v4 = vadd.f32 %v766_v2, %v2829_v59  ;;  %v575_v5 = vpop.f32.mrb[2].mxu0  ;;  %v768_v6 = vpop.f32.mrb[2].mxu1 }
 0x163   : > { %v925_v7 = vmax.f32 %v765_v63, 0.0  ;;  %v576_v8 = vadd.f32 %v575_v5, %v2823_v57  ;;  %v769_v9 = vadd.f32 %v768_v6, %v2825_v58  ;;  %v577_v10 = vpop.f32.mrb[3].mxu0  ;;  %v770_v11 = vpop.f32.mrb[3].mxu1  ;;  %v923_v15 = vmax.f32 %v572_v62, 0.0 }
 0x164   : > { %v926_v12 = vmax.f32 %v767_v4, 0.0  ;;  %v578_v13 = vadd.f32 %v577_v10, %v2827_v0  ;;  %v771_v14 = vadd.f32 %v770_v11, %v2829_v59  ;;  %v924_v18 = vmax.f32 %v574_v3, 0.0 }
 0x165   : > { %v927_v16 = vmax.f32 %v576_v8, 0.0  ;;  %v929_v17 = vmax.f32 %v769_v9, 0.0 }
 0x166   : > { %v928_v19 = vmax.f32 %v578_v13, 0.0  ;;  %v930_v20 = vmax.f32 %v771_v14, 0.0 }
 0x167   : > { %v1051_v21 = vpack.c.bf16 %v927_v16, %v923_v15  ;;  %v1053_v22 = vpack.c.bf16 %v929_v17, %v925_v7 }
 0x168   : > { %v1052_v23 = vpack.c.bf16 %v928_v19, %v924_v18  ;;  %v1054_v24 = vpack.c.bf16 %v930_v20, %v926_v12  ;;  %v581_v25 = vpop.f32.mrb[4].mxu0  ;;  %v774_v26 = vpop.f32.mrb[4].mxu1 }
 0x169   : > { %v582_v27 = vadd.f32 %v581_v25, %v2823_v57  ;;  %v775_v28 = vadd.f32 %v774_v26, %v2825_v58  ;;  %v583_v29 = vpop.f32.mrb[5].mxu0  ;;  %v776_v30 = vpop.f32.mrb[5].mxu1 }
 0x16a   : > { %v584_v31 = vadd.f32 %v583_v29, %v2827_v0  ;;  %v777_v32 = vadd.f32 %v776_v30, %v2829_v59  ;;  %v585_v33 = vpop.f32.mrb[6].mxu0  ;;  %v778_v34 = vpop.f32.mrb[6].mxu1  ;;  %1410 = vmatprep.mubr.bf16.mxu0 %v1052_v23  ;;  %1571 = vmatprep.mubr.bf16.mxu1 %v1054_v24 }
 0x16b   : > { %v933_v35 = vmax.f32 %v775_v28, 0.0  ;;  %v586_v36 = vadd.f32 %v585_v33, %v2823_v57  ;;  %v779_v37 = vadd.f32 %v778_v34, %v2825_v58  ;;  %v587_v38 = vpop.f32.mrb[7].mxu0  ;;  %v780_v39 = vpop.f32.mrb[7].mxu1  ;;  %1411 = vmatmul.mubr.bf16.vlgmr.msra.gmra.mrb[64].mxu0 %v1051_v21  ;;  %1572 = vmatmul.mubr.bf16.vlgmr.msra.gmra.mrb[64].mxu1 %v1053_v22  ;;  %v931_v43 = vmax.f32 %v582_v27, 0.0 }
 0x16c   : > { %v934_v40 = vmax.f32 %v777_v32, 0.0  ;;  %v588_v41 = vadd.f32 %v587_v38, %v2827_v0  ;;  %v781_v42 = vadd.f32 %v780_v39, %v2829_v59  ;;  %v932_v46 = vmax.f32 %v584_v31, 0.0 }
 0x16d   : > { %v935_v44 = vmax.f32 %v586_v36, 0.0  ;;  %v937_v45 = vmax.f32 %v779_v37, 0.0 }
 0x16e   : > { %v936_v47 = vmax.f32 %v588_v41, 0.0  ;;  %v938_v48 = vmax.f32 %v781_v42, 0.0 }
 0x16f   : > { %v1055_v49 = vpack.c.bf16 %v935_v44, %v931_v43  ;;  %v1057_v50 = vpack.c.bf16 %v937_v45, %v933_v35 }
 0x170   : > { %v1056_v51 = vpack.c.bf16 %v936_v47, %v932_v46  ;;  %v1058_v52 = vpack.c.bf16 %v938_v48, %v934_v40  ;;  %v591_v53 = vpop.f32.mrb[8].mxu0  ;;  %v784_v54 = vpop.f32.mrb[8].mxu1 }
 0x171   : > { %v592_v55 = vadd.f32 %v591_v53, %v2823_v57  ;;  %v785_v56 = vadd.f32 %v784_v54, %v2825_v58  ;;  %v593_v60 = vpop.f32.mrb[9].mxu0  ;;  %v786_v61 = vpop.f32.mrb[9].mxu1 }
 0x172   : > { %v594_v62 = vadd.f32 %v593_v60, %v2827_v0  ;;  %v787_v63 = vadd.f32 %v786_v61, %v2829_v59  ;;  %v595_v1 = vpop.f32.mrb[10].mxu0  ;;  %v788_v2 = vpop.f32.mrb[10].mxu1  ;;  %1418 = vmatprep.mubr.bf16.mxu0 %v1056_v51  ;;  %1579 = vmatprep.mubr.bf16.mxu1 %v1058_v52 }
 0x173   : > { %v941_v3 = vmax.f32 %v785_v56, 0.0  ;;  %v596_v4 = vadd.f32 %v595_v1, %v2823_v57  ;;  %v789_v5 = vadd.f32 %v788_v2, %v2825_v58  ;;  %v597_v6 = vpop.f32.mrb[11].mxu0  ;;  %v790_v7 = vpop.f32.mrb[11].mxu1  ;;  %1419 = vmatmul.mubr.bf16.gmra.mrb[68].mxu0 %v1055_v49  ;;  %1580 = vmatmul.mubr.bf16.gmra.mrb[68].mxu1 %v1057_v50  ;;  %v939_v11 = vmax.f32 %v592_v55, 0.0 }
 0x174   : > { %v942_v8 = vmax.f32 %v787_v63, 0.0  ;;  %v598_v9 = vadd.f32 %v597_v6, %v2827_v0  ;;  %v791_v10 = vadd.f32 %v790_v7, %v2829_v59  ;;  %v940_v14 = vmax.f32 %v594_v62, 0.0 }
 0x175   : > { %v943_v12 = vmax.f32 %v596_v4, 0.0  ;;  %v945_v13 = vmax.f32 %v789_v5, 0.0 }
 0x176   : > { %v944_v15 = vmax.f32 %v598_v9, 0.0  ;;  %v946_v16 = vmax.f32 %v791_v10, 0.0 }
 0x177   : > { %v1059_v17 = vpack.c.bf16 %v943_v12, %v939_v11  ;;  %v1061_v18 = vpack.c.bf16 %v945_v13, %v941_v3 }
 0x178   : > { %v1060_v19 = vpack.c.bf16 %v944_v15, %v940_v14  ;;  %v1062_v20 = vpack.c.bf16 %v946_v16, %v942_v8  ;;  %v601_v21 = vpop.f32.mrb[12].mxu0  ;;  %v794_v22 = vpop.f32.mrb[12].mxu1 }
 0x179   : > { %v602_v23 = vadd.f32 %v601_v21, %v2823_v57  ;;  %v795_v24 = vadd.f32 %v794_v22, %v2825_v58  ;;  %v603_v25 = vpop.f32.mrb[13].mxu0  ;;  %v796_v26 = vpop.f32.mrb[13].mxu1 }
 0x17a   : > { %v604_v27 = vadd.f32 %v603_v25, %v2827_v0  ;;  %v797_v28 = vadd.f32 %v796_v26, %v2829_v59  ;;  %v605_v29 = vpop.f32.mrb[14].mxu0  ;;  %v798_v30 = vpop.f32.mrb[14].mxu1  ;;  %1426 = vmatprep.mubr.bf16.mxu0 %v1060_v19  ;;  %1587 = vmatprep.mubr.bf16.mxu1 %v1062_v20 }
 0x17b   : > { %v949_v31 = vmax.f32 %v795_v24, 0.0  ;;  %v606_v32 = vadd.f32 %v605_v29, %v2823_v57  ;;  %v799_v33 = vadd.f32 %v798_v30, %v2825_v58  ;;  %v607_v34 = vpop.f32.mrb[15].mxu0  ;;  %v800_v35 = vpop.f32.mrb[15].mxu1  ;;  %1427 = vmatmul.mubr.bf16.gmra.mrb[72].mxu0 %v1059_v17  ;;  %1588 = vmatmul.mubr.bf16.gmra.mrb[72].mxu1 %v1061_v18  ;;  %v947_v39 = vmax.f32 %v602_v23, 0.0 }
 0x17c   : > { %v950_v36 = vmax.f32 %v797_v28, 0.0  ;;  %v608_v37 = vadd.f32 %v607_v34, %v2827_v0  ;;  %v801_v38 = vadd.f32 %v800_v35, %v2829_v59  ;;  %v948_v42 = vmax.f32 %v604_v27, 0.0 }
 0x17d   : > { %v951_v40 = vmax.f32 %v606_v32, 0.0  ;;  %v953_v41 = vmax.f32 %v799_v33, 0.0 }
 0x17e   : > { %v952_v43 = vmax.f32 %v608_v37, 0.0  ;;  %v954_v44 = vmax.f32 %v801_v38, 0.0 }
 0x17f   : > { %v1063_v45 = vpack.c.bf16 %v951_v40, %v947_v39  ;;  %v1065_v46 = vpack.c.bf16 %v953_v41, %v949_v31 }
 0x180   : > { %v1064_v47 = vpack.c.bf16 %v952_v43, %v948_v42  ;;  %v1066_v48 = vpack.c.bf16 %v954_v44, %v950_v36  ;;  %v611_v49 = vpop.f32.mrb[16].mxu0  ;;  %v804_v50 = vpop.f32.mrb[16].mxu1 }
 0x181   : > { %v612_v51 = vadd.f32 %v611_v49, %v2823_v57  ;;  %v805_v52 = vadd.f32 %v804_v50, %v2825_v58  ;;  %v613_v53 = vpop.f32.mrb[17].mxu0  ;;  %v806_v54 = vpop.f32.mrb[17].mxu1 }
 0x182   : > { %v614_v55 = vadd.f32 %v613_v53, %v2827_v0  ;;  %v807_v56 = vadd.f32 %v806_v54, %v2829_v59  ;;  %v615_v60 = vpop.f32.mrb[18].mxu0  ;;  %v808_v61 = vpop.f32.mrb[18].mxu1  ;;  %1434 = vmatprep.mubr.bf16.mxu0 %v1064_v47  ;;  %1595 = vmatprep.mubr.bf16.mxu1 %v1066_v48 }
 0x183   : > { %v957_v62 = vmax.f32 %v805_v52, 0.0  ;;  %v616_v63 = vadd.f32 %v615_v60, %v2823_v57  ;;  %v809_v1 = vadd.f32 %v808_v61, %v2825_v58  ;;  %v617_v2 = vpop.f32.mrb[19].mxu0  ;;  %v810_v3 = vpop.f32.mrb[19].mxu1  ;;  %1435 = vmatmul.mubr.bf16.gmra.mrb[76].mxu0 %v1063_v45  ;;  %1596 = vmatmul.mubr.bf16.gmra.mrb[76].mxu1 %v1065_v46  ;;  %v955_v7 = vmax.f32 %v612_v51, 0.0 }
 0x184   : > { %v958_v4 = vmax.f32 %v807_v56, 0.0  ;;  %v618_v5 = vadd.f32 %v617_v2, %v2827_v0  ;;  %v811_v6 = vadd.f32 %v810_v3, %v2829_v59  ;;  %v956_v10 = vmax.f32 %v614_v55, 0.0 }
 0x185   : > { %v959_v8 = vmax.f32 %v616_v63, 0.0  ;;  %v961_v9 = vmax.f32 %v809_v1, 0.0 }
 0x186   : > { %v960_v11 = vmax.f32 %v618_v5, 0.0  ;;  %v962_v12 = vmax.f32 %v811_v6, 0.0 }
 0x187   : > { %v1067_v13 = vpack.c.bf16 %v959_v8, %v955_v7  ;;  %v1069_v14 = vpack.c.bf16 %v961_v9, %v957_v62 }
 0x188   : > { %v1068_v15 = vpack.c.bf16 %v960_v11, %v956_v10  ;;  %v1070_v16 = vpack.c.bf16 %v962_v12, %v958_v4  ;;  %v621_v17 = vpop.f32.mrb[20].mxu0  ;;  %v814_v18 = vpop.f32.mrb[20].mxu1 }
 0x189   : > { %v622_v19 = vadd.f32 %v621_v17, %v2823_v57  ;;  %v815_v20 = vadd.f32 %v814_v18, %v2825_v58  ;;  %v623_v21 = vpop.f32.mrb[21].mxu0  ;;  %v816_v22 = vpop.f32.mrb[21].mxu1 }
 0x18a   : > { %v624_v23 = vadd.f32 %v623_v21, %v2827_v0  ;;  %v817_v24 = vadd.f32 %v816_v22, %v2829_v59  ;;  %v625_v25 = vpop.f32.mrb[22].mxu0  ;;  %v818_v26 = vpop.f32.mrb[22].mxu1  ;;  %1442 = vmatprep.mubr.bf16.mxu0 %v1068_v15  ;;  %1603 = vmatprep.mubr.bf16.mxu1 %v1070_v16 }
 0x18b   : > { %v965_v27 = vmax.f32 %v815_v20, 0.0  ;;  %v626_v28 = vadd.f32 %v625_v25, %v2823_v57  ;;  %v819_v29 = vadd.f32 %v818_v26, %v2825_v58  ;;  %v627_v30 = vpop.f32.mrb[23].mxu0  ;;  %v820_v31 = vpop.f32.mrb[23].mxu1  ;;  %1443 = vmatmul.mubr.bf16.gmra.mrb[80].mxu0 %v1067_v13  ;;  %1604 = vmatmul.mubr.bf16.gmra.mrb[80].mxu1 %v1069_v14  ;;  %v963_v35 = vmax.f32 %v622_v19, 0.0 }
 0x18c   : > { %v966_v32 = vmax.f32 %v817_v24, 0.0  ;;  %v628_v33 = vadd.f32 %v627_v30, %v2827_v0  ;;  %v821_v34 = vadd.f32 %v820_v31, %v2829_v59  ;;  %v964_v38 = vmax.f32 %v624_v23, 0.0 }
 0x18d   : > { %v967_v36 = vmax.f32 %v626_v28, 0.0  ;;  %v969_v37 = vmax.f32 %v819_v29, 0.0 }
 0x18e   : > { %v968_v39 = vmax.f32 %v628_v33, 0.0  ;;  %v970_v40 = vmax.f32 %v821_v34, 0.0 }
 0x18f   : > { %v1071_v41 = vpack.c.bf16 %v967_v36, %v963_v35  ;;  %v1073_v42 = vpack.c.bf16 %v969_v37, %v965_v27 }
 0x190   : > { %v1072_v43 = vpack.c.bf16 %v968_v39, %v964_v38  ;;  %v1074_v44 = vpack.c.bf16 %v970_v40, %v966_v32  ;;  %v631_v45 = vpop.f32.mrb[24].mxu0  ;;  %v824_v46 = vpop.f32.mrb[24].mxu1 }
 0x191   : > { %v632_v47 = vadd.f32 %v631_v45, %v2823_v57  ;;  %v825_v48 = vadd.f32 %v824_v46, %v2825_v58  ;;  %v633_v49 = vpop.f32.mrb[25].mxu0  ;;  %v826_v50 = vpop.f32.mrb[25].mxu1 }
 0x192   : > { %v634_v51 = vadd.f32 %v633_v49, %v2827_v0  ;;  %v827_v52 = vadd.f32 %v826_v50, %v2829_v59  ;;  %v635_v53 = vpop.f32.mrb[26].mxu0  ;;  %v828_v54 = vpop.f32.mrb[26].mxu1  ;;  %1450 = vmatprep.mubr.bf16.mxu0 %v1072_v43  ;;  %1611 = vmatprep.mubr.bf16.mxu1 %v1074_v44 }
 0x193   : > { %v973_v55 = vmax.f32 %v825_v48, 0.0  ;;  %v636_v56 = vadd.f32 %v635_v53, %v2823_v57  ;;  %v829_v60 = vadd.f32 %v828_v54, %v2825_v58  ;;  %v637_v61 = vpop.f32.mrb[27].mxu0  ;;  %v830_v62 = vpop.f32.mrb[27].mxu1  ;;  %1451 = vmatmul.mubr.bf16.gmra.mrb[84].mxu0 %v1071_v41  ;;  %1612 = vmatmul.mubr.bf16.gmra.mrb[84].mxu1 %v1073_v42  ;;  %v971_v3 = vmax.f32 %v632_v47, 0.0 }
 0x194   : > { %v974_v63 = vmax.f32 %v827_v52, 0.0  ;;  %v638_v1 = vadd.f32 %v637_v61, %v2827_v0  ;;  %v831_v2 = vadd.f32 %v830_v62, %v2829_v59  ;;  %v972_v6 = vmax.f32 %v634_v51, 0.0 }
 0x195   : > { %v975_v4 = vmax.f32 %v636_v56, 0.0  ;;  %v977_v5 = vmax.f32 %v829_v60, 0.0 }
 0x196   : > { %v976_v7 = vmax.f32 %v638_v1, 0.0  ;;  %v978_v8 = vmax.f32 %v831_v2, 0.0 }
 0x197   : > { %v1075_v9 = vpack.c.bf16 %v975_v4, %v971_v3  ;;  %v1077_v10 = vpack.c.bf16 %v977_v5, %v973_v55 }
 0x198   : > { %v1076_v11 = vpack.c.bf16 %v976_v7, %v972_v6  ;;  %v1078_v12 = vpack.c.bf16 %v978_v8, %v974_v63  ;;  %v641_v13 = vpop.f32.mrb[28].mxu0  ;;  %v834_v14 = vpop.f32.mrb[28].mxu1 }
 0x199   : > { %v642_v15 = vadd.f32 %v641_v13, %v2823_v57  ;;  %v835_v16 = vadd.f32 %v834_v14, %v2825_v58  ;;  %v643_v17 = vpop.f32.mrb[29].mxu0  ;;  %v836_v18 = vpop.f32.mrb[29].mxu1 }
 0x19a   : > { %v644_v19 = vadd.f32 %v643_v17, %v2827_v0  ;;  %v837_v20 = vadd.f32 %v836_v18, %v2829_v59  ;;  %v645_v21 = vpop.f32.mrb[30].mxu0  ;;  %v838_v22 = vpop.f32.mrb[30].mxu1  ;;  %1458 = vmatprep.mubr.bf16.mxu0 %v1076_v11  ;;  %1619 = vmatprep.mubr.bf16.mxu1 %v1078_v12 }
 0x19b   : > { %v981_v23 = vmax.f32 %v835_v16, 0.0  ;;  %v646_v24 = vadd.f32 %v645_v21, %v2823_v57  ;;  %v839_v25 = vadd.f32 %v838_v22, %v2825_v58  ;;  %v647_v26 = vpop.f32.mrb[31].mxu0  ;;  %v840_v27 = vpop.f32.mrb[31].mxu1  ;;  %1459 = vmatmul.mubr.bf16.gmra.mrb[88].mxu0 %v1075_v9  ;;  %1620 = vmatmul.mubr.bf16.gmra.mrb[88].mxu1 %v1077_v10  ;;  %v979_v31 = vmax.f32 %v642_v15, 0.0 }
 0x19c   : > { %v982_v28 = vmax.f32 %v837_v20, 0.0  ;;  %v648_v29 = vadd.f32 %v647_v26, %v2827_v0  ;;  %v841_v30 = vadd.f32 %v840_v27, %v2829_v59  ;;  %v980_v34 = vmax.f32 %v644_v19, 0.0 }
 0x19d   : > { %v983_v32 = vmax.f32 %v646_v24, 0.0  ;;  %v985_v33 = vmax.f32 %v839_v25, 0.0 }
 0x19e   : > { %v984_v35 = vmax.f32 %v648_v29, 0.0  ;;  %v986_v36 = vmax.f32 %v841_v30, 0.0 }
 0x19f   : > { %v1079_v37 = vpack.c.bf16 %v983_v32, %v979_v31  ;;  %v1081_v38 = vpack.c.bf16 %v985_v33, %v981_v23 }
 0x1a0   : > { %v1080_v39 = vpack.c.bf16 %v984_v35, %v980_v34  ;;  %v1082_v40 = vpack.c.bf16 %v986_v36, %v982_v28  ;;  %v651_v41 = vpop.f32.mrb[32].mxu0  ;;  %v844_v42 = vpop.f32.mrb[32].mxu1 }
 0x1a1   : > { %v652_v43 = vadd.f32 %v651_v41, %v2823_v57  ;;  %v845_v44 = vadd.f32 %v844_v42, %v2825_v58  ;;  %v653_v45 = vpop.f32.mrb[33].mxu0  ;;  %v846_v46 = vpop.f32.mrb[33].mxu1 }
 0x1a2   : > { %v654_v47 = vadd.f32 %v653_v45, %v2827_v0  ;;  %v847_v48 = vadd.f32 %v846_v46, %v2829_v59  ;;  %v655_v49 = vpop.f32.mrb[34].mxu0  ;;  %v848_v50 = vpop.f32.mrb[34].mxu1  ;;  %1466 = vmatprep.mubr.bf16.mxu0 %v1080_v39  ;;  %1627 = vmatprep.mubr.bf16.mxu1 %v1082_v40 }
 0x1a3   : > { %v989_v51 = vmax.f32 %v845_v44, 0.0  ;;  %v656_v52 = vadd.f32 %v655_v49, %v2823_v57  ;;  %v849_v53 = vadd.f32 %v848_v50, %v2825_v58  ;;  %v657_v54 = vpop.f32.mrb[35].mxu0  ;;  %v850_v55 = vpop.f32.mrb[35].mxu1  ;;  %1467 = vmatmul.mubr.bf16.gmra.mrb[92].mxu0 %v1079_v37  ;;  %1628 = vmatmul.mubr.bf16.gmra.mrb[92].mxu1 %v1081_v38  ;;  %v987_v62 = vmax.f32 %v652_v43, 0.0 }
 0x1a4   : > { %v990_v56 = vmax.f32 %v847_v48, 0.0  ;;  %v658_v60 = vadd.f32 %v657_v54, %v2827_v0  ;;  %v851_v61 = vadd.f32 %v850_v55, %v2829_v59  ;;  %v988_v2 = vmax.f32 %v654_v47, 0.0 }
 0x1a5   : > { %v991_v63 = vmax.f32 %v656_v52, 0.0  ;;  %v993_v1 = vmax.f32 %v849_v53, 0.0 }
 0x1a6   : > { %v992_v3 = vmax.f32 %v658_v60, 0.0  ;;  %v994_v4 = vmax.f32 %v851_v61, 0.0 }
 0x1a7   : > { %v1083_v5 = vpack.c.bf16 %v991_v63, %v987_v62  ;;  %v1085_v6 = vpack.c.bf16 %v993_v1, %v989_v51 }
 0x1a8   : > { %v1084_v7 = vpack.c.bf16 %v992_v3, %v988_v2  ;;  %v1086_v8 = vpack.c.bf16 %v994_v4, %v990_v56  ;;  %v661_v9 = vpop.f32.mrb[36].mxu0  ;;  %v854_v10 = vpop.f32.mrb[36].mxu1 }
 0x1a9   : > { %v662_v11 = vadd.f32 %v661_v9, %v2823_v57  ;;  %v855_v12 = vadd.f32 %v854_v10, %v2825_v58  ;;  %v663_v13 = vpop.f32.mrb[37].mxu0  ;;  %v856_v14 = vpop.f32.mrb[37].mxu1 }
 0x1aa   : > { %v664_v15 = vadd.f32 %v663_v13, %v2827_v0  ;;  %v857_v16 = vadd.f32 %v856_v14, %v2829_v59  ;;  %v665_v17 = vpop.f32.mrb[38].mxu0  ;;  %v858_v18 = vpop.f32.mrb[38].mxu1  ;;  %1474 = vmatprep.mubr.bf16.mxu0 %v1084_v7  ;;  %1635 = vmatprep.mubr.bf16.mxu1 %v1086_v8 }
 0x1ab   : > { %v997_v19 = vmax.f32 %v855_v12, 0.0  ;;  %v666_v20 = vadd.f32 %v665_v17, %v2823_v57  ;;  %v859_v21 = vadd.f32 %v858_v18, %v2825_v58  ;;  %v667_v22 = vpop.f32.mrb[39].mxu0  ;;  %v860_v23 = vpop.f32.mrb[39].mxu1  ;;  %1475 = vmatmul.mubr.bf16.gmra.mrb[96].mxu0 %v1083_v5  ;;  %1636 = vmatmul.mubr.bf16.gmra.mrb[96].mxu1 %v1085_v6  ;;  %v995_v27 = vmax.f32 %v662_v11, 0.0 }
 0x1ac   : > { %v998_v24 = vmax.f32 %v857_v16, 0.0  ;;  %v668_v25 = vadd.f32 %v667_v22, %v2827_v0  ;;  %v861_v26 = vadd.f32 %v860_v23, %v2829_v59  ;;  %v996_v30 = vmax.f32 %v664_v15, 0.0 }
 0x1ad   : > { %v999_v28 = vmax.f32 %v666_v20, 0.0  ;;  %v1001_v29 = vmax.f32 %v859_v21, 0.0 }
 0x1ae   : > { %v1000_v31 = vmax.f32 %v668_v25, 0.0  ;;  %v1002_v32 = vmax.f32 %v861_v26, 0.0 }
 0x1af   : > { %v1087_v33 = vpack.c.bf16 %v999_v28, %v995_v27  ;;  %v1089_v34 = vpack.c.bf16 %v1001_v29, %v997_v19 }
 0x1b0   : > { %v1088_v35 = vpack.c.bf16 %v1000_v31, %v996_v30  ;;  %v1090_v36 = vpack.c.bf16 %v1002_v32, %v998_v24  ;;  %v671_v37 = vpop.f32.mrb[40].mxu0  ;;  %v864_v38 = vpop.f32.mrb[40].mxu1 }
 0x1b1   : > { %v672_v39 = vadd.f32 %v671_v37, %v2823_v57  ;;  %v865_v40 = vadd.f32 %v864_v38, %v2825_v58  ;;  %v673_v41 = vpop.f32.mrb[41].mxu0  ;;  %v866_v42 = vpop.f32.mrb[41].mxu1 }
 0x1b2   : > { %v674_v43 = vadd.f32 %v673_v41, %v2827_v0  ;;  %v867_v44 = vadd.f32 %v866_v42, %v2829_v59  ;;  %v675_v45 = vpop.f32.mrb[42].mxu0  ;;  %v868_v46 = vpop.f32.mrb[42].mxu1  ;;  %1482 = vmatprep.mubr.bf16.mxu0 %v1088_v35  ;;  %1643 = vmatprep.mubr.bf16.mxu1 %v1090_v36 }
 0x1b3   : > { %v1005_v47 = vmax.f32 %v865_v40, 0.0  ;;  %v676_v48 = vadd.f32 %v675_v45, %v2823_v57  ;;  %v869_v49 = vadd.f32 %v868_v46, %v2825_v58  ;;  %v677_v50 = vpop.f32.mrb[43].mxu0  ;;  %v870_v51 = vpop.f32.mrb[43].mxu1  ;;  %1483 = vmatmul.mubr.bf16.gmra.mrb[100].mxu0 %v1087_v33  ;;  %1644 = vmatmul.mubr.bf16.gmra.mrb[100].mxu1 %v1089_v34  ;;  %v1003_v55 = vmax.f32 %v672_v39, 0.0 }
 0x1b4   : > { %v1006_v52 = vmax.f32 %v867_v44, 0.0  ;;  %v678_v53 = vadd.f32 %v677_v50, %v2827_v0  ;;  %v871_v54 = vadd.f32 %v870_v51, %v2829_v59  ;;  %v1004_v61 = vmax.f32 %v674_v43, 0.0 }
 0x1b5   : > { %v1007_v56 = vmax.f32 %v676_v48, 0.0  ;;  %v1009_v60 = vmax.f32 %v869_v49, 0.0 }
 0x1b6   : > { %v1008_v62 = vmax.f32 %v678_v53, 0.0  ;;  %v1010_v63 = vmax.f32 %v871_v54, 0.0 }
 0x1b7   : > { %v1091_v1 = vpack.c.bf16 %v1007_v56, %v1003_v55  ;;  %v1093_v2 = vpack.c.bf16 %v1009_v60, %v1005_v47 }
 0x1b8   : > { %v1092_v3 = vpack.c.bf16 %v1008_v62, %v1004_v61  ;;  %v1094_v4 = vpack.c.bf16 %v1010_v63, %v1006_v52  ;;  %v681_v5 = vpop.f32.mrb[44].mxu0  ;;  %v874_v6 = vpop.f32.mrb[44].mxu1 }
 0x1b9   : > { %v682_v7 = vadd.f32 %v681_v5, %v2823_v57  ;;  %v875_v8 = vadd.f32 %v874_v6, %v2825_v58  ;;  %v683_v9 = vpop.f32.mrb[45].mxu0  ;;  %v876_v10 = vpop.f32.mrb[45].mxu1 }
 0x1ba   : > { %v684_v11 = vadd.f32 %v683_v9, %v2827_v0  ;;  %v877_v12 = vadd.f32 %v876_v10, %v2829_v59  ;;  %v685_v13 = vpop.f32.mrb[46].mxu0  ;;  %v878_v14 = vpop.f32.mrb[46].mxu1  ;;  %1490 = vmatprep.mubr.bf16.mxu0 %v1092_v3  ;;  %1651 = vmatprep.mubr.bf16.mxu1 %v1094_v4 }
 0x1bb   : > { %v1013_v15 = vmax.f32 %v875_v8, 0.0  ;;  %v686_v16 = vadd.f32 %v685_v13, %v2823_v57  ;;  %v879_v17 = vadd.f32 %v878_v14, %v2825_v58  ;;  %v687_v18 = vpop.f32.mrb[47].mxu0  ;;  %v880_v19 = vpop.f32.mrb[47].mxu1  ;;  %1491 = vmatmul.mubr.bf16.gmra.mrb[104].mxu0 %v1091_v1  ;;  %1652 = vmatmul.mubr.bf16.gmra.mrb[104].mxu1 %v1093_v2  ;;  %v1011_v23 = vmax.f32 %v682_v7, 0.0 }
 0x1bc   : > { %v1014_v20 = vmax.f32 %v877_v12, 0.0  ;;  %v688_v21 = vadd.f32 %v687_v18, %v2827_v0  ;;  %v881_v22 = vadd.f32 %v880_v19, %v2829_v59  ;;  %v1012_v26 = vmax.f32 %v684_v11, 0.0 }
 0x1bd   : > { %v1015_v24 = vmax.f32 %v686_v16, 0.0  ;;  %v1017_v25 = vmax.f32 %v879_v17, 0.0 }
 0x1be   : > { %v1016_v27 = vmax.f32 %v688_v21, 0.0  ;;  %v1018_v28 = vmax.f32 %v881_v22, 0.0 }
 0x1bf   : > { %v1095_v29 = vpack.c.bf16 %v1015_v24, %v1011_v23  ;;  %v1097_v30 = vpack.c.bf16 %v1017_v25, %v1013_v15 }
 0x1c0   : > { %v1096_v31 = vpack.c.bf16 %v1016_v27, %v1012_v26  ;;  %v1098_v32 = vpack.c.bf16 %v1018_v28, %v1014_v20  ;;  %v691_v33 = vpop.f32.mrb[48].mxu0  ;;  %v884_v34 = vpop.f32.mrb[48].mxu1 }
 0x1c1   : > { %v692_v35 = vadd.f32 %v691_v33, %v2823_v57  ;;  %v885_v36 = vadd.f32 %v884_v34, %v2825_v58  ;;  %v693_v37 = vpop.f32.mrb[49].mxu0  ;;  %v886_v38 = vpop.f32.mrb[49].mxu1 }
 0x1c2   : > { %v694_v39 = vadd.f32 %v693_v37, %v2827_v0  ;;  %v887_v40 = vadd.f32 %v886_v38, %v2829_v59  ;;  %v695_v41 = vpop.f32.mrb[50].mxu0  ;;  %v888_v42 = vpop.f32.mrb[50].mxu1  ;;  %1498 = vmatprep.mubr.bf16.mxu0 %v1096_v31  ;;  %1659 = vmatprep.mubr.bf16.mxu1 %v1098_v32 }
 0x1c3   : > { %v1021_v43 = vmax.f32 %v885_v36, 0.0  ;;  %v696_v44 = vadd.f32 %v695_v41, %v2823_v57  ;;  %v889_v45 = vadd.f32 %v888_v42, %v2825_v58  ;;  %v697_v46 = vpop.f32.mrb[51].mxu0  ;;  %v890_v47 = vpop.f32.mrb[51].mxu1  ;;  %1499 = vmatmul.mubr.bf16.gmra.mrb[108].mxu0 %v1095_v29  ;;  %1660 = vmatmul.mubr.bf16.gmra.mrb[108].mxu1 %v1097_v30  ;;  %v1019_v51 = vmax.f32 %v692_v35, 0.0 }
 0x1c4   : > { %v1022_v48 = vmax.f32 %v887_v40, 0.0  ;;  %v698_v49 = vadd.f32 %v697_v46, %v2827_v0  ;;  %v891_v50 = vadd.f32 %v890_v47, %v2829_v59  ;;  %v1020_v54 = vmax.f32 %v694_v39, 0.0 }
 0x1c5   : > { %v1023_v52 = vmax.f32 %v696_v44, 0.0  ;;  %v1025_v53 = vmax.f32 %v889_v45, 0.0 }
 0x1c6   : > { %v1024_v55 = vmax.f32 %v698_v49, 0.0  ;;  %v1026_v56 = vmax.f32 %v891_v50, 0.0 }
 0x1c7   : > { %v1099_v60 = vpack.c.bf16 %v1023_v52, %v1019_v51  ;;  %v1101_v61 = vpack.c.bf16 %v1025_v53, %v1021_v43 }
 0x1c8   : > { %v1100_v62 = vpack.c.bf16 %v1024_v55, %v1020_v54  ;;  %v1102_v63 = vpack.c.bf16 %v1026_v56, %v1022_v48  ;;  %v701_v1 = vpop.f32.mrb[52].mxu0  ;;  %v894_v2 = vpop.f32.mrb[52].mxu1 }
 0x1c9   : > { %v702_v3 = vadd.f32 %v701_v1, %v2823_v57  ;;  %v895_v4 = vadd.f32 %v894_v2, %v2825_v58  ;;  %v703_v5 = vpop.f32.mrb[53].mxu0  ;;  %v896_v6 = vpop.f32.mrb[53].mxu1 }
 0x1ca   : > { %v704_v7 = vadd.f32 %v703_v5, %v2827_v0  ;;  %v897_v8 = vadd.f32 %v896_v6, %v2829_v59  ;;  %v705_v9 = vpop.f32.mrb[54].mxu0  ;;  %v898_v10 = vpop.f32.mrb[54].mxu1  ;;  %1506 = vmatprep.mubr.bf16.mxu0 %v1100_v62  ;;  %1667 = vmatprep.mubr.bf16.mxu1 %v1102_v63 }
 0x1cb   : > { %v1029_v11 = vmax.f32 %v895_v4, 0.0  ;;  %v706_v12 = vadd.f32 %v705_v9, %v2823_v57  ;;  %v899_v13 = vadd.f32 %v898_v10, %v2825_v58  ;;  %v707_v14 = vpop.f32.mrb[55].mxu0  ;;  %v900_v15 = vpop.f32.mrb[55].mxu1  ;;  %1507 = vmatmul.mubr.bf16.gmra.mrb[112].mxu0 %v1099_v60  ;;  %1668 = vmatmul.mubr.bf16.gmra.mrb[112].mxu1 %v1101_v61  ;;  %v1027_v19 = vmax.f32 %v702_v3, 0.0 }
 0x1cc   : > { %v1030_v16 = vmax.f32 %v897_v8, 0.0  ;;  %v708_v17 = vadd.f32 %v707_v14, %v2827_v0  ;;  %v901_v18 = vadd.f32 %v900_v15, %v2829_v59  ;;  %v1028_v22 = vmax.f32 %v704_v7, 0.0 }
 0x1cd   : > { %v1031_v20 = vmax.f32 %v706_v12, 0.0  ;;  %v1033_v21 = vmax.f32 %v899_v13, 0.0 }
 0x1ce   : > { %v1032_v23 = vmax.f32 %v708_v17, 0.0  ;;  %v1034_v24 = vmax.f32 %v901_v18, 0.0 }
 0x1cf   : > { %v1103_v25 = vpack.c.bf16 %v1031_v20, %v1027_v19  ;;  %v1105_v26 = vpack.c.bf16 %v1033_v21, %v1029_v11 }
 0x1d0   : > { %v1104_v27 = vpack.c.bf16 %v1032_v23, %v1028_v22  ;;  %v1106_v28 = vpack.c.bf16 %v1034_v24, %v1030_v16  ;;  %v711_v29 = vpop.f32.mrb[56].mxu0  ;;  %v904_v30 = vpop.f32.mrb[56].mxu1 }
 0x1d1   : > { %v712_v31 = vadd.f32 %v711_v29, %v2823_v57  ;;  %v905_v32 = vadd.f32 %v904_v30, %v2825_v58  ;;  %v713_v33 = vpop.f32.mrb[57].mxu0  ;;  %v906_v34 = vpop.f32.mrb[57].mxu1 }
 0x1d2   : > { %v714_v35 = vadd.f32 %v713_v33, %v2827_v0  ;;  %v907_v36 = vadd.f32 %v906_v34, %v2829_v59  ;;  %v715_v37 = vpop.f32.mrb[58].mxu0  ;;  %v908_v38 = vpop.f32.mrb[58].mxu1  ;;  %1514 = vmatprep.mubr.bf16.mxu0 %v1104_v27  ;;  %1675 = vmatprep.mubr.bf16.mxu1 %v1106_v28 }
 0x1d3   : > { %v1037_v39 = vmax.f32 %v905_v32, 0.0  ;;  %v716_v40 = vadd.f32 %v715_v37, %v2823_v57  ;;  %v909_v41 = vadd.f32 %v908_v38, %v2825_v58  ;;  %v717_v42 = vpop.f32.mrb[59].mxu0  ;;  %v910_v43 = vpop.f32.mrb[59].mxu1  ;;  %1515 = vmatmul.mubr.bf16.gmra.mrb[116].mxu0 %v1103_v25  ;;  %1676 = vmatmul.mubr.bf16.gmra.mrb[116].mxu1 %v1105_v26  ;;  %v1035_v47 = vmax.f32 %v712_v31, 0.0  ;;  %v2335_v37 = vld [vmem:[%s2746_s6] sm:$0xff] }
 0x1d4   : > { %v1038_v44 = vmax.f32 %v907_v36, 0.0  ;;  %v718_v45 = vadd.f32 %v717_v42, %v2827_v0  ;;  %v911_v46 = vadd.f32 %v910_v43, %v2829_v59  ;;  %v1036_v50 = vmax.f32 %v714_v35, 0.0 }
 0x1d5   : > { %v1039_v48 = vmax.f32 %v716_v40, 0.0  ;;  %v1041_v49 = vmax.f32 %v909_v41, 0.0 }
 0x1d6   : > { %v1040_v51 = vmax.f32 %v718_v45, 0.0  ;;  %v1042_v52 = vmax.f32 %v911_v46, 0.0 }
 0x1d7   : > { %v1107_v53 = vpack.c.bf16 %v1039_v48, %v1035_v47  ;;  %v1109_v54 = vpack.c.bf16 %v1041_v49, %v1037_v39 }
 0x1d8   : > { %v1108_v55 = vpack.c.bf16 %v1040_v51, %v1036_v50  ;;  %v1110_v56 = vpack.c.bf16 %v1042_v52, %v1038_v44  ;;  %v721_v60 = vpop.f32.mrb[60].mxu0  ;;  %v914_v61 = vpop.f32.mrb[60].mxu1  ;;  %v2336_v44 = vld [vmem:[%s2746_s6 + $0x8] sm:$0xff] }
 0x1d9   : > { %v722_v62 = vadd.f32 %v721_v60, %v2823_v57  ;;  %v915_v63 = vadd.f32 %v914_v61, %v2825_v58  ;;  %v723_v1 = vpop.f32.mrb[61].mxu0  ;;  %v916_v2 = vpop.f32.mrb[61].mxu1  ;;  %v2337_v60 = vld [vmem:[%s2746_s6 + $0x10] sm:$0xff] }
 0x1da   : > { %v724_v3 = vadd.f32 %v723_v1, %v2827_v0  ;;  %v917_v4 = vadd.f32 %v916_v2, %v2829_v59  ;;  %v725_v5 = vpop.f32.mrb[62].mxu0  ;;  %v918_v6 = vpop.f32.mrb[62].mxu1  ;;  %1522 = vmatprep.mubr.bf16.mxu0 %v1108_v55  ;;  %1683 = vmatprep.mubr.bf16.mxu1 %v1110_v56 }
 0x1db   : > { %v1045_v7 = vmax.f32 %v915_v63, 0.0  ;;  %v726_v8 = vadd.f32 %v725_v5, %v2823_v57  ;;  %v919_v9 = vadd.f32 %v918_v6, %v2825_v58  ;;  %v727_v10 = vpop.f32.mrb[63].mxu0  ;;  %v920_v11 = vpop.f32.mrb[63].mxu1  ;;  %1523 = vmatmul.mubr.bf16.gmra.mrb[120].mxu0 %v1107_v53  ;;  %1684 = vmatmul.mubr.bf16.gmra.mrb[120].mxu1 %v1109_v54  ;;  %v1043_v15 = vmax.f32 %v722_v62, 0.0 }
 0x1dc   : > { %v1046_v12 = vmax.f32 %v917_v4, 0.0  ;;  %v728_v13 = vadd.f32 %v727_v10, %v2827_v0  ;;  %v921_v14 = vadd.f32 %v920_v11, %v2829_v59  ;;  %v1044_v18 = vmax.f32 %v724_v3, 0.0  ;;  %v2962_v0 = vld [vmem:[%s3119_s4] ss:$0 sm:$0xff]  ;;  %v2338_v4 = vld [vmem:[%s2746_s6 + $0x18] sm:$0xff] }
 0x1dd   : > { %v1047_v16 = vmax.f32 %v726_v8, 0.0  ;;  %v1049_v17 = vmax.f32 %v919_v9, 0.0 }
 0x1de   : > { %v1048_v19 = vmax.f32 %v728_v13, 0.0  ;;  %v1050_v20 = vmax.f32 %v921_v14, 0.0 }
 0x1df   : > { %v1111_v21 = vpack.c.bf16 %v1047_v16, %v1043_v15  ;;  %v1113_v22 = vpack.c.bf16 %v1049_v17, %v1045_v7  ;;  %v2339_v17 = vld [vmem:[%s2746_s6 + $0x20] sm:$0xff] }
 0x1e0   : > { %v1112_v57 = vpack.c.bf16 %v1048_v19, %v1044_v18  ;;  %v1114_v23 = vpack.c.bf16 %v1050_v20, %v1046_v12 }
 0x1e2   : > { %1530 = vmatprep.mubr.bf16.mxu0 %v1112_v57  ;;  %1691 = vmatprep.mubr.bf16.mxu1 %v1114_v23  ;;  %v2340_v23 = vld [vmem:[%s2746_s6 + $0x28] sm:$0xff] }
 0x1e3   : > { %1531 = vmatmul.mubr.bf16.gmra.mrb[124].mxu0 %v1111_v21  ;;  %1692 = vmatmul.mubr.bf16.gmra.mrb[124].mxu1 %v1113_v22 }
 0x23e   : > { %v1971_v58 = vpop.f32.mrb[64].mxu0  ;;  %v2083_v24 = vpop.f32.mrb[64].mxu1 }
 0x23f   : > { %v1972_v59 = vpop.f32.mrb[65].mxu0  ;;  %v2084_v25 = vpop.f32.mrb[65].mxu1 }
 0x240   : > { %v1973_v26 = vadd.f32 %v1972_v59, %v1971_v58  ;;  %v2085_v27 = vadd.f32 %v2084_v25, %v2083_v24  ;;  %v1974_v28 = vpop.f32.mrb[66].mxu0  ;;  %v2086_v29 = vpop.f32.mrb[66].mxu1 }
 0x241   : > { %v1975_v30 = vpop.f32.mrb[67].mxu0  ;;  %v2087_v31 = vpop.f32.mrb[67].mxu1 }
 0x242   : > { %v1413_v32 = vadd.f32 %v1973_v26, %v2962_v0  ;;  %v1976_v33 = vadd.f32 %v1975_v30, %v1974_v28  ;;  %v2088_v34 = vadd.f32 %v2087_v31, %v2086_v29 }
 0x244   : > { %v1574_v35 = vadd.f32 %v2085_v27, %v1413_v32  ;;  %v1416_v36 = vadd.f32 %v1976_v33, %v2962_v0 }
 0x246   : > { %v1700_v38 = vadd.f32 %v2335_v37, %v1574_v35  ;;  %v1577_v39 = vadd.f32 %v2088_v34, %v1416_v36  ;;  %v1977_v40 = vpop.f32.mrb[68].mxu0  ;;  %v2089_v41 = vpop.f32.mrb[68].mxu1  ;;  %v2341_v34 = vld [vmem:[%s2746_s6 + $0x30] sm:$0xff] }
 0x247   : > { %v1978_v42 = vpop.f32.mrb[69].mxu0  ;;  %v2090_v43 = vpop.f32.mrb[69].mxu1 }
 0x248   : > { %1732 = vst [vmem:[%s2969_s12] sm:$0xff] %v1700_v38  ;;  %v1701_v45 = vadd.f32 %v2336_v44, %v1577_v39  ;;  %v1979_v46 = vadd.f32 %v1978_v42, %v1977_v40  ;;  %v2091_v47 = vadd.f32 %v2090_v43, %v2089_v41  ;;  %v1980_v48 = vpop.f32.mrb[70].mxu0  ;;  %v2092_v49 = vpop.f32.mrb[70].mxu1  ;;  %v2342_v41 = vld [vmem:[%s2746_s6 + $0x38] sm:$0xff] }
 0x249   : > { %v1981_v50 = vpop.f32.mrb[71].mxu0  ;;  %v2093_v51 = vpop.f32.mrb[71].mxu1 }
 0x24a   : > { %1733 = vst [vmem:[%s2969_s12 + $0x8] sm:$0xff] %v1701_v45  ;;  %v1421_v52 = vadd.f32 %v1979_v46, %v2962_v0  ;;  %v1982_v53 = vadd.f32 %v1981_v50, %v1980_v48  ;;  %v2094_v54 = vadd.f32 %v2093_v51, %v2092_v49 }
 0x24c   : > { %v1582_v55 = vadd.f32 %v2091_v47, %v1421_v52  ;;  %v1424_v56 = vadd.f32 %v1982_v53, %v2962_v0 }
 0x24e   : > { %v1702_v61 = vadd.f32 %v2337_v60, %v1582_v55  ;;  %v1585_v62 = vadd.f32 %v2094_v54, %v1424_v56  ;;  %v1983_v63 = vpop.f32.mrb[72].mxu0  ;;  %v2095_v1 = vpop.f32.mrb[72].mxu1  ;;  %v2343_v54 = vld [vmem:[%s2746_s6 + $0x40] sm:$0xff] }
 0x24f   : > { %v1984_v2 = vpop.f32.mrb[73].mxu0  ;;  %v2096_v3 = vpop.f32.mrb[73].mxu1 }
 0x250   : > { %1734 = vst [vmem:[%s2969_s12 + $0x10] sm:$0xff] %v1702_v61  ;;  %v1703_v5 = vadd.f32 %v2338_v4, %v1585_v62  ;;  %v1985_v6 = vadd.f32 %v1984_v2, %v1983_v63  ;;  %v2097_v7 = vadd.f32 %v2096_v3, %v2095_v1  ;;  %v1986_v8 = vpop.f32.mrb[74].mxu0  ;;  %v2098_v9 = vpop.f32.mrb[74].mxu1  ;;  %v2344_v1 = vld [vmem:[%s2746_s6 + $0x48] sm:$0xff] }
 0x251   : > { %v1987_v10 = vpop.f32.mrb[75].mxu0  ;;  %v2099_v11 = vpop.f32.mrb[75].mxu1 }
 0x252   : > { %1735 = vst [vmem:[%s2969_s12 + $0x18] sm:$0xff] %v1703_v5  ;;  %v1429_v12 = vadd.f32 %v1985_v6, %v2962_v0  ;;  %v1988_v13 = vadd.f32 %v1987_v10, %v1986_v8  ;;  %v2100_v14 = vadd.f32 %v2099_v11, %v2098_v9 }
 0x254   : > { %v1590_v15 = vadd.f32 %v2097_v7, %v1429_v12  ;;  %v1432_v16 = vadd.f32 %v1988_v13, %v2962_v0 }
 0x256   : > { %v1704_v18 = vadd.f32 %v2339_v17, %v1590_v15  ;;  %v1593_v19 = vadd.f32 %v2100_v14, %v1432_v16  ;;  %v1989_v20 = vpop.f32.mrb[76].mxu0  ;;  %v2101_v21 = vpop.f32.mrb[76].mxu1  ;;  %v2345_v14 = vld [vmem:[%s2746_s6 + $0x50] sm:$0xff] }
 0x257   : > { %v1990_v22 = vpop.f32.mrb[77].mxu0  ;;  %v2102_v57 = vpop.f32.mrb[77].mxu1 }
 0x258   : > { %1736 = vst [vmem:[%s2969_s12 + $0x20] sm:$0xff] %v1704_v18  ;;  %v1705_v58 = vadd.f32 %v2340_v23, %v1593_v19  ;;  %v1991_v24 = vadd.f32 %v1990_v22, %v1989_v20  ;;  %v2103_v59 = vadd.f32 %v2102_v57, %v2101_v21  ;;  %v1992_v25 = vpop.f32.mrb[78].mxu0  ;;  %v2104_v26 = vpop.f32.mrb[78].mxu1  ;;  %v2346_v21 = vld [vmem:[%s2746_s6 + $0x58] sm:$0xff] }
 0x259   : > { %v1993_v27 = vpop.f32.mrb[79].mxu0  ;;  %v2105_v28 = vpop.f32.mrb[79].mxu1 }
 0x25a   : > { %1737 = vst [vmem:[%s2969_s12 + $0x28] sm:$0xff] %v1705_v58  ;;  %v1437_v29 = vadd.f32 %v1991_v24, %v2962_v0  ;;  %v1994_v30 = vadd.f32 %v1993_v27, %v1992_v25  ;;  %v2106_v31 = vadd.f32 %v2105_v28, %v2104_v26 }
 0x25c   : > { %v1598_v32 = vadd.f32 %v2103_v59, %v1437_v29  ;;  %v1440_v33 = vadd.f32 %v1994_v30, %v2962_v0 }
 0x25e   : > { %v1706_v35 = vadd.f32 %v2341_v34, %v1598_v32  ;;  %v1601_v36 = vadd.f32 %v2106_v31, %v1440_v33  ;;  %v1995_v37 = vpop.f32.mrb[80].mxu0  ;;  %v2107_v38 = vpop.f32.mrb[80].mxu1  ;;  %v2347_v31 = vld [vmem:[%s2746_s6 + $0x60] sm:$0xff] }
 0x25f   : > { %v1996_v39 = vpop.f32.mrb[81].mxu0  ;;  %v2108_v40 = vpop.f32.mrb[81].mxu1 }
 0x260   : > { %1738 = vst [vmem:[%s2969_s12 + $0x30] sm:$0xff] %v1706_v35  ;;  %v1707_v42 = vadd.f32 %v2342_v41, %v1601_v36  ;;  %v1997_v43 = vadd.f32 %v1996_v39, %v1995_v37  ;;  %v2109_v44 = vadd.f32 %v2108_v40, %v2107_v38  ;;  %v1998_v45 = vpop.f32.mrb[82].mxu0  ;;  %v2110_v46 = vpop.f32.mrb[82].mxu1  ;;  %v2348_v38 = vld [vmem:[%s2746_s6 + $0x68] sm:$0xff] }
 0x261   : > { %v1999_v47 = vpop.f32.mrb[83].mxu0  ;;  %v2111_v48 = vpop.f32.mrb[83].mxu1 }
 0x262   : > { %1739 = vst [vmem:[%s2969_s12 + $0x38] sm:$0xff] %v1707_v42  ;;  %v1445_v49 = vadd.f32 %v1997_v43, %v2962_v0  ;;  %v2000_v50 = vadd.f32 %v1999_v47, %v1998_v45  ;;  %v2112_v51 = vadd.f32 %v2111_v48, %v2110_v46 }
 0x264   : > { %v1606_v52 = vadd.f32 %v2109_v44, %v1445_v49  ;;  %v1448_v53 = vadd.f32 %v2000_v50, %v2962_v0 }
 0x266   : > { %v1708_v55 = vadd.f32 %v2343_v54, %v1606_v52  ;;  %v1609_v56 = vadd.f32 %v2112_v51, %v1448_v53  ;;  %v2001_v60 = vpop.f32.mrb[84].mxu0  ;;  %v2113_v61 = vpop.f32.mrb[84].mxu1  ;;  %v2349_v51 = vld [vmem:[%s2746_s6 + $0x70] sm:$0xff] }
 0x267   : > { %v2002_v62 = vpop.f32.mrb[85].mxu0  ;;  %v2114_v63 = vpop.f32.mrb[85].mxu1 }
 0x268   : > { %1740 = vst [vmem:[%s2969_s12 + $0x40] sm:$0xff] %v1708_v55  ;;  %v1709_v2 = vadd.f32 %v2344_v1, %v1609_v56  ;;  %v2003_v3 = vadd.f32 %v2002_v62, %v2001_v60  ;;  %v2115_v4 = vadd.f32 %v2114_v63, %v2113_v61  ;;  %v2004_v5 = vpop.f32.mrb[86].mxu0  ;;  %v2116_v6 = vpop.f32.mrb[86].mxu1  ;;  %v2350_v61 = vld [vmem:[%s2746_s6 + $0x78] sm:$0xff] }
 0x269   : > { %v2005_v7 = vpop.f32.mrb[87].mxu0  ;;  %v2117_v8 = vpop.f32.mrb[87].mxu1 }
 0x26a   : > { %1741 = vst [vmem:[%s2969_s12 + $0x48] sm:$0xff] %v1709_v2  ;;  %v1453_v9 = vadd.f32 %v2003_v3, %v2962_v0  ;;  %v2006_v10 = vadd.f32 %v2005_v7, %v2004_v5  ;;  %v2118_v11 = vadd.f32 %v2117_v8, %v2116_v6 }
 0x26c   : > { %v1614_v12 = vadd.f32 %v2115_v4, %v1453_v9  ;;  %v1456_v13 = vadd.f32 %v2006_v10, %v2962_v0 }
 0x26e   : > { %v1710_v15 = vadd.f32 %v2345_v14, %v1614_v12  ;;  %v1617_v16 = vadd.f32 %v2118_v11, %v1456_v13  ;;  %v2007_v17 = vpop.f32.mrb[88].mxu0  ;;  %v2119_v18 = vpop.f32.mrb[88].mxu1  ;;  %v2351_v11 = vld [vmem:[%s2746_s6 + $0x80] sm:$0xff] }
 0x26f   : > { %v2008_v19 = vpop.f32.mrb[89].mxu0  ;;  %v2120_v20 = vpop.f32.mrb[89].mxu1 }
 0x270   : > { %1742 = vst [vmem:[%s2969_s12 + $0x50] sm:$0xff] %v1710_v15  ;;  %v1711_v22 = vadd.f32 %v2346_v21, %v1617_v16  ;;  %v2009_v57 = vadd.f32 %v2008_v19, %v2007_v17  ;;  %v2121_v23 = vadd.f32 %v2120_v20, %v2119_v18  ;;  %v2010_v58 = vpop.f32.mrb[90].mxu0  ;;  %v2122_v24 = vpop.f32.mrb[90].mxu1  ;;  %v2352_v18 = vld [vmem:[%s2746_s6 + $0x88] sm:$0xff] }
 0x271   : > { %v2011_v59 = vpop.f32.mrb[91].mxu0  ;;  %v2123_v25 = vpop.f32.mrb[91].mxu1 }
 0x272   : > { %1743 = vst [vmem:[%s2969_s12 + $0x58] sm:$0xff] %v1711_v22  ;;  %v1461_v26 = vadd.f32 %v2009_v57, %v2962_v0  ;;  %v2012_v27 = vadd.f32 %v2011_v59, %v2010_v58  ;;  %v2124_v28 = vadd.f32 %v2123_v25, %v2122_v24 }
 0x274   : > { %v1622_v29 = vadd.f32 %v2121_v23, %v1461_v26  ;;  %v1464_v30 = vadd.f32 %v2012_v27, %v2962_v0 }
 0x276   : > { %v1712_v32 = vadd.f32 %v2347_v31, %v1622_v29  ;;  %v1625_v33 = vadd.f32 %v2124_v28, %v1464_v30  ;;  %v2013_v34 = vpop.f32.mrb[92].mxu0  ;;  %v2125_v35 = vpop.f32.mrb[92].mxu1  ;;  %v2353_v28 = vld [vmem:[%s2746_s6 + $0x90] sm:$0xff] }
 0x277   : > { %v2014_v36 = vpop.f32.mrb[93].mxu0  ;;  %v2126_v37 = vpop.f32.mrb[93].mxu1 }
 0x278   : > { %1744 = vst [vmem:[%s2969_s12 + $0x60] sm:$0xff] %v1712_v32  ;;  %v1713_v39 = vadd.f32 %v2348_v38, %v1625_v33  ;;  %v2015_v40 = vadd.f32 %v2014_v36, %v2013_v34  ;;  %v2127_v41 = vadd.f32 %v2126_v37, %v2125_v35  ;;  %v2016_v42 = vpop.f32.mrb[94].mxu0  ;;  %v2128_v43 = vpop.f32.mrb[94].mxu1  ;;  %v2354_v35 = vld [vmem:[%s2746_s6 + $0x98] sm:$0xff] }
 0x279   : > { %v2017_v44 = vpop.f32.mrb[95].mxu0  ;;  %v2129_v45 = vpop.f32.mrb[95].mxu1 }
 0x27a   : > { %1745 = vst [vmem:[%s2969_s12 + $0x68] sm:$0xff] %v1713_v39  ;;  %v1469_v46 = vadd.f32 %v2015_v40, %v2962_v0  ;;  %v2018_v47 = vadd.f32 %v2017_v44, %v2016_v42  ;;  %v2130_v48 = vadd.f32 %v2129_v45, %v2128_v43 }
 0x27c   : > { %v1630_v49 = vadd.f32 %v2127_v41, %v1469_v46  ;;  %v1472_v50 = vadd.f32 %v2018_v47, %v2962_v0 }
 0x27e   : > { %v1714_v52 = vadd.f32 %v2349_v51, %v1630_v49  ;;  %v1633_v53 = vadd.f32 %v2130_v48, %v1472_v50  ;;  %v2019_v54 = vpop.f32.mrb[96].mxu0  ;;  %v2131_v55 = vpop.f32.mrb[96].mxu1  ;;  %v2355_v48 = vld [vmem:[%s2746_s6 + $0xa0] sm:$0xff] }
 0x27f   : > { %v2020_v56 = vpop.f32.mrb[97].mxu0  ;;  %v2132_v60 = vpop.f32.mrb[97].mxu1 }
 0x280   : > { %1746 = vst [vmem:[%s2969_s12 + $0x70] sm:$0xff] %v1714_v52  ;;  %v1715_v62 = vadd.f32 %v2350_v61, %v1633_v53  ;;  %v2021_v63 = vadd.f32 %v2020_v56, %v2019_v54  ;;  %v2133_v1 = vadd.f32 %v2132_v60, %v2131_v55  ;;  %v2022_v2 = vpop.f32.mrb[98].mxu0  ;;  %v2134_v3 = vpop.f32.mrb[98].mxu1  ;;  %v2356_v55 = vld [vmem:[%s2746_s6 + $0xa8] sm:$0xff] }
 0x281   : > { %v2023_v4 = vpop.f32.mrb[99].mxu0  ;;  %v2135_v5 = vpop.f32.mrb[99].mxu1 }
 0x282   : > { %1747 = vst [vmem:[%s2969_s12 + $0x78] sm:$0xff] %v1715_v62  ;;  %v1477_v6 = vadd.f32 %v2021_v63, %v2962_v0  ;;  %v2024_v7 = vadd.f32 %v2023_v4, %v2022_v2  ;;  %v2136_v8 = vadd.f32 %v2135_v5, %v2134_v3 }
 0x284   : > { %v1638_v9 = vadd.f32 %v2133_v1, %v1477_v6  ;;  %v1480_v10 = vadd.f32 %v2024_v7, %v2962_v0 }
 0x286   : > { %v1716_v12 = vadd.f32 %v2351_v11, %v1638_v9  ;;  %v1641_v13 = vadd.f32 %v2136_v8, %v1480_v10  ;;  %v2025_v14 = vpop.f32.mrb[100].mxu0  ;;  %v2137_v15 = vpop.f32.mrb[100].mxu1  ;;  %v2357_v8 = vld [vmem:[%s2746_s6 + $0xb0] sm:$0xff] }
 0x287   : > { %v2026_v16 = vpop.f32.mrb[101].mxu0  ;;  %v2138_v17 = vpop.f32.mrb[101].mxu1 }
 0x288   : > { %1748 = vst [vmem:[%s2969_s12 + $0x80] sm:$0xff] %v1716_v12  ;;  %v1717_v19 = vadd.f32 %v2352_v18, %v1641_v13  ;;  %v2027_v20 = vadd.f32 %v2026_v16, %v2025_v14  ;;  %v2139_v21 = vadd.f32 %v2138_v17, %v2137_v15  ;;  %v2028_v22 = vpop.f32.mrb[102].mxu0  ;;  %v2140_v57 = vpop.f32.mrb[102].mxu1  ;;  %v2358_v15 = vld [vmem:[%s2746_s6 + $0xb8] sm:$0xff] }
 0x289   : > { %v2029_v23 = vpop.f32.mrb[103].mxu0  ;;  %v2141_v58 = vpop.f32.mrb[103].mxu1 }
 0x28a   : > { %1749 = vst [vmem:[%s2969_s12 + $0x88] sm:$0xff] %v1717_v19  ;;  %v1485_v24 = vadd.f32 %v2027_v20, %v2962_v0  ;;  %v2030_v59 = vadd.f32 %v2029_v23, %v2028_v22  ;;  %v2142_v25 = vadd.f32 %v2141_v58, %v2140_v57 }
 0x28c   : > { %v1646_v26 = vadd.f32 %v2139_v21, %v1485_v24  ;;  %v1488_v27 = vadd.f32 %v2030_v59, %v2962_v0 }
 0x28e   : > { %v1718_v29 = vadd.f32 %v2353_v28, %v1646_v26  ;;  %v1649_v30 = vadd.f32 %v2142_v25, %v1488_v27  ;;  %v2031_v31 = vpop.f32.mrb[104].mxu0  ;;  %v2143_v32 = vpop.f32.mrb[104].mxu1  ;;  %v2359_v25 = vld [vmem:[%s2746_s6 + $0xc0] sm:$0xff] }
 0x28f   : > { %v2032_v33 = vpop.f32.mrb[105].mxu0  ;;  %v2144_v34 = vpop.f32.mrb[105].mxu1 }
 0x290   : > { %1750 = vst [vmem:[%s2969_s12 + $0x90] sm:$0xff] %v1718_v29  ;;  %v1719_v36 = vadd.f32 %v2354_v35, %v1649_v30  ;;  %v2033_v37 = vadd.f32 %v2032_v33, %v2031_v31  ;;  %v2145_v38 = vadd.f32 %v2144_v34, %v2143_v32  ;;  %v2034_v39 = vpop.f32.mrb[106].mxu0  ;;  %v2146_v40 = vpop.f32.mrb[106].mxu1  ;;  %v2360_v32 = vld [vmem:[%s2746_s6 + $0xc8] sm:$0xff] }
 0x291   : > { %v2035_v41 = vpop.f32.mrb[107].mxu0  ;;  %v2147_v42 = vpop.f32.mrb[107].mxu1 }
 0x292   : > { %1751 = vst [vmem:[%s2969_s12 + $0x98] sm:$0xff] %v1719_v36  ;;  %v1493_v43 = vadd.f32 %v2033_v37, %v2962_v0  ;;  %v2036_v44 = vadd.f32 %v2035_v41, %v2034_v39  ;;  %v2148_v45 = vadd.f32 %v2147_v42, %v2146_v40 }
 0x294   : > { %v1654_v46 = vadd.f32 %v2145_v38, %v1493_v43  ;;  %v1496_v47 = vadd.f32 %v2036_v44, %v2962_v0 }
 0x296   : > { %v1720_v49 = vadd.f32 %v2355_v48, %v1654_v46  ;;  %v1657_v50 = vadd.f32 %v2148_v45, %v1496_v47  ;;  %v2037_v51 = vpop.f32.mrb[108].mxu0  ;;  %v2149_v52 = vpop.f32.mrb[108].mxu1  ;;  %v2361_v45 = vld [vmem:[%s2746_s6 + $0xd0] sm:$0xff] }
 0x297   : > { %v2038_v53 = vpop.f32.mrb[109].mxu0  ;;  %v2150_v54 = vpop.f32.mrb[109].mxu1 }
 0x298   : > { %1752 = vst [vmem:[%s2969_s12 + $0xa0] sm:$0xff] %v1720_v49  ;;  %v1721_v56 = vadd.f32 %v2356_v55, %v1657_v50  ;;  %v2039_v60 = vadd.f32 %v2038_v53, %v2037_v51  ;;  %v2151_v61 = vadd.f32 %v2150_v54, %v2149_v52  ;;  %v2040_v62 = vpop.f32.mrb[110].mxu0  ;;  %v2152_v63 = vpop.f32.mrb[110].mxu1  ;;  %v2362_v52 = vld [vmem:[%s2746_s6 + $0xd8] sm:$0xff] }
 0x299   : > { %v2041_v1 = vpop.f32.mrb[111].mxu0  ;;  %v2153_v2 = vpop.f32.mrb[111].mxu1 }
 0x29a   : > { %1753 = vst [vmem:[%s2969_s12 + $0xa8] sm:$0xff] %v1721_v56  ;;  %v1501_v3 = vadd.f32 %v2039_v60, %v2962_v0  ;;  %v2042_v4 = vadd.f32 %v2041_v1, %v2040_v62  ;;  %v2154_v5 = vadd.f32 %v2153_v2, %v2152_v63 }
 0x29c   : > { %v1662_v6 = vadd.f32 %v2151_v61, %v1501_v3  ;;  %v1504_v7 = vadd.f32 %v2042_v4, %v2962_v0 }
 0x29e   : > { %v1722_v9 = vadd.f32 %v2357_v8, %v1662_v6  ;;  %v1665_v10 = vadd.f32 %v2154_v5, %v1504_v7  ;;  %v2043_v11 = vpop.f32.mrb[112].mxu0  ;;  %v2155_v12 = vpop.f32.mrb[112].mxu1  ;;  %v2363_v5 = vld [vmem:[%s2746_s6 + $0xe0] sm:$0xff] }
 0x29f   : > { %v2044_v13 = vpop.f32.mrb[113].mxu0  ;;  %v2156_v14 = vpop.f32.mrb[113].mxu1 }
 0x2a0   : > { %1754 = vst [vmem:[%s2969_s12 + $0xb0] sm:$0xff] %v1722_v9  ;;  %v1723_v16 = vadd.f32 %v2358_v15, %v1665_v10  ;;  %v2045_v17 = vadd.f32 %v2044_v13, %v2043_v11  ;;  %v2157_v18 = vadd.f32 %v2156_v14, %v2155_v12  ;;  %v2046_v19 = vpop.f32.mrb[114].mxu0  ;;  %v2158_v20 = vpop.f32.mrb[114].mxu1  ;;  %v2364_v12 = vld [vmem:[%s2746_s6 + $0xe8] sm:$0xff] }
 0x2a1   : > { %v2047_v21 = vpop.f32.mrb[115].mxu0  ;;  %v2159_v22 = vpop.f32.mrb[115].mxu1 }
 0x2a2   : > { %1755 = vst [vmem:[%s2969_s12 + $0xb8] sm:$0xff] %v1723_v16  ;;  %v1509_v57 = vadd.f32 %v2045_v17, %v2962_v0  ;;  %v2048_v23 = vadd.f32 %v2047_v21, %v2046_v19  ;;  %v2160_v58 = vadd.f32 %v2159_v22, %v2158_v20 }
 0x2a4   : > { %v1670_v24 = vadd.f32 %v2157_v18, %v1509_v57  ;;  %v1512_v59 = vadd.f32 %v2048_v23, %v2962_v0 }
 0x2a6   : > { %v1724_v26 = vadd.f32 %v2359_v25, %v1670_v24  ;;  %v1673_v27 = vadd.f32 %v2160_v58, %v1512_v59  ;;  %v2049_v28 = vpop.f32.mrb[116].mxu0  ;;  %v2161_v29 = vpop.f32.mrb[116].mxu1  ;;  %v2365_v58 = vld [vmem:[%s2746_s6 + $0xf0] sm:$0xff]  ;;  %v2366_v25 = vld [vmem:[%s2746_s6 + $0xf8] sm:$0xff] }
 0x2a7   : > { %v2050_v30 = vpop.f32.mrb[117].mxu0  ;;  %v2162_v31 = vpop.f32.mrb[117].mxu1 }
 0x2a8   : > { %1756 = vst [vmem:[%s2969_s12 + $0xc0] sm:$0xff] %v1724_v26  ;;  %v1725_v33 = vadd.f32 %v2360_v32, %v1673_v27  ;;  %v2051_v34 = vadd.f32 %v2050_v30, %v2049_v28  ;;  %v2163_v35 = vadd.f32 %v2162_v31, %v2161_v29  ;;  %v2052_v36 = vpop.f32.mrb[118].mxu0  ;;  %v2164_v37 = vpop.f32.mrb[118].mxu1 }
 0x2a9   : > { %v2053_v38 = vpop.f32.mrb[119].mxu0  ;;  %v2165_v39 = vpop.f32.mrb[119].mxu1 }
 0x2aa   : > { %1757 = vst [vmem:[%s2969_s12 + $0xc8] sm:$0xff] %v1725_v33  ;;  %v1517_v40 = vadd.f32 %v2051_v34, %v2962_v0  ;;  %v2054_v41 = vadd.f32 %v2053_v38, %v2052_v36  ;;  %v2166_v42 = vadd.f32 %v2165_v39, %v2164_v37 }
 0x2ac   : > { %v1678_v43 = vadd.f32 %v2163_v35, %v1517_v40  ;;  %v1520_v44 = vadd.f32 %v2054_v41, %v2962_v0 }
 0x2ae   : > { %v1726_v46 = vadd.f32 %v2361_v45, %v1678_v43  ;;  %v1681_v47 = vadd.f32 %v2166_v42, %v1520_v44  ;;  %v2055_v48 = vpop.f32.mrb[120].mxu0  ;;  %v2167_v49 = vpop.f32.mrb[120].mxu1 }
 0x2af   : > { %v2056_v50 = vpop.f32.mrb[121].mxu0  ;;  %v2168_v51 = vpop.f32.mrb[121].mxu1 }
 0x2b0   : > { %1758 = vst [vmem:[%s2969_s12 + $0xd0] sm:$0xff] %v1726_v46  ;;  %v1727_v53 = vadd.f32 %v2362_v52, %v1681_v47  ;;  %v2057_v54 = vadd.f32 %v2056_v50, %v2055_v48  ;;  %v2169_v55 = vadd.f32 %v2168_v51, %v2167_v49  ;;  %v2058_v56 = vpop.f32.mrb[122].mxu0  ;;  %v2170_v60 = vpop.f32.mrb[122].mxu1 }
 0x2b1   : > { %v2059_v61 = vpop.f32.mrb[123].mxu0  ;;  %v2171_v62 = vpop.f32.mrb[123].mxu1 }
 0x2b2   : > { %1759 = vst [vmem:[%s2969_s12 + $0xd8] sm:$0xff] %v1727_v53  ;;  %v1525_v63 = vadd.f32 %v2057_v54, %v2962_v0  ;;  %v2060_v1 = vadd.f32 %v2059_v61, %v2058_v56  ;;  %v2172_v2 = vadd.f32 %v2171_v62, %v2170_v60 }
 0x2b4   : > { %v1686_v3 = vadd.f32 %v2169_v55, %v1525_v63  ;;  %v1528_v4 = vadd.f32 %v2060_v1, %v2962_v0 }
 0x2b6   : > { %v1728_v6 = vadd.f32 %v2363_v5, %v1686_v3  ;;  %v1689_v7 = vadd.f32 %v2172_v2, %v1528_v4  ;;  %v2061_v8 = vpop.f32.mrb[124].mxu0  ;;  %v2173_v9 = vpop.f32.mrb[124].mxu1 }
 0x2b7   : > { %v2062_v10 = vpop.f32.mrb[125].mxu0  ;;  %v2174_v11 = vpop.f32.mrb[125].mxu1 }
 0x2b8   : > { %1760 = vst [vmem:[%s2969_s12 + $0xe0] sm:$0xff] %v1728_v6  ;;  %v1729_v13 = vadd.f32 %v2364_v12, %v1689_v7  ;;  %v2063_v14 = vadd.f32 %v2062_v10, %v2061_v8  ;;  %v2175_v15 = vadd.f32 %v2174_v11, %v2173_v9  ;;  %v2064_v16 = vpop.f32.mrb[126].mxu0  ;;  %v2176_v17 = vpop.f32.mrb[126].mxu1 }
 0x2b9   : > { %v2065_v18 = vpop.f32.mrb[127].mxu0  ;;  %v2177_v19 = vpop.f32.mrb[127].mxu1 }
 0x2ba   : > { %1761 = vst [vmem:[%s2969_s12 + $0xe8] sm:$0xff] %v1729_v13  ;;  %v1533_v20 = vadd.f32 %v2063_v14, %v2962_v0  ;;  %v2066_v21 = vadd.f32 %v2065_v18, %v2064_v16  ;;  %v2178_v22 = vadd.f32 %v2177_v19, %v2176_v17 }
 0x2bc   : > { %v1694_v57 = vadd.f32 %v2175_v15, %v1533_v20  ;;  %v1536_v23 = vadd.f32 %v2066_v21, %v2962_v0 }
 0x2be   : > { %v1730_v24 = vadd.f32 %v2365_v58, %v1694_v57  ;;  %v1697_v59 = vadd.f32 %v2178_v22, %v1536_v23 }
 0x2c0   : > { %1762 = vst [vmem:[%s2969_s12 + $0xf0] sm:$0xff] %v1730_v24  ;;  %v1731_v26 = vadd.f32 %v2366_v25, %v1697_v59 }
 0x2c2   : > { %1763 = vst [vmem:[%s2969_s12 + $0xf8] sm:$0xff] %v1731_v26 }
 0x2c3   : > { %2466 = shalt.err (!%p2463_p2)
}
 0x2c4   : > { %s2467_s6 = scalar_lea.hbm %s3066_s11, 4096  ;;  %s2471_s10 = scalar_lea.hbm %s3120_s5, 8192 }
 0x2c5   : > { %p2468_p13 = scmp.ne.s32.totalorder %s3066_s11, %s2467_s6  ;;  %p2472_p4 = scmp.lt.u32.totalorder %s3066_s11, %s3120_s5 }
 0x2c6   : > { %p2473_p7 = scmp.lt.u32.totalorder %s2471_s10, %s2467_s6  ;;  %p2475_p11 = scmp.lt.u32.totalorder %s2467_s6, %s3066_s11 }
 0x2c7   : > { %p2469_p6 = pnand %p2468_p13, %p3134_p0 }
 0x2c8   : > { %p2474_p8 = por %p2473_p7, %p2472_p4 }
 0x2c9   : > { %p2470_p10 = pneg %p2469_p6 }
 0x2ca   : > { %p2476_p1 = por %p2475_p11, %p2474_p8 }
 0x2cc   : > { %p2477_p3 = pnand %p2476_p1, %p2470_p10 }
 0x2ce   : > { %2480 = shalt.err (!%p2477_p3)
}
 0x2cf   : > { %s2536_s13 = smov 128   ;;  %s2537_s8 = smov 8  }
 0x2d0   : > { %2189 = dma.vmem_to_hbm [thread:$0]  (%p3134_p0), %s3068_s29, 4096, %s3066_s11, %s1765_s14, %s2536_s13, %s2536_s13, %s2537_s8  }
 0x2d1 PF: > { %s1793_s9 = sand.u32 1, %s2511_s18   ;;  %p3135_p5 = scmp.ne.s32.totalorder %s3125_s25, 0 }
 0x2d2   : > { %p3136_p9 = scmp.ge.s32.totalorder %s2523_s21, 2  ;;  %s1794_s22 = scalar_lea.sflag [#allocation4], %s1793_s9 }
 0x2d4   : > { %p2203_p12 = pnand %p3136_p9, %p3135_p5 }
 0x2d6   : > { %2506 = dma.done.wait (!%p2203_p12), %s1794_s22, 4096  }
 0x2d7   : > { %2508 = vsyncadd (!%p2203_p12), %s1794_s22, 4294963200  ;;  %p19_p2 = scmp.ge.s32.totalorder %s2678_s16, 4   ;;  %s3137_s18 = smov %s2515_s19 }
 0x2d8   : > { %s3138_s19 = smov %s2519_s20  ;;  %s3139_s20 = smov %s2687_s27 }
 0x2d9   : > { %s3140_s21 = smov %s2678_s16  ;;  %21 = sbr.rel (!%p19_p2) target bundleno = 6 (0x6), region = 93 }
 0x2e0   :  { %1799 = vsyncpa [#allocation3], 1 }
 0x2e1   :  { %1801 = vsyncpa [#allocation3 + $0x1], 1 }
 0x2e2   :  { %1802 = vsyncpa [#allocation6], 1 }
 0x2e3   :  { %1803 = vsyncpa [#allocation4], 1 }
 0x2e4   :  { %1805 = vsyncpa [#allocation4 + $0x1], 1 }

// kernel: tpu_custom_call.1
= control target key start
LH: loop header
LB: loop body
LE: loop exit
PB: predicated region body
PF: predicated region fallthrough
CT: control target
= control target key end

     0   :  { %10 = vsyncpa [#allocation3], 0  ;;  %s3115_s0 = inlined_call_operand.hbm [shape: f32[512,128], index: 0, kind: input, shape index: {}]   ;;  %s3116_s1 = inlined_call_operand.hbm [shape: bf16[128,512], index: 1, kind: input, shape index: {}]   ;;  %s3117_s2 = inlined_call_operand.vmem [shape: f32[1,512], index: 2, kind: input, shape index: {}]   ;;  %s3118_s3 = inlined_call_operand.hbm [shape: bf16[512,128], index: 3, kind: input, shape index: {}]   ;;  %s3119_s4 = inlined_call_operand.vmem [shape: f32[1,128], index: 4, kind: input, shape index: {}]   ;;  %s3120_s5 = inlined_call_operand.hbm [shape: f32[512,128], index: 5, kind: output, shape index: {}]  }
   0x1   :  { %12 = vsyncpa [#allocation3 + $0x1], 0 }
   0x2   :  { %13 = vsyncpa [#allocation6], 0 }
   0x3   :  { %14 = vsyncpa [#allocation4], 0 }
   0x4   :  { %16 = vsyncpa [#allocation4 + $0x1], 0  ;;  %s2568_s18 = smov 0   ;;  %s2570_s19 = smov 0  }
   0x5   :  { %s2572_s20 = smov 0   ;;  %s2574_s21 = smov 0  }
   0x6 LB: > { %s2589_s22 = sadd.s32 4294967295, %s2523_s21   ;;  %s1870_s23 = sadd.s32 4294967294, %s2523_s21   ;;  %s2523_s21 = sphi %s2574_s21, %s3140_s21   ;;  %s2519_s20 = sphi %s2572_s20, %s3139_s20   ;;  %s2515_s19 = sphi %s2570_s19, %s3138_s19   ;;  %s2511_s18 = sphi %s2568_s18, %s3137_s18  }
   0x7   : > { %p42_p0 = scmp.ne.s32.totalorder %s2515_s19, %s2511_s18  ;;  %p3121_p1 = scmp.eq.s32.totalorder %s2589_s22, 0 }
   0x8   : > { %p156_p3 = scmp.eq.s32.totalorder %s1870_s23, 1  ;;  %p1871_p5 = scmp.ge.s32.totalorder %s2523_s21, 1 }
   0x9   : > { %p2598_p4 = por %p3121_p1, %p42_p0  ;;  %p163_p7 = scmp.lt.s32.totalorder %s2523_s21, 3 }
   0xa   : > { %p2603_p6 = por %p156_p3, %p42_p0  ;;  %s2525_s27 = smov [#allocation5]  }
   0xb   : > { %s3124_s24 = scalar_select %p2598_p4, 1, 0 }
   0xc   : > { %s3125_s25 = scalar_select %p2603_p6, 1, 0 }
   0xd   : > { %p2608_p8 = pnand %p1871_p5, %p163_p7  ;;  %s175_s28 = sshll.u32 %s2525_s27, 4  ;;  %s2612_s28 = int_to_ptr.vmem [resolvable:$true] %s175_s28 }
   0xe   : > { %s2526_s30 = smov [#allocation7]   ;;  %s2367_s9 = scalar_lea.hbm %s3116_s1, 4096 }
   0xf   : > { %p2191_p9 = pneg %p2608_p8  ;;  %s191_s6 = sshll.u32 %s2526_s30, 4  ;;  %s2623_s6 = int_to_ptr.vmem [resolvable:$true] %s191_s6 }
  0x10   : > { %p2368_p12 = scmp.ne.s32.totalorder %s3116_s1, %s2367_s9  ;;  %p2374_p5 = scmp.lt.u32.totalorder %s2367_s9, %s3116_s1 }
  0x11   : > { %p2619_p11 = pnand %p2191_p9, %p3121_p1 }
  0x13   : > { %p2369_p13 = pneg %p2619_p11 }
  0x15   : > { %p2370_p0 = pnand %p2369_p13, %p2368_p12 }
  0x17   : > { %p2371_p3 = pneg %p2370_p0 }
  0x19   : > { %p2376_p7 = pnand %p2374_p5, %p2371_p3 }
  0x1b   : > { %2379 = shalt.err (!%p2376_p7)
}
  0x1c   : > { %s2380_s14 = scalar_lea.vmem %s2612_s28, 4096  ;;  %p2388_p2 = scmp.lt.s32.totalorder %s2612_s28, %s2612_s28 }
  0x1d   : > { %p2381_p9 = scmp.ne.s32.totalorder %s2612_s28, %s2380_s14  ;;  %p2389_p12 = scmp.lt.s32.totalorder %s2380_s14, %s2380_s14 }
  0x1f   : > { %p2383_p10 = pnand %p2381_p9, %p2369_p13  ;;  %p2390_p0 = por %p2389_p12, %p2388_p2 }
  0x21   : > { %p2384_p1 = pneg %p2383_p10 }
  0x23   : > { %p2391_p6 = pnand %p2390_p0, %p2384_p1 }
  0x25   : > { %2394 = shalt.err (!%p2391_p6)
}
  0x26   : > { %s2527_s15 = smov 256   ;;  %s2528_s16 = smov 16  }
  0x27   : > { %2194 = dma.hbm_to_vmem [thread:$0]  (!%p2619_p11), %s3116_s1, 4096, %s2612_s28, [#allocation6], %s2527_s15, %s2527_s15, %s2528_s16  }
  0x28   : > { %s2395_s7 = scalar_lea.hbm %s3118_s3, 4096 }
  0x29   : > { %p2396_p2 = scmp.ne.s32.totalorder %s3118_s3, %s2395_s7  ;;  %p2402_p10 = scmp.lt.u32.totalorder %s2395_s7, %s3118_s3 }
  0x2b   : > { %p2398_p1 = pnand %p2396_p2, %p2369_p13 }
  0x2d   : > { %p2399_p6 = pneg %p2398_p1 }
  0x2f   : > { %p2404_p3 = pnand %p2402_p10, %p2399_p6 }
  0x31   : > { %2407 = shalt.err (!%p2404_p3)
}
  0x32   : > { %s2408_s28 = scalar_lea.vmem %s2623_s6, 4096  ;;  %p2416_p12 = scmp.lt.s32.totalorder %s2623_s6, %s2623_s6 }
  0x33   : > { %p2409_p5 = scmp.ne.s32.totalorder %s2623_s6, %s2408_s28  ;;  %p2417_p0 = scmp.lt.s32.totalorder %s2408_s28, %s2408_s28 }
  0x35   : > { %p2411_p7 = pnand %p2409_p5, %p2369_p13  ;;  %p2418_p2 = por %p2417_p0, %p2416_p12 }
  0x37   : > { %p2412_p9 = pneg %p2411_p7 }
  0x39   : > { %p2419_p1 = pnand %p2418_p2, %p2412_p9 }
  0x3b   : > { %2422 = shalt.err (!%p2419_p1)
}
  0x3c   : > { %s2529_s12 = smov 64   ;;  %s2530_s13 = smov 4  }
  0x3d   : > { %2197 = dma.hbm_to_vmem [thread:$0]  (!%p2619_p11), %s3118_s3, 4096, %s2623_s6, [#allocation6], %s2529_s12, %s2529_s12, %s2530_s13  }
  0x3e   : > { %s2678_s16 = sadd.s32 1, %s2523_s21   ;;  %s29_s23 = sadd.s32 1, %s2519_s20 }
  0x3f   : > { %s26_s17 = ssub.s32 %s2523_s21, %s2678_s16  ;;  %p36_p6 = scmp.ne.s32.totalorder %s2519_s20, %s2515_s19 }
  0x40   : > { %p27_p13 = scmp.eq.s32.totalorder %s26_s17, 0  ;;  %p37_p10 = scmp.eq.s32.totalorder %s2523_s21, 0 }
  0x41   : > { %p3128_p5 = scmp.eq.s32.totalorder %s2589_s22, 1  ;;  %p2208_p9 = scmp.lt.s32.totalorder %s2523_s21, 2 }
  0x42   : > { %s2687_s27 = scalar_select %p27_p13, %s2519_s20, %s29_s23  }
  0x43   : > { %p38_p3 = por %p37_p10, %p36_p6  ;;  %p2691_p7 = por %p3128_p5, %p36_p6 }
  0x44   : > { %s208_s29 = sand.u32 1, %s2519_s20   ;;  %s1953_s6 = sshll.u32 %s2523_s21, 12 }
  0x45   : > { %s3129_s30 = scalar_select %p2691_p7, 1, 0 }
  0x46   : > { %s1875_s7 = sshll.u32 %s208_s29, 8  ;;  %s2701_s10 = scalar_lea.hbm %s3115_s0, %s1953_s6 }
  0x47   : > { %s212_s11 = scalar_lea.vmem [#allocation2], %s1875_s7  ;;  %p2705_p11 = pnand %p2208_p9, %p38_p3 }
  0x48   : > { %s219_s28 = sshll.u32 %s212_s11, 4  ;;  %s2709_s13 = scalar_lea.sflag [#allocation3], %s208_s29  ;;  %s2703_s28 = int_to_ptr.vmem [resolvable:$true] %s219_s28 }
  0x49   : > { %s2423_s14 = scalar_lea.hbm %s2701_s10, 4096  ;;  %p2425_p0 = pneg %p2705_p11 }
  0x4a   : > { %p2424_p12 = scmp.ne.s32.totalorder %s2701_s10, %s2423_s14  ;;  %s2428_s23 = scalar_lea.hbm %s3115_s0, 8192 }
  0x4b   : > { %p2429_p13 = scmp.lt.u32.totalorder %s2701_s10, %s3115_s0  ;;  %p2430_p6 = scmp.lt.u32.totalorder %s2428_s23, %s2423_s14 }
  0x4c   : > { %p2426_p2 = pnand %p2425_p0, %p2424_p12  ;;  %p2432_p3 = scmp.lt.u32.totalorder %s2423_s14, %s2701_s10 }
  0x4d   : > { %p2431_p10 = por %p2430_p6, %p2429_p13 }
  0x4e   : > { %p2427_p1 = pneg %p2426_p2 }
  0x4f   : > { %p2433_p5 = por %p2432_p3, %p2431_p10 }
  0x51   : > { %p2434_p9 = pnand %p2433_p5, %p2427_p1 }
  0x53   : > { %2437 = shalt.err (!%p2434_p9)
}
  0x54   : > { %s2438_s29 = scalar_lea.vmem %s2703_s28, 4096  ;;  %s2531_s8 = smov [#allocation2]  }
  0x55   : > { %p2439_p12 = scmp.ne.s32.totalorder %s2703_s28, %s2438_s29  ;;  %s2443_s9 = sshll.u32 %s2531_s8, 4  ;;  %s2444_s9 = int_to_ptr.vmem [resolvable:$false] %s2443_s9 }
  0x56   : > { %s2445_s11 = scalar_lea.vmem %s2444_s9, 8192  ;;  %p2446_p4 = scmp.lt.s32.totalorder %s2703_s28, %s2444_s9 }
  0x57   : > { %p2441_p2 = pnand %p2439_p12, %p2425_p0  ;;  %p2447_p13 = scmp.lt.s32.totalorder %s2445_s11, %s2438_s29 }
  0x59   : > { %p2442_p7 = pneg %p2441_p2  ;;  %p2448_p6 = por %p2447_p13, %p2446_p4 }
  0x5b   : > { %p2449_p10 = pnand %p2448_p6, %p2442_p7 }
  0x5d   : > { %2452 = shalt.err (!%p2449_p10)
}
  0x5e   : > { %s2532_s14 = smov 128   ;;  %s2533_s15 = smov 8  }
  0x5f   : > { %2201 = dma.hbm_to_vmem [thread:$0]  (!%p2705_p11), %s2701_s10, 4096, %s2703_s28, %s2709_s13, %s2532_s14, %s2532_s14, %s2533_s15  }
  0x60   : > { %231 = sbr.rel (%p2608_p8) target bundleno = 721 (0x2d1), region = 40  ;;  %s2740_s17 = sand.u32 (!%p2608_p8), 1, %s2515_s19  }
  0x61   : > { %s1879_s23 = sshll.u32 (!%p2608_p8), %s2740_s17, 8  ;;  %s234_s7 = scalar_lea.sflag (!%p2608_p8), [#allocation3], %s2740_s17 }
  0x62   : > { %s2746_s6 = scalar_lea.vmem (!%p2608_p8), [#allocation2], %s1879_s23  ;;  %p3131_p4 = scmp.ne.s32.totalorder (!%p2608_p8), %s3124_s24, 0 }
  0x67   : > { %2498 = dma.done.wait (%p3131_p4), %s234_s7, 4096  }
  0x68   : > { %2500 = vsyncadd (%p3131_p4), %s234_s7, 4294963200  ;;  %p3132_p7 = scmp.eq.s32.totalorder %s2589_s22, 0 }
  0x6a   : > { %2502 = dma.done.wait (%p3132_p7), [#allocation6], 8192   ;;  %p3133_p8 = pmov %p3132_p7 }
  0x6b   : > { %v2534_v0 = vmov 0   ;;  %v2255_v1 = vld [vmem:[#allocation5 + $0x4] ss:$16 sps:$4 sm:$0xff]   ;;  %v2257_v2 = vld [vmem:[#allocation5 + $0xc] ss:$16 sps:$4 sm:$0xff]   ;;  %s2969_s12 = scalar_lea.vmem [#allocation8], %s1879_s23 }
  0x6c   : > { %2504 = vsyncadd (%p3133_p8), [#allocation6], 4294959104  ;;  %569 = vmatprep.mubr.bf16.mxu0 %v2534_v0  ;;  %762 = vmatprep.mubr.bf16.mxu1 %v2534_v0  ;;  %v2259_v3 = vld [vmem:[#allocation5] ss:$16 sps:$4 sm:$0xff]   ;;  %v2260_v4 = vld [vmem:[#allocation5 + $0x8] ss:$16 sps:$4 sm:$0xff]  }
  0x6d   : > { %537 = vmatprep.subr.bf16.mxu0 %v2255_v1  ;;  %730 = vmatprep.subr.bf16.mxu1 %v2257_v2  ;;  %v2261_v5 = vld [vmem:[#allocation5 + $0x24] ss:$16 sps:$4 sm:$0xff]   ;;  %v2263_v6 = vld [vmem:[#allocation5 + $0x2c] ss:$16 sps:$4 sm:$0xff]   ;;  %v2265_v7 = vld [vmem:[#allocation5 + $0x20] ss:$16 sps:$4 sm:$0xff]  }
  0x6e   : > { %538 = vmatpush1.bf16.msra.mxu0 %v2259_v3  ;;  %731 = vmatpush1.bf16.msra.mxu1 %v2260_v4  ;;  %v2266_v8 = vld [vmem:[#allocation5 + $0x28] ss:$16 sps:$4 sm:$0xff]   ;;  %v2267_v9 = vld [vmem:[#allocation5 + $0x44] ss:$16 sps:$4 sm:$0xff]   ;;  %v2269_v10 = vld [vmem:[#allocation5 + $0x4c] ss:$16 sps:$4 sm:$0xff]  }
  0x6f   : > { %539 = vmatprep.subr.bf16.mxu0 %v2261_v5  ;;  %732 = vmatprep.subr.bf16.mxu1 %v2263_v6  ;;  %v2271_v11 = vld [vmem:[#allocation5 + $0x40] ss:$16 sps:$4 sm:$0xff]   ;;  %v2272_v12 = vld [vmem:[#allocation5 + $0x48] ss:$16 sps:$4 sm:$0xff]   ;;  %v2273_v13 = vld [vmem:[#allocation5 + $0x64] ss:$16 sps:$4 sm:$0xff]  }
  0x70   : > { %v2275_v14 = vld [vmem:[#allocation5 + $0x6c] ss:$16 sps:$4 sm:$0xff]   ;;  %v2277_v15 = vld [vmem:[#allocation5 + $0x60] ss:$16 sps:$4 sm:$0xff]   ;;  %v2278_v16 = vld [vmem:[#allocation5 + $0x68] ss:$16 sps:$4 sm:$0xff]  }
  0x71   : > { %v2279_v17 = vld [vmem:[#allocation5 + $0x84] ss:$16 sps:$4 sm:$0xff]   ;;  %v2281_v18 = vld [vmem:[#allocation5 + $0x8c] ss:$16 sps:$4 sm:$0xff]   ;;  %v2283_v19 = vld [vmem:[#allocation5 + $0x80] ss:$16 sps:$4 sm:$0xff]  }
  0x72   : > { %540 = vmatpush1.bf16.msra.mxu0 %v2265_v7  ;;  %733 = vmatpush1.bf16.msra.mxu1 %v2266_v8  ;;  %v2284_v20 = vld [vmem:[#allocation5 + $0x88] ss:$16 sps:$4 sm:$0xff]   ;;  %v2285_v21 = vld [vmem:[#allocation5 + $0xa4] ss:$16 sps:$4 sm:$0xff]   ;;  %v2287_v22 = vld [vmem:[#allocation5 + $0xac] ss:$16 sps:$4 sm:$0xff]  }
  0x73   : > { %541 = vmatprep.subr.bf16.mxu0 %v2267_v9  ;;  %734 = vmatprep.subr.bf16.mxu1 %v2269_v10  ;;  %v2289_v23 = vld [vmem:[#allocation5 + $0xa0] ss:$16 sps:$4 sm:$0xff]   ;;  %v2290_v24 = vld [vmem:[#allocation5 + $0xa8] ss:$16 sps:$4 sm:$0xff]   ;;  %v2291_v25 = vld [vmem:[#allocation5 + $0xc4] ss:$16 sps:$4 sm:$0xff]  }
  0x74   : > { %v2293_v26 = vld [vmem:[#allocation5 + $0xcc] ss:$16 sps:$4 sm:$0xff]   ;;  %v2295_v27 = vld [vmem:[#allocation5 + $0xc0] ss:$16 sps:$4 sm:$0xff]   ;;  %v2296_v28 = vld [vmem:[#allocation5 + $0xc8] ss:$16 sps:$4 sm:$0xff]  }
  0x75   : > { %v2297_v29 = vld [vmem:[#allocation5 + $0xe4] ss:$16 sps:$4 sm:$0xff]   ;;  %v2299_v30 = vld [vmem:[#allocation5 + $0xec] ss:$16 sps:$4 sm:$0xff]   ;;  %v2301_v31 = vld [vmem:[#allocation5 + $0xe0] ss:$16 sps:$4 sm:$0xff]  }
  0x76   : > { %542 = vmatpush1.bf16.msra.mxu0 %v2271_v11  ;;  %735 = vmatpush1.bf16.msra.mxu1 %v2272_v12  ;;  %v2302_v32 = vld [vmem:[#allocation5 + $0xe8] ss:$16 sps:$4 sm:$0xff]   ;;  %v275_v33 = vld [vmem:[%s2746_s6] sm:$0xff]  ;;  %v277_v40 = vld [vmem:[%s2746_s6 + $0x10] sm:$0xff]  ;;  %s1954_s13 = sshll.u32 %s2589_s22, 12  ;;  %s1778_s29 = sshll.u32 %s2969_s12, 4  ;;  %s3068_s29 = int_to_ptr.vmem [resolvable:$true] %s1778_s29 }
  0x77   : > { %543 = vmatprep.subr.bf16.mxu0 %v2273_v13  ;;  %736 = vmatprep.subr.bf16.mxu1 %v2275_v14  ;;  %v276_v34 = vld [vmem:[%s2746_s6 + $0x8] sm:$0xff]  ;;  %v2303_v35 = vld [vmem:[#allocation7 + $0x40] sm:$0xff]   ;;  %v278_v42 = vld [vmem:[%s2746_s6 + $0x18] sm:$0xff]  ;;  %s3066_s11 = scalar_lea.hbm %s3120_s5, %s1954_s13  ;;  %s1765_s14 = scalar_lea.sflag [#allocation4], %s2740_s17 }
  0x78   : > { %v307_v36 = vpack.c.bf16 %v276_v34, %v275_v33  ;;  %v2304_v37 = vld [vmem:[#allocation7] sm:$0xff]   ;;  %v2307_v41 = vld [vmem:[#allocation7 + $0x48] sm:$0xff]   ;;  %v308_v45 = vpack.c.bf16 %v278_v42, %v277_v40  ;;  %v2311_v47 = vld [vmem:[#allocation7 + $0x50] sm:$0xff]   ;;  %s2453_s22 = scalar_lea.vmem %s3068_s29, 4096  ;;  %p3134_p0 = scmp.ne.s32.totalorder %s3129_s30, 0 }
  0x79   : > { %v2305_v38 = vld [vmem:[#allocation7 + $0xc0] sm:$0xff]   ;;  %v2308_v43 = vld [vmem:[#allocation7 + $0x8] sm:$0xff]   ;;  %v2312_v48 = vld [vmem:[#allocation7 + $0x10] sm:$0xff]   ;;  %p2454_p11 = scmp.ne.s32.totalorder %s3068_s29, %s2453_s22  ;;  %s2535_s15 = smov [#allocation8]  }
  0x7a   : > { %544 = vmatpush1.bf16.msra.mxu0 %v2277_v15  ;;  %737 = vmatpush1.bf16.msra.mxu1 %v2278_v16  ;;  %v2306_v39 = vld [vmem:[#allocation7 + $0x80] sm:$0xff]   ;;  %v2309_v44 = vld [vmem:[#allocation7 + $0xc8] sm:$0xff]   ;;  %v2313_v51 = vld [vmem:[#allocation7 + $0xd0] sm:$0xff]   ;;  %s2457_s23 = sshll.u32 %s2535_s15, 4  ;;  %s2458_s23 = int_to_ptr.vmem [resolvable:$false] %s2457_s23 }
  0x7b   : > { %545 = vmatprep.subr.bf16.mxu0 %v2279_v17  ;;  %738 = vmatprep.subr.bf16.mxu1 %v2281_v18  ;;  %v2310_v46 = vld [vmem:[#allocation7 + $0x88] sm:$0xff]   ;;  %v279_v49 = vld [vmem:[%s2746_s6 + $0x20] sm:$0xff]  ;;  %v2314_v52 = vld [vmem:[#allocation7 + $0x90] sm:$0xff]   ;;  %p2455_p1 = pnand %p2454_p11, %p3134_p0  ;;  %s2459_s7 = scalar_lea.vmem %s2458_s23, 8192 }
  0x7c   : > { %v280_v50 = vld [vmem:[%s2746_s6 + $0x28] sm:$0xff]  ;;  %v2315_v53 = vld [vmem:[#allocation7 + $0x58] sm:$0xff]   ;;  %v2319_v58 = vld [vmem:[#allocation7 + $0x60] sm:$0xff]   ;;  %p2460_p5 = scmp.lt.s32.totalorder %s3068_s29, %s2458_s23  ;;  %p2461_p9 = scmp.lt.s32.totalorder %s2459_s7, %s2453_s22 }
  0x7d   : > { %v2316_v54 = vld [vmem:[#allocation7 + $0x18] sm:$0xff]   ;;  %v309_v56 = vpack.c.bf16 %v280_v50, %v279_v49  ;;  %v2320_v59 = vld [vmem:[#allocation7 + $0x20] sm:$0xff]   ;;  %v281_v60 = vld [vmem:[%s2746_s6 + $0x30] sm:$0xff]  ;;  %v357_v50 = vlaneseq  ;;  %p2456_p3 = pneg %p2455_p1 }
  0x7e   : > { %546 = vmatpush1.bf16.msra.mxu0 %v2283_v19  ;;  %739 = vmatpush1.bf16.msra.mxu1 %v2284_v20  ;;  %v2317_v55 = vld [vmem:[#allocation7 + $0xd8] sm:$0xff]   ;;  %v2321_v62 = vld [vmem:[#allocation7 + $0xe0] sm:$0xff]   ;;  %v2323_v1 = vld [vmem:[#allocation7 + $0x68] sm:$0xff]   ;;  %p2462_p12 = por %p2461_p9, %p2460_p5 }
  0x7f   : > { %547 = vmatprep.subr.bf16.mxu0 %v2285_v21  ;;  %740 = vmatprep.subr.bf16.mxu1 %v2287_v22  ;;  %v2318_v57 = vld [vmem:[#allocation7 + $0x98] sm:$0xff]   ;;  %v2322_v63 = vld [vmem:[#allocation7 + $0xa0] sm:$0xff]   ;;  %v2324_v2 = vld [vmem:[#allocation7 + $0x28] sm:$0xff]  }
  0x80   : > { %v282_v61 = vld [vmem:[%s2746_s6 + $0x38] sm:$0xff]  ;;  %v2325_v3 = vld [vmem:[#allocation7 + $0xe8] sm:$0xff]   ;;  %v2327_v6 = vld [vmem:[#allocation7 + $0x70] sm:$0xff]   ;;  %p2463_p2 = pnand %p2462_p12, %p2456_p3 }
  0x81   : > { %v310_v4 = vpack.c.bf16 %v282_v61, %v281_v60  ;;  %v2326_v5 = vld [vmem:[#allocation7 + $0xa8] sm:$0xff]   ;;  %v2328_v7 = vld [vmem:[#allocation7 + $0x30] sm:$0xff]   ;;  %v283_v8 = vld [vmem:[%s2746_s6 + $0x40] sm:$0xff] }
  0x82   : > { %548 = vmatpush1.bf16.msra.mxu0 %v2289_v23  ;;  %741 = vmatpush1.bf16.msra.mxu1 %v2290_v24  ;;  %v284_v9 = vld [vmem:[%s2746_s6 + $0x48] sm:$0xff]  ;;  %v2329_v10 = vld [vmem:[#allocation7 + $0xf0] sm:$0xff]   ;;  %v2331_v12 = vld [vmem:[#allocation7 + $0x78] sm:$0xff]  }
  0x83   : > { %549 = vmatprep.subr.bf16.mxu0 %v2291_v25  ;;  %742 = vmatprep.subr.bf16.mxu1 %v2293_v26  ;;  %v2330_v11 = vld [vmem:[#allocation7 + $0xb0] sm:$0xff]   ;;  %v2332_v13 = vld [vmem:[#allocation7 + $0x38] sm:$0xff]   ;;  %v311_v15 = vpack.c.bf16 %v284_v9, %v283_v8  ;;  %v287_v20 = vld [vmem:[%s2746_s6 + $0x60] sm:$0xff] }
  0x84   : > { %v2333_v14 = vld [vmem:[#allocation7 + $0xf8] sm:$0xff]   ;;  %v285_v17 = vld [vmem:[%s2746_s6 + $0x50] sm:$0xff]  ;;  %v288_v21 = vld [vmem:[%s2746_s6 + $0x68] sm:$0xff] }
  0x85   : > { %v2334_v16 = vld [vmem:[#allocation7 + $0xb8] sm:$0xff]   ;;  %v313_v22 = vpack.c.bf16 %v288_v21, %v287_v20  ;;  %v289_v23 = vld [vmem:[%s2746_s6 + $0x70] sm:$0xff]  ;;  %v291_v26 = vld [vmem:[%s2746_s6 + $0x80] sm:$0xff] }
  0x86   : > { %550 = vmatpush1.bf16.msra.mxu0 %v2295_v27  ;;  %743 = vmatpush1.bf16.msra.mxu1 %v2296_v28  ;;  %v286_v18 = vld [vmem:[%s2746_s6 + $0x58] sm:$0xff]  ;;  %v292_v27 = vld [vmem:[%s2746_s6 + $0x88] sm:$0xff] }
  0x87   : > { %551 = vmatprep.subr.bf16.mxu0 %v2297_v29  ;;  %744 = vmatprep.subr.bf16.mxu1 %v2299_v30  ;;  %v312_v19 = vpack.c.bf16 %v286_v18, %v285_v17  ;;  %v290_v24 = vld [vmem:[%s2746_s6 + $0x78] sm:$0xff]  ;;  %v315_v28 = vpack.c.bf16 %v292_v27, %v291_v26  ;;  %v293_v29 = vld [vmem:[%s2746_s6 + $0x90] sm:$0xff]  ;;  %v296_v33 = vld [vmem:[%s2746_s6 + $0xa8] sm:$0xff] }
  0x88   : > { %v314_v25 = vpack.c.bf16 %v290_v24, %v289_v23  ;;  %v294_v30 = vld [vmem:[%s2746_s6 + $0x98] sm:$0xff] }
  0x89   : > { %v302_v42 = vld [vmem:[%s2746_s6 + $0xd8] sm:$0xff] }
  0x8a   : > { %552 = vmatpush1.bf16.msra.mxu0 %v2301_v31  ;;  %745 = vmatpush1.bf16.msra.mxu1 %v2302_v32  ;;  %v316_v31 = vpack.c.bf16 %v294_v30, %v293_v29  ;;  %v295_v32 = vld [vmem:[%s2746_s6 + $0xa0] sm:$0xff] }
  0x8b   : > { %1955 = vmatprep.subr.bf16.mxu0 %v2303_v35  ;;  %2067 = vmatprep.subr.bf16.mxu1 %v2305_v38  ;;  %v317_v34 = vpack.c.bf16 %v296_v33, %v295_v32  ;;  %v297_v35 = vld [vmem:[%s2746_s6 + $0xb0] sm:$0xff]  ;;  %v299_v38 = vld [vmem:[%s2746_s6 + $0xc0] sm:$0xff] }
  0x8d   : > { %570 = vmatmul.mubr.bf16.vlgmr.msra.gmra.mrb[0].mxu0 %v307_v36  ;;  %763 = vmatmul.mubr.bf16.vlgmr.msra.gmra.mrb[0].mxu1 %v307_v36  ;;  %v298_v36 = vld [vmem:[%s2746_s6 + $0xb8] sm:$0xff] }
  0x8e   : > { %579 = vmatprep.mubr.bf16.mxu0 %v2534_v0  ;;  %772 = vmatprep.mubr.bf16.mxu1 %v2534_v0 }
  0x8f   : > { %1956 = vmatpush3.bf16.msra.mxu0 %v2304_v37  ;;  %2068 = vmatpush3.bf16.msra.mxu1 %v2306_v39  ;;  %v318_v37 = vpack.c.bf16 %v298_v36, %v297_v35  ;;  %v300_v39 = vld [vmem:[%s2746_s6 + $0xc8] sm:$0xff] }
  0x90   : > { %1957 = vmatprep.subr.bf16.mxu0 %v2307_v41  ;;  %2069 = vmatprep.subr.bf16.mxu1 %v2309_v44  ;;  %v319_v40 = vpack.c.bf16 %v300_v39, %v299_v38  ;;  %v301_v41 = vld [vmem:[%s2746_s6 + $0xd0] sm:$0xff]  ;;  %v303_v44 = vld [vmem:[%s2746_s6 + $0xe0] sm:$0xff] }
  0x93   : > { %1958 = vmatpush3.bf16.msra.mxu0 %v2308_v43  ;;  %2070 = vmatpush3.bf16.msra.mxu1 %v2310_v46  ;;  %v320_v43 = vpack.c.bf16 %v302_v42, %v301_v41 }
  0x94   : > { %1959 = vmatprep.subr.bf16.mxu0 %v2311_v47  ;;  %2071 = vmatprep.subr.bf16.mxu1 %v2313_v51  ;;  %v305_v47 = vld [vmem:[%s2746_s6 + $0xf0] sm:$0xff]  ;;  %v358_v51 = vshrl.u32 %v357_v50, 7 }
  0x95   : > { %580 = vmatmul.mubr.bf16.gmra.mrb[4].mxu0 %v308_v45  ;;  %773 = vmatmul.mubr.bf16.gmra.mrb[4].mxu1 %v308_v45  ;;  %v304_v45 = vld [vmem:[%s2746_s6 + $0xe8] sm:$0xff] }
  0x96   : > { %589 = vmatprep.mubr.bf16.mxu0 %v2534_v0  ;;  %782 = vmatprep.mubr.bf16.mxu1 %v2534_v0  ;;  %v321_v46 = vpack.c.bf16 %v304_v45, %v303_v44 }
  0x97   : > { %1960 = vmatpush3.bf16.msra.mxu0 %v2312_v48  ;;  %2072 = vmatpush3.bf16.msra.mxu1 %v2314_v52  ;;  %v306_v48 = vld [vmem:[%s2746_s6 + $0xf8] sm:$0xff]  ;;  %v359_v52 = vsub.s32 0, %v358_v51 }
  0x98   : > { %1961 = vmatprep.subr.bf16.mxu0 %v2315_v53  ;;  %2073 = vmatprep.subr.bf16.mxu1 %v2317_v55  ;;  %v322_v49 = vpack.c.bf16 %v306_v48, %v305_v47  ;;  %v367_v53 = vsub.s32 2, %v358_v51  ;;  %v363_v55 = vsub.s32 1, %v358_v51 }
  0x9b   : > { %1962 = vmatpush3.bf16.msra.mxu0 %v2316_v54  ;;  %2074 = vmatpush3.bf16.msra.mxu1 %v2318_v57  ;;  %v355_v54 = vld [vmem:[%s3117_s2] sm:$0xf] }
  0x9c   : > { %1963 = vmatprep.subr.bf16.mxu0 %v2319_v58  ;;  %2075 = vmatprep.subr.bf16.mxu1 %v2321_v62  ;;  %v2823_v57 = vrot.slane %v355_v54, %v359_v52  ;;  %v2825_v58 = vrot.slane %v355_v54, %v367_v53 }
  0x9d   : > { %590 = vmatmul.mubr.bf16.gmra.mrb[8].mxu0 %v309_v56  ;;  %783 = vmatmul.mubr.bf16.gmra.mrb[8].mxu1 %v309_v56  ;;  %v371_v56 = vsub.s32 3, %v358_v51 }
  0x9e   : > { %599 = vmatprep.mubr.bf16.mxu0 %v2534_v0  ;;  %792 = vmatprep.mubr.bf16.mxu1 %v2534_v0 }
  0x9f   : > { %1964 = vmatpush3.bf16.msra.mxu0 %v2320_v59  ;;  %2076 = vmatpush3.bf16.msra.mxu1 %v2322_v63  ;;  %v2829_v59 = vrot.slane %v355_v54, %v371_v56 }
  0xa0   : > { %1965 = vmatprep.subr.bf16.mxu0 %v2323_v1  ;;  %2077 = vmatprep.subr.bf16.mxu1 %v2325_v3 }
  0xa3   : > { %1966 = vmatpush3.bf16.msra.mxu0 %v2324_v2  ;;  %2078 = vmatpush3.bf16.msra.mxu1 %v2326_v5 }
  0xa4   : > { %1967 = vmatprep.subr.bf16.mxu0 %v2327_v6  ;;  %2079 = vmatprep.subr.bf16.mxu1 %v2329_v10 }
  0xa5   : > { %600 = vmatmul.mubr.bf16.gmra.mrb[12].mxu0 %v310_v4  ;;  %793 = vmatmul.mubr.bf16.gmra.mrb[12].mxu1 %v310_v4 }
  0xa6   : > { %609 = vmatprep.mubr.bf16.mxu0 %v2534_v0  ;;  %802 = vmatprep.mubr.bf16.mxu1 %v2534_v0 }
  0xa7   : > { %1968 = vmatpush3.bf16.msra.mxu0 %v2328_v7  ;;  %2080 = vmatpush3.bf16.msra.mxu1 %v2330_v11 }
  0xa8   : > { %1969 = vmatprep.subr.bf16.mxu0 %v2331_v12  ;;  %2081 = vmatprep.subr.bf16.mxu1 %v2333_v14 }
  0xab   : > { %1970 = vmatpush3.bf16.msra.mxu0 %v2332_v13  ;;  %2082 = vmatpush3.bf16.msra.mxu1 %v2334_v16 }
  0xad   : > { %610 = vmatmul.mubr.bf16.gmra.mrb[16].mxu0 %v311_v15  ;;  %803 = vmatmul.mubr.bf16.gmra.mrb[16].mxu1 %v311_v15 }
  0xae   : > { %619 = vmatprep.mubr.bf16.mxu0 %v2534_v0  ;;  %812 = vmatprep.mubr.bf16.mxu1 %v2534_v0 }
  0xb5   : > { %620 = vmatmul.mubr.bf16.gmra.mrb[20].mxu0 %v312_v19  ;;  %813 = vmatmul.mubr.bf16.gmra.mrb[20].mxu1 %v312_v19 }
  0xb6   : > { %629 = vmatprep.mubr.bf16.mxu0 %v2534_v0  ;;  %822 = vmatprep.mubr.bf16.mxu1 %v2534_v0 }
  0xbd   : > { %630 = vmatmul.mubr.bf16.gmra.mrb[24].mxu0 %v313_v22  ;;  %823 = vmatmul.mubr.bf16.gmra.mrb[24].mxu1 %v313_v22 }
  0xbe   : > { %639 = vmatprep.mubr.bf16.mxu0 %v2534_v0  ;;  %832 = vmatprep.mubr.bf16.mxu1 %v2534_v0 }
  0xc5   : > { %640 = vmatmul.mubr.bf16.gmra.mrb[28].mxu0 %v314_v25  ;;  %833 = vmatmul.mubr.bf16.gmra.mrb[28].mxu1 %v314_v25 }
  0xc6   : > { %649 = vmatprep.mubr.bf16.mxu0 %v2534_v0  ;;  %842 = vmatprep.mubr.bf16.mxu1 %v2534_v0 }
  0xcd   : > { %650 = vmatmul.mubr.bf16.gmra.mrb[32].mxu0 %v315_v28  ;;  %843 = vmatmul.mubr.bf16.gmra.mrb[32].mxu1 %v315_v28 }
  0xce   : > { %659 = vmatprep.mubr.bf16.mxu0 %v2534_v0  ;;  %852 = vmatprep.mubr.bf16.mxu1 %v2534_v0 }
  0xd5   : > { %660 = vmatmul.mubr.bf16.gmra.mrb[36].mxu0 %v316_v31  ;;  %853 = vmatmul.mubr.bf16.gmra.mrb[36].mxu1 %v316_v31 }
  0xd6   : > { %669 = vmatprep.mubr.bf16.mxu0 %v2534_v0  ;;  %862 = vmatprep.mubr.bf16.mxu1 %v2534_v0 }
  0xdd   : > { %670 = vmatmul.mubr.bf16.gmra.mrb[40].mxu0 %v317_v34  ;;  %863 = vmatmul.mubr.bf16.gmra.mrb[40].mxu1 %v317_v34 }
  0xde   : > { %679 = vmatprep.mubr.bf16.mxu0 %v2534_v0  ;;  %872 = vmatprep.mubr.bf16.mxu1 %v2534_v0 }
  0xe5   : > { %680 = vmatmul.mubr.bf16.gmra.mrb[44].mxu0 %v318_v37  ;;  %873 = vmatmul.mubr.bf16.gmra.mrb[44].mxu1 %v318_v37 }
  0xe6   : > { %689 = vmatprep.mubr.bf16.mxu0 %v2534_v0  ;;  %882 = vmatprep.mubr.bf16.mxu1 %v2534_v0 }
  0xed   : > { %690 = vmatmul.mubr.bf16.gmra.mrb[48].mxu0 %v319_v40  ;;  %883 = vmatmul.mubr.bf16.gmra.mrb[48].mxu1 %v319_v40 }
  0xee   : > { %699 = vmatprep.mubr.bf16.mxu0 %v2534_v0  ;;  %892 = vmatprep.mubr.bf16.mxu1 %v2534_v0 }
  0xf5   : > { %700 = vmatmul.mubr.bf16.gmra.mrb[52].mxu0 %v320_v43  ;;  %893 = vmatmul.mubr.bf16.gmra.mrb[52].mxu1 %v320_v43 }
  0xf6   : > { %709 = vmatprep.mubr.bf16.mxu0 %v2534_v0  ;;  %902 = vmatprep.mubr.bf16.mxu1 %v2534_v0 }
  0xfd   : > { %710 = vmatmul.mubr.bf16.gmra.mrb[56].mxu0 %v321_v46  ;;  %903 = vmatmul.mubr.bf16.gmra.mrb[56].mxu1 %v321_v46 }
  0xfe   : > { %719 = vmatprep.mubr.bf16.mxu0 %v2534_v0  ;;  %912 = vmatprep.mubr.bf16.mxu1 %v2534_v0  ;;  %v2827_v0 = vrot.slane %v355_v54, %v363_v55 }
 0x105   : > { %720 = vmatmul.mubr.bf16.gmra.mrb[60].mxu0 %v322_v49  ;;  %913 = vmatmul.mubr.bf16.gmra.mrb[60].mxu1 %v322_v49 }
 0x160   : > { %v571_v60 = vpop.f32.mrb[0].mxu0  ;;  %v764_v61 = vpop.f32.mrb[0].mxu1 }
 0x161   : > { %v572_v62 = vadd.f32 %v571_v60, %v2823_v57  ;;  %v765_v63 = vadd.f32 %v764_v61, %v2825_v58  ;;  %v573_v1 = vpop.f32.mrb[1].mxu0  ;;  %v766_v2 = vpop.f32.mrb[1].mxu1 }
 0x162   : > { %v574_v3 = vadd.f32 %v573_v1, %v2827_v0  ;;  %v767_v4 = vadd.f32 %v766_v2, %v2829_v59  ;;  %v575_v5 = vpop.f32.mrb[2].mxu0  ;;  %v768_v6 = vpop.f32.mrb[2].mxu1 }
 0x163   : > { %v925_v7 = vmax.f32 %v765_v63, 0.0  ;;  %v576_v8 = vadd.f32 %v575_v5, %v2823_v57  ;;  %v769_v9 = vadd.f32 %v768_v6, %v2825_v58  ;;  %v577_v10 = vpop.f32.mrb[3].mxu0  ;;  %v770_v11 = vpop.f32.mrb[3].mxu1  ;;  %v923_v15 = vmax.f32 %v572_v62, 0.0 }
 0x164   : > { %v926_v12 = vmax.f32 %v767_v4, 0.0  ;;  %v578_v13 = vadd.f32 %v577_v10, %v2827_v0  ;;  %v771_v14 = vadd.f32 %v770_v11, %v2829_v59  ;;  %v924_v18 = vmax.f32 %v574_v3, 0.0 }
 0x165   : > { %v927_v16 = vmax.f32 %v576_v8, 0.0  ;;  %v929_v17 = vmax.f32 %v769_v9, 0.0 }
 0x166   : > { %v928_v19 = vmax.f32 %v578_v13, 0.0  ;;  %v930_v20 = vmax.f32 %v771_v14, 0.0 }
 0x167   : > { %v1051_v21 = vpack.c.bf16 %v927_v16, %v923_v15  ;;  %v1053_v22 = vpack.c.bf16 %v929_v17, %v925_v7 }
 0x168   : > { %v1052_v23 = vpack.c.bf16 %v928_v19, %v924_v18  ;;  %v1054_v24 = vpack.c.bf16 %v930_v20, %v926_v12  ;;  %v581_v25 = vpop.f32.mrb[4].mxu0  ;;  %v774_v26 = vpop.f32.mrb[4].mxu1 }
 0x169   : > { %v582_v27 = vadd.f32 %v581_v25, %v2823_v57  ;;  %v775_v28 = vadd.f32 %v774_v26, %v2825_v58  ;;  %v583_v29 = vpop.f32.mrb[5].mxu0  ;;  %v776_v30 = vpop.f32.mrb[5].mxu1 }
 0x16a   : > { %v584_v31 = vadd.f32 %v583_v29, %v2827_v0  ;;  %v777_v32 = vadd.f32 %v776_v30, %v2829_v59  ;;  %v585_v33 = vpop.f32.mrb[6].mxu0  ;;  %v778_v34 = vpop.f32.mrb[6].mxu1  ;;  %1410 = vmatprep.mubr.bf16.mxu0 %v1052_v23  ;;  %1571 = vmatprep.mubr.bf16.mxu1 %v1054_v24 }
 0x16b   : > { %v933_v35 = vmax.f32 %v775_v28, 0.0  ;;  %v586_v36 = vadd.f32 %v585_v33, %v2823_v57  ;;  %v779_v37 = vadd.f32 %v778_v34, %v2825_v58  ;;  %v587_v38 = vpop.f32.mrb[7].mxu0  ;;  %v780_v39 = vpop.f32.mrb[7].mxu1  ;;  %1411 = vmatmul.mubr.bf16.vlgmr.msra.gmra.mrb[64].mxu0 %v1051_v21  ;;  %1572 = vmatmul.mubr.bf16.vlgmr.msra.gmra.mrb[64].mxu1 %v1053_v22  ;;  %v931_v43 = vmax.f32 %v582_v27, 0.0 }
 0x16c   : > { %v934_v40 = vmax.f32 %v777_v32, 0.0  ;;  %v588_v41 = vadd.f32 %v587_v38, %v2827_v0  ;;  %v781_v42 = vadd.f32 %v780_v39, %v2829_v59  ;;  %v932_v46 = vmax.f32 %v584_v31, 0.0 }
 0x16d   : > { %v935_v44 = vmax.f32 %v586_v36, 0.0  ;;  %v937_v45 = vmax.f32 %v779_v37, 0.0 }
 0x16e   : > { %v936_v47 = vmax.f32 %v588_v41, 0.0  ;;  %v938_v48 = vmax.f32 %v781_v42, 0.0 }
 0x16f   : > { %v1055_v49 = vpack.c.bf16 %v935_v44, %v931_v43  ;;  %v1057_v50 = vpack.c.bf16 %v937_v45, %v933_v35 }
 0x170   : > { %v1056_v51 = vpack.c.bf16 %v936_v47, %v932_v46  ;;  %v1058_v52 = vpack.c.bf16 %v938_v48, %v934_v40  ;;  %v591_v53 = vpop.f32.mrb[8].mxu0  ;;  %v784_v54 = vpop.f32.mrb[8].mxu1 }
 0x171   : > { %v592_v55 = vadd.f32 %v591_v53, %v2823_v57  ;;  %v785_v56 = vadd.f32 %v784_v54, %v2825_v58  ;;  %v593_v60 = vpop.f32.mrb[9].mxu0  ;;  %v786_v61 = vpop.f32.mrb[9].mxu1 }
 0x172   : > { %v594_v62 = vadd.f32 %v593_v60, %v2827_v0  ;;  %v787_v63 = vadd.f32 %v786_v61, %v2829_v59  ;;  %v595_v1 = vpop.f32.mrb[10].mxu0  ;;  %v788_v2 = vpop.f32.mrb[10].mxu1  ;;  %1418 = vmatprep.mubr.bf16.mxu0 %v1056_v51  ;;  %1579 = vmatprep.mubr.bf16.mxu1 %v1058_v52 }
 0x173   : > { %v941_v3 = vmax.f32 %v785_v56, 0.0  ;;  %v596_v4 = vadd.f32 %v595_v1, %v2823_v57  ;;  %v789_v5 = vadd.f32 %v788_v2, %v2825_v58  ;;  %v597_v6 = vpop.f32.mrb[11].mxu0  ;;  %v790_v7 = vpop.f32.mrb[11].mxu1  ;;  %1419 = vmatmul.mubr.bf16.gmra.mrb[68].mxu0 %v1055_v49  ;;  %1580 = vmatmul.mubr.bf16.gmra.mrb[68].mxu1 %v1057_v50  ;;  %v939_v11 = vmax.f32 %v592_v55, 0.0 }
 0x174   : > { %v942_v8 = vmax.f32 %v787_v63, 0.0  ;;  %v598_v9 = vadd.f32 %v597_v6, %v2827_v0  ;;  %v791_v10 = vadd.f32 %v790_v7, %v2829_v59  ;;  %v940_v14 = vmax.f32 %v594_v62, 0.0 }
 0x175   : > { %v943_v12 = vmax.f32 %v596_v4, 0.0  ;;  %v945_v13 = vmax.f32 %v789_v5, 0.0 }
 0x176   : > { %v944_v15 = vmax.f32 %v598_v9, 0.0  ;;  %v946_v16 = vmax.f32 %v791_v10, 0.0 }
 0x177   : > { %v1059_v17 = vpack.c.bf16 %v943_v12, %v939_v11  ;;  %v1061_v18 = vpack.c.bf16 %v945_v13, %v941_v3 }
 0x178   : > { %v1060_v19 = vpack.c.bf16 %v944_v15, %v940_v14  ;;  %v1062_v20 = vpack.c.bf16 %v946_v16, %v942_v8  ;;  %v601_v21 = vpop.f32.mrb[12].mxu0  ;;  %v794_v22 = vpop.f32.mrb[12].mxu1 }
 0x179   : > { %v602_v23 = vadd.f32 %v601_v21, %v2823_v57  ;;  %v795_v24 = vadd.f32 %v794_v22, %v2825_v58  ;;  %v603_v25 = vpop.f32.mrb[13].mxu0  ;;  %v796_v26 = vpop.f32.mrb[13].mxu1 }
 0x17a   : > { %v604_v27 = vadd.f32 %v603_v25, %v2827_v0  ;;  %v797_v28 = vadd.f32 %v796_v26, %v2829_v59  ;;  %v605_v29 = vpop.f32.mrb[14].mxu0  ;;  %v798_v30 = vpop.f32.mrb[14].mxu1  ;;  %1426 = vmatprep.mubr.bf16.mxu0 %v1060_v19  ;;  %1587 = vmatprep.mubr.bf16.mxu1 %v1062_v20 }
 0x17b   : > { %v949_v31 = vmax.f32 %v795_v24, 0.0  ;;  %v606_v32 = vadd.f32 %v605_v29, %v2823_v57  ;;  %v799_v33 = vadd.f32 %v798_v30, %v2825_v58  ;;  %v607_v34 = vpop.f32.mrb[15].mxu0  ;;  %v800_v35 = vpop.f32.mrb[15].mxu1  ;;  %1427 = vmatmul.mubr.bf16.gmra.mrb[72].mxu0 %v1059_v17  ;;  %1588 = vmatmul.mubr.bf16.gmra.mrb[72].mxu1 %v1061_v18  ;;  %v947_v39 = vmax.f32 %v602_v23, 0.0 }
 0x17c   : > { %v950_v36 = vmax.f32 %v797_v28, 0.0  ;;  %v608_v37 = vadd.f32 %v607_v34, %v2827_v0  ;;  %v801_v38 = vadd.f32 %v800_v35, %v2829_v59  ;;  %v948_v42 = vmax.f32 %v604_v27, 0.0 }
 0x17d   : > { %v951_v40 = vmax.f32 %v606_v32, 0.0  ;;  %v953_v41 = vmax.f32 %v799_v33, 0.0 }
 0x17e   : > { %v952_v43 = vmax.f32 %v608_v37, 0.0  ;;  %v954_v44 = vmax.f32 %v801_v38, 0.0 }
 0x17f   : > { %v1063_v45 = vpack.c.bf16 %v951_v40, %v947_v39  ;;  %v1065_v46 = vpack.c.bf16 %v953_v41, %v949_v31 }
 0x180   : > { %v1064_v47 = vpack.c.bf16 %v952_v43, %v948_v42  ;;  %v1066_v48 = vpack.c.bf16 %v954_v44, %v950_v36  ;;  %v611_v49 = vpop.f32.mrb[16].mxu0  ;;  %v804_v50 = vpop.f32.mrb[16].mxu1 }
 0x181   : > { %v612_v51 = vadd.f32 %v611_v49, %v2823_v57  ;;  %v805_v52 = vadd.f32 %v804_v50, %v2825_v58  ;;  %v613_v53 = vpop.f32.mrb[17].mxu0  ;;  %v806_v54 = vpop.f32.mrb[17].mxu1 }
 0x182   : > { %v614_v55 = vadd.f32 %v613_v53, %v2827_v0  ;;  %v807_v56 = vadd.f32 %v806_v54, %v2829_v59  ;;  %v615_v60 = vpop.f32.mrb[18].mxu0  ;;  %v808_v61 = vpop.f32.mrb[18].mxu1  ;;  %1434 = vmatprep.mubr.bf16.mxu0 %v1064_v47  ;;  %1595 = vmatprep.mubr.bf16.mxu1 %v1066_v48 }
 0x183   : > { %v957_v62 = vmax.f32 %v805_v52, 0.0  ;;  %v616_v63 = vadd.f32 %v615_v60, %v2823_v57  ;;  %v809_v1 = vadd.f32 %v808_v61, %v2825_v58  ;;  %v617_v2 = vpop.f32.mrb[19].mxu0  ;;  %v810_v3 = vpop.f32.mrb[19].mxu1  ;;  %1435 = vmatmul.mubr.bf16.gmra.mrb[76].mxu0 %v1063_v45  ;;  %1596 = vmatmul.mubr.bf16.gmra.mrb[76].mxu1 %v1065_v46  ;;  %v955_v7 = vmax.f32 %v612_v51, 0.0 }
 0x184   : > { %v958_v4 = vmax.f32 %v807_v56, 0.0  ;;  %v618_v5 = vadd.f32 %v617_v2, %v2827_v0  ;;  %v811_v6 = vadd.f32 %v810_v3, %v2829_v59  ;;  %v956_v10 = vmax.f32 %v614_v55, 0.0 }
 0x185   : > { %v959_v8 = vmax.f32 %v616_v63, 0.0  ;;  %v961_v9 = vmax.f32 %v809_v1, 0.0 }
 0x186   : > { %v960_v11 = vmax.f32 %v618_v5, 0.0  ;;  %v962_v12 = vmax.f32 %v811_v6, 0.0 }
 0x187   : > { %v1067_v13 = vpack.c.bf16 %v959_v8, %v955_v7  ;;  %v1069_v14 = vpack.c.bf16 %v961_v9, %v957_v62 }
 0x188   : > { %v1068_v15 = vpack.c.bf16 %v960_v11, %v956_v10  ;;  %v1070_v16 = vpack.c.bf16 %v962_v12, %v958_v4  ;;  %v621_v17 = vpop.f32.mrb[20].mxu0  ;;  %v814_v18 = vpop.f32.mrb[20].mxu1 }
 0x189   : > { %v622_v19 = vadd.f32 %v621_v17, %v2823_v57  ;;  %v815_v20 = vadd.f32 %v814_v18, %v2825_v58  ;;  %v623_v21 = vpop.f32.mrb[21].mxu0  ;;  %v816_v22 = vpop.f32.mrb[21].mxu1 }
 0x18a   : > { %v624_v23 = vadd.f32 %v623_v21, %v2827_v0  ;;  %v817_v24 = vadd.f32 %v816_v22, %v2829_v59  ;;  %v625_v25 = vpop.f32.mrb[22].mxu0  ;;  %v818_v26 = vpop.f32.mrb[22].mxu1  ;;  %1442 = vmatprep.mubr.bf16.mxu0 %v1068_v15  ;;  %1603 = vmatprep.mubr.bf16.mxu1 %v1070_v16 }
 0x18b   : > { %v965_v27 = vmax.f32 %v815_v20, 0.0  ;;  %v626_v28 = vadd.f32 %v625_v25, %v2823_v57  ;;  %v819_v29 = vadd.f32 %v818_v26, %v2825_v58  ;;  %v627_v30 = vpop.f32.mrb[23].mxu0  ;;  %v820_v31 = vpop.f32.mrb[23].mxu1  ;;  %1443 = vmatmul.mubr.bf16.gmra.mrb[80].mxu0 %v1067_v13  ;;  %1604 = vmatmul.mubr.bf16.gmra.mrb[80].mxu1 %v1069_v14  ;;  %v963_v35 = vmax.f32 %v622_v19, 0.0 }
 0x18c   : > { %v966_v32 = vmax.f32 %v817_v24, 0.0  ;;  %v628_v33 = vadd.f32 %v627_v30, %v2827_v0  ;;  %v821_v34 = vadd.f32 %v820_v31, %v2829_v59  ;;  %v964_v38 = vmax.f32 %v624_v23, 0.0 }
 0x18d   : > { %v967_v36 = vmax.f32 %v626_v28, 0.0  ;;  %v969_v37 = vmax.f32 %v819_v29, 0.0 }
 0x18e   : > { %v968_v39 = vmax.f32 %v628_v33, 0.0  ;;  %v970_v40 = vmax.f32 %v821_v34, 0.0 }
 0x18f   : > { %v1071_v41 = vpack.c.bf16 %v967_v36, %v963_v35  ;;  %v1073_v42 = vpack.c.bf16 %v969_v37, %v965_v27 }
 0x190   : > { %v1072_v43 = vpack.c.bf16 %v968_v39, %v964_v38  ;;  %v1074_v44 = vpack.c.bf16 %v970_v40, %v966_v32  ;;  %v631_v45 = vpop.f32.mrb[24].mxu0  ;;  %v824_v46 = vpop.f32.mrb[24].mxu1 }
 0x191   : > { %v632_v47 = vadd.f32 %v631_v45, %v2823_v57  ;;  %v825_v48 = vadd.f32 %v824_v46, %v2825_v58  ;;  %v633_v49 = vpop.f32.mrb[25].mxu0  ;;  %v826_v50 = vpop.f32.mrb[25].mxu1 }
 0x192   : > { %v634_v51 = vadd.f32 %v633_v49, %v2827_v0  ;;  %v827_v52 = vadd.f32 %v826_v50, %v2829_v59  ;;  %v635_v53 = vpop.f32.mrb[26].mxu0  ;;  %v828_v54 = vpop.f32.mrb[26].mxu1  ;;  %1450 = vmatprep.mubr.bf16.mxu0 %v1072_v43  ;;  %1611 = vmatprep.mubr.bf16.mxu1 %v1074_v44 }
 0x193   : > { %v973_v55 = vmax.f32 %v825_v48, 0.0  ;;  %v636_v56 = vadd.f32 %v635_v53, %v2823_v57  ;;  %v829_v60 = vadd.f32 %v828_v54, %v2825_v58  ;;  %v637_v61 = vpop.f32.mrb[27].mxu0  ;;  %v830_v62 = vpop.f32.mrb[27].mxu1  ;;  %1451 = vmatmul.mubr.bf16.gmra.mrb[84].mxu0 %v1071_v41  ;;  %1612 = vmatmul.mubr.bf16.gmra.mrb[84].mxu1 %v1073_v42  ;;  %v971_v3 = vmax.f32 %v632_v47, 0.0 }
 0x194   : > { %v974_v63 = vmax.f32 %v827_v52, 0.0  ;;  %v638_v1 = vadd.f32 %v637_v61, %v2827_v0  ;;  %v831_v2 = vadd.f32 %v830_v62, %v2829_v59  ;;  %v972_v6 = vmax.f32 %v634_v51, 0.0 }
 0x195   : > { %v975_v4 = vmax.f32 %v636_v56, 0.0  ;;  %v977_v5 = vmax.f32 %v829_v60, 0.0 }
 0x196   : > { %v976_v7 = vmax.f32 %v638_v1, 0.0  ;;  %v978_v8 = vmax.f32 %v831_v2, 0.0 }
 0x197   : > { %v1075_v9 = vpack.c.bf16 %v975_v4, %v971_v3  ;;  %v1077_v10 = vpack.c.bf16 %v977_v5, %v973_v55 }
 0x198   : > { %v1076_v11 = vpack.c.bf16 %v976_v7, %v972_v6  ;;  %v1078_v12 = vpack.c.bf16 %v978_v8, %v974_v63  ;;  %v641_v13 = vpop.f32.mrb[28].mxu0  ;;  %v834_v14 = vpop.f32.mrb[28].mxu1 }
 0x199   : > { %v642_v15 = vadd.f32 %v641_v13, %v2823_v57  ;;  %v835_v16 = vadd.f32 %v834_v14, %v2825_v58  ;;  %v643_v17 = vpop.f32.mrb[29].mxu0  ;;  %v836_v18 = vpop.f32.mrb[29].mxu1 }
 0x19a   : > { %v644_v19 = vadd.f32 %v643_v17, %v2827_v0  ;;  %v837_v20 = vadd.f32 %v836_v18, %v2829_v59  ;;  %v645_v21 = vpop.f32.mrb[30].mxu0  ;;  %v838_v22 = vpop.f32.mrb[30].mxu1  ;;  %1458 = vmatprep.mubr.bf16.mxu0 %v1076_v11  ;;  %1619 = vmatprep.mubr.bf16.mxu1 %v1078_v12 }
 0x19b   : > { %v981_v23 = vmax.f32 %v835_v16, 0.0  ;;  %v646_v24 = vadd.f32 %v645_v21, %v2823_v57  ;;  %v839_v25 = vadd.f32 %v838_v22, %v2825_v58  ;;  %v647_v26 = vpop.f32.mrb[31].mxu0  ;;  %v840_v27 = vpop.f32.mrb[31].mxu1  ;;  %1459 = vmatmul.mubr.bf16.gmra.mrb[88].mxu0 %v1075_v9  ;;  %1620 = vmatmul.mubr.bf16.gmra.mrb[88].mxu1 %v1077_v10  ;;  %v979_v31 = vmax.f32 %v642_v15, 0.0 }
 0x19c   : > { %v982_v28 = vmax.f32 %v837_v20, 0.0  ;;  %v648_v29 = vadd.f32 %v647_v26, %v2827_v0  ;;  %v841_v30 = vadd.f32 %v840_v27, %v2829_v59  ;;  %v980_v34 = vmax.f32 %v644_v19, 0.0 }
 0x19d   : > { %v983_v32 = vmax.f32 %v646_v24, 0.0  ;;  %v985_v33 = vmax.f32 %v839_v25, 0.0 }
 0x19e   : > { %v984_v35 = vmax.f32 %v648_v29, 0.0  ;;  %v986_v36 = vmax.f32 %v841_v30, 0.0 }
 0x19f   : > { %v1079_v37 = vpack.c.bf16 %v983_v32, %v979_v31  ;;  %v1081_v38 = vpack.c.bf16 %v985_v33, %v981_v23 }
 0x1a0   : > { %v1080_v39 = vpack.c.bf16 %v984_v35, %v980_v34  ;;  %v1082_v40 = vpack.c.bf16 %v986_v36, %v982_v28  ;;  %v651_v41 = vpop.f32.mrb[32].mxu0  ;;  %v844_v42 = vpop.f32.mrb[32].mxu1 }
 0x1a1   : > { %v652_v43 = vadd.f32 %v651_v41, %v2823_v57  ;;  %v845_v44 = vadd.f32 %v844_v42, %v2825_v58  ;;  %v653_v45 = vpop.f32.mrb[33].mxu0  ;;  %v846_v46 = vpop.f32.mrb[33].mxu1 }
 0x1a2   : > { %v654_v47 = vadd.f32 %v653_v45, %v2827_v0  ;;  %v847_v48 = vadd.f32 %v846_v46, %v2829_v59  ;;  %v655_v49 = vpop.f32.mrb[34].mxu0  ;;  %v848_v50 = vpop.f32.mrb[34].mxu1  ;;  %1466 = vmatprep.mubr.bf16.mxu0 %v1080_v39  ;;  %1627 = vmatprep.mubr.bf16.mxu1 %v1082_v40 }
 0x1a3   : > { %v989_v51 = vmax.f32 %v845_v44, 0.0  ;;  %v656_v52 = vadd.f32 %v655_v49, %v2823_v57  ;;  %v849_v53 = vadd.f32 %v848_v50, %v2825_v58  ;;  %v657_v54 = vpop.f32.mrb[35].mxu0  ;;  %v850_v55 = vpop.f32.mrb[35].mxu1  ;;  %1467 = vmatmul.mubr.bf16.gmra.mrb[92].mxu0 %v1079_v37  ;;  %1628 = vmatmul.mubr.bf16.gmra.mrb[92].mxu1 %v1081_v38  ;;  %v987_v62 = vmax.f32 %v652_v43, 0.0 }
 0x1a4   : > { %v990_v56 = vmax.f32 %v847_v48, 0.0  ;;  %v658_v60 = vadd.f32 %v657_v54, %v2827_v0  ;;  %v851_v61 = vadd.f32 %v850_v55, %v2829_v59  ;;  %v988_v2 = vmax.f32 %v654_v47, 0.0 }
 0x1a5   : > { %v991_v63 = vmax.f32 %v656_v52, 0.0  ;;  %v993_v1 = vmax.f32 %v849_v53, 0.0 }
 0x1a6   : > { %v992_v3 = vmax.f32 %v658_v60, 0.0  ;;  %v994_v4 = vmax.f32 %v851_v61, 0.0 }
 0x1a7   : > { %v1083_v5 = vpack.c.bf16 %v991_v63, %v987_v62  ;;  %v1085_v6 = vpack.c.bf16 %v993_v1, %v989_v51 }
 0x1a8   : > { %v1084_v7 = vpack.c.bf16 %v992_v3, %v988_v2  ;;  %v1086_v8 = vpack.c.bf16 %v994_v4, %v990_v56  ;;  %v661_v9 = vpop.f32.mrb[36].mxu0  ;;  %v854_v10 = vpop.f32.mrb[36].mxu1 }
 0x1a9   : > { %v662_v11 = vadd.f32 %v661_v9, %v2823_v57  ;;  %v855_v12 = vadd.f32 %v854_v10, %v2825_v58  ;;  %v663_v13 = vpop.f32.mrb[37].mxu0  ;;  %v856_v14 = vpop.f32.mrb[37].mxu1 }
 0x1aa   : > { %v664_v15 = vadd.f32 %v663_v13, %v2827_v0  ;;  %v857_v16 = vadd.f32 %v856_v14, %v2829_v59  ;;  %v665_v17 = vpop.f32.mrb[38].mxu0  ;;  %v858_v18 = vpop.f32.mrb[38].mxu1  ;;  %1474 = vmatprep.mubr.bf16.mxu0 %v1084_v7  ;;  %1635 = vmatprep.mubr.bf16.mxu1 %v1086_v8 }
 0x1ab   : > { %v997_v19 = vmax.f32 %v855_v12, 0.0  ;;  %v666_v20 = vadd.f32 %v665_v17, %v2823_v57  ;;  %v859_v21 = vadd.f32 %v858_v18, %v2825_v58  ;;  %v667_v22 = vpop.f32.mrb[39].mxu0  ;;  %v860_v23 = vpop.f32.mrb[39].mxu1  ;;  %1475 = vmatmul.mubr.bf16.gmra.mrb[96].mxu0 %v1083_v5  ;;  %1636 = vmatmul.mubr.bf16.gmra.mrb[96].mxu1 %v1085_v6  ;;  %v995_v27 = vmax.f32 %v662_v11, 0.0 }
 0x1ac   : > { %v998_v24 = vmax.f32 %v857_v16, 0.0  ;;  %v668_v25 = vadd.f32 %v667_v22, %v2827_v0  ;;  %v861_v26 = vadd.f32 %v860_v23, %v2829_v59  ;;  %v996_v30 = vmax.f32 %v664_v15, 0.0 }
 0x1ad   : > { %v999_v28 = vmax.f32 %v666_v20, 0.0  ;;  %v1001_v29 = vmax.f32 %v859_v21, 0.0 }
 0x1ae   : > { %v1000_v31 = vmax.f32 %v668_v25, 0.0  ;;  %v1002_v32 = vmax.f32 %v861_v26, 0.0 }
 0x1af   : > { %v1087_v33 = vpack.c.bf16 %v999_v28, %v995_v27  ;;  %v1089_v34 = vpack.c.bf16 %v1001_v29, %v997_v19 }
 0x1b0   : > { %v1088_v35 = vpack.c.bf16 %v1000_v31, %v996_v30  ;;  %v1090_v36 = vpack.c.bf16 %v1002_v32, %v998_v24  ;;  %v671_v37 = vpop.f32.mrb[40].mxu0  ;;  %v864_v38 = vpop.f32.mrb[40].mxu1 }
 0x1b1   : > { %v672_v39 = vadd.f32 %v671_v37, %v2823_v57  ;;  %v865_v40 = vadd.f32 %v864_v38, %v2825_v58  ;;  %v673_v41 = vpop.f32.mrb[41].mxu0  ;;  %v866_v42 = vpop.f32.mrb[41].mxu1 }
 0x1b2   : > { %v674_v43 = vadd.f32 %v673_v41, %v2827_v0  ;;  %v867_v44 = vadd.f32 %v866_v42, %v2829_v59  ;;  %v675_v45 = vpop.f32.mrb[42].mxu0  ;;  %v868_v46 = vpop.f32.mrb[42].mxu1  ;;  %1482 = vmatprep.mubr.bf16.mxu0 %v1088_v35  ;;  %1643 = vmatprep.mubr.bf16.mxu1 %v1090_v36 }
 0x1b3   : > { %v1005_v47 = vmax.f32 %v865_v40, 0.0  ;;  %v676_v48 = vadd.f32 %v675_v45, %v2823_v57  ;;  %v869_v49 = vadd.f32 %v868_v46, %v2825_v58  ;;  %v677_v50 = vpop.f32.mrb[43].mxu0  ;;  %v870_v51 = vpop.f32.mrb[43].mxu1  ;;  %1483 = vmatmul.mubr.bf16.gmra.mrb[100].mxu0 %v1087_v33  ;;  %1644 = vmatmul.mubr.bf16.gmra.mrb[100].mxu1 %v1089_v34  ;;  %v1003_v55 = vmax.f32 %v672_v39, 0.0 }
 0x1b4   : > { %v1006_v52 = vmax.f32 %v867_v44, 0.0  ;;  %v678_v53 = vadd.f32 %v677_v50, %v2827_v0  ;;  %v871_v54 = vadd.f32 %v870_v51, %v2829_v59  ;;  %v1004_v61 = vmax.f32 %v674_v43, 0.0 }
 0x1b5   : > { %v1007_v56 = vmax.f32 %v676_v48, 0.0  ;;  %v1009_v60 = vmax.f32 %v869_v49, 0.0 }
 0x1b6   : > { %v1008_v62 = vmax.f32 %v678_v53, 0.0  ;;  %v1010_v63 = vmax.f32 %v871_v54, 0.0 }
 0x1b7   : > { %v1091_v1 = vpack.c.bf16 %v1007_v56, %v1003_v55  ;;  %v1093_v2 = vpack.c.bf16 %v1009_v60, %v1005_v47 }
 0x1b8   : > { %v1092_v3 = vpack.c.bf16 %v1008_v62, %v1004_v61  ;;  %v1094_v4 = vpack.c.bf16 %v1010_v63, %v1006_v52  ;;  %v681_v5 = vpop.f32.mrb[44].mxu0  ;;  %v874_v6 = vpop.f32.mrb[44].mxu1 }
 0x1b9   : > { %v682_v7 = vadd.f32 %v681_v5, %v2823_v57  ;;  %v875_v8 = vadd.f32 %v874_v6, %v2825_v58  ;;  %v683_v9 = vpop.f32.mrb[45].mxu0  ;;  %v876_v10 = vpop.f32.mrb[45].mxu1 }
 0x1ba   : > { %v684_v11 = vadd.f32 %v683_v9, %v2827_v0  ;;  %v877_v12 = vadd.f32 %v876_v10, %v2829_v59  ;;  %v685_v13 = vpop.f32.mrb[46].mxu0  ;;  %v878_v14 = vpop.f32.mrb[46].mxu1  ;;  %1490 = vmatprep.mubr.bf16.mxu0 %v1092_v3  ;;  %1651 = vmatprep.mubr.bf16.mxu1 %v1094_v4 }
 0x1bb   : > { %v1013_v15 = vmax.f32 %v875_v8, 0.0  ;;  %v686_v16 = vadd.f32 %v685_v13, %v2823_v57  ;;  %v879_v17 = vadd.f32 %v878_v14, %v2825_v58  ;;  %v687_v18 = vpop.f32.mrb[47].mxu0  ;;  %v880_v19 = vpop.f32.mrb[47].mxu1  ;;  %1491 = vmatmul.mubr.bf16.gmra.mrb[104].mxu0 %v1091_v1  ;;  %1652 = vmatmul.mubr.bf16.gmra.mrb[104].mxu1 %v1093_v2  ;;  %v1011_v23 = vmax.f32 %v682_v7, 0.0 }
 0x1bc   : > { %v1014_v20 = vmax.f32 %v877_v12, 0.0  ;;  %v688_v21 = vadd.f32 %v687_v18, %v2827_v0  ;;  %v881_v22 = vadd.f32 %v880_v19, %v2829_v59  ;;  %v1012_v26 = vmax.f32 %v684_v11, 0.0 }
 0x1bd   : > { %v1015_v24 = vmax.f32 %v686_v16, 0.0  ;;  %v1017_v25 = vmax.f32 %v879_v17, 0.0 }
 0x1be   : > { %v1016_v27 = vmax.f32 %v688_v21, 0.0  ;;  %v1018_v28 = vmax.f32 %v881_v22, 0.0 }
 0x1bf   : > { %v1095_v29 = vpack.c.bf16 %v1015_v24, %v1011_v23  ;;  %v1097_v30 = vpack.c.bf16 %v1017_v25, %v1013_v15 }
 0x1c0   : > { %v1096_v31 = vpack.c.bf16 %v1016_v27, %v1012_v26  ;;  %v1098_v32 = vpack.c.bf16 %v1018_v28, %v1014_v20  ;;  %v691_v33 = vpop.f32.mrb[48].mxu0  ;;  %v884_v34 = vpop.f32.mrb[48].mxu1 }
 0x1c1   : > { %v692_v35 = vadd.f32 %v691_v33, %v2823_v57  ;;  %v885_v36 = vadd.f32 %v884_v34, %v2825_v58  ;;  %v693_v37 = vpop.f32.mrb[49].mxu0  ;;  %v886_v38 = vpop.f32.mrb[49].mxu1 }
 0x1c2   : > { %v694_v39 = vadd.f32 %v693_v37, %v2827_v0  ;;  %v887_v40 = vadd.f32 %v886_v38, %v2829_v59  ;;  %v695_v41 = vpop.f32.mrb[50].mxu0  ;;  %v888_v42 = vpop.f32.mrb[50].mxu1  ;;  %1498 = vmatprep.mubr.bf16.mxu0 %v1096_v31  ;;  %1659 = vmatprep.mubr.bf16.mxu1 %v1098_v32 }
 0x1c3   : > { %v1021_v43 = vmax.f32 %v885_v36, 0.0  ;;  %v696_v44 = vadd.f32 %v695_v41, %v2823_v57  ;;  %v889_v45 = vadd.f32 %v888_v42, %v2825_v58  ;;  %v697_v46 = vpop.f32.mrb[51].mxu0  ;;  %v890_v47 = vpop.f32.mrb[51].mxu1  ;;  %1499 = vmatmul.mubr.bf16.gmra.mrb[108].mxu0 %v1095_v29  ;;  %1660 = vmatmul.mubr.bf16.gmra.mrb[108].mxu1 %v1097_v30  ;;  %v1019_v51 = vmax.f32 %v692_v35, 0.0 }
 0x1c4   : > { %v1022_v48 = vmax.f32 %v887_v40, 0.0  ;;  %v698_v49 = vadd.f32 %v697_v46, %v2827_v0  ;;  %v891_v50 = vadd.f32 %v890_v47, %v2829_v59  ;;  %v1020_v54 = vmax.f32 %v694_v39, 0.0 }
 0x1c5   : > { %v1023_v52 = vmax.f32 %v696_v44, 0.0  ;;  %v1025_v53 = vmax.f32 %v889_v45, 0.0 }
 0x1c6   : > { %v1024_v55 = vmax.f32 %v698_v49, 0.0  ;;  %v1026_v56 = vmax.f32 %v891_v50, 0.0 }
 0x1c7   : > { %v1099_v60 = vpack.c.bf16 %v1023_v52, %v1019_v51  ;;  %v1101_v61 = vpack.c.bf16 %v1025_v53, %v1021_v43 }
 0x1c8   : > { %v1100_v62 = vpack.c.bf16 %v1024_v55, %v1020_v54  ;;  %v1102_v63 = vpack.c.bf16 %v1026_v56, %v1022_v48  ;;  %v701_v1 = vpop.f32.mrb[52].mxu0  ;;  %v894_v2 = vpop.f32.mrb[52].mxu1 }
 0x1c9   : > { %v702_v3 = vadd.f32 %v701_v1, %v2823_v57  ;;  %v895_v4 = vadd.f32 %v894_v2, %v2825_v58  ;;  %v703_v5 = vpop.f32.mrb[53].mxu0  ;;  %v896_v6 = vpop.f32.mrb[53].mxu1 }
 0x1ca   : > { %v704_v7 = vadd.f32 %v703_v5, %v2827_v0  ;;  %v897_v8 = vadd.f32 %v896_v6, %v2829_v59  ;;  %v705_v9 = vpop.f32.mrb[54].mxu0  ;;  %v898_v10 = vpop.f32.mrb[54].mxu1  ;;  %1506 = vmatprep.mubr.bf16.mxu0 %v1100_v62  ;;  %1667 = vmatprep.mubr.bf16.mxu1 %v1102_v63 }
 0x1cb   : > { %v1029_v11 = vmax.f32 %v895_v4, 0.0  ;;  %v706_v12 = vadd.f32 %v705_v9, %v2823_v57  ;;  %v899_v13 = vadd.f32 %v898_v10, %v2825_v58  ;;  %v707_v14 = vpop.f32.mrb[55].mxu0  ;;  %v900_v15 = vpop.f32.mrb[55].mxu1  ;;  %1507 = vmatmul.mubr.bf16.gmra.mrb[112].mxu0 %v1099_v60  ;;  %1668 = vmatmul.mubr.bf16.gmra.mrb[112].mxu1 %v1101_v61  ;;  %v1027_v19 = vmax.f32 %v702_v3, 0.0 }
 0x1cc   : > { %v1030_v16 = vmax.f32 %v897_v8, 0.0  ;;  %v708_v17 = vadd.f32 %v707_v14, %v2827_v0  ;;  %v901_v18 = vadd.f32 %v900_v15, %v2829_v59  ;;  %v1028_v22 = vmax.f32 %v704_v7, 0.0 }
 0x1cd   : > { %v1031_v20 = vmax.f32 %v706_v12, 0.0  ;;  %v1033_v21 = vmax.f32 %v899_v13, 0.0 }
 0x1ce   : > { %v1032_v23 = vmax.f32 %v708_v17, 0.0  ;;  %v1034_v24 = vmax.f32 %v901_v18, 0.0 }
 0x1cf   : > { %v1103_v25 = vpack.c.bf16 %v1031_v20, %v1027_v19  ;;  %v1105_v26 = vpack.c.bf16 %v1033_v21, %v1029_v11 }
 0x1d0   : > { %v1104_v27 = vpack.c.bf16 %v1032_v23, %v1028_v22  ;;  %v1106_v28 = vpack.c.bf16 %v1034_v24, %v1030_v16  ;;  %v711_v29 = vpop.f32.mrb[56].mxu0  ;;  %v904_v30 = vpop.f32.mrb[56].mxu1 }
 0x1d1   : > { %v712_v31 = vadd.f32 %v711_v29, %v2823_v57  ;;  %v905_v32 = vadd.f32 %v904_v30, %v2825_v58  ;;  %v713_v33 = vpop.f32.mrb[57].mxu0  ;;  %v906_v34 = vpop.f32.mrb[57].mxu1 }
 0x1d2   : > { %v714_v35 = vadd.f32 %v713_v33, %v2827_v0  ;;  %v907_v36 = vadd.f32 %v906_v34, %v2829_v59  ;;  %v715_v37 = vpop.f32.mrb[58].mxu0  ;;  %v908_v38 = vpop.f32.mrb[58].mxu1  ;;  %1514 = vmatprep.mubr.bf16.mxu0 %v1104_v27  ;;  %1675 = vmatprep.mubr.bf16.mxu1 %v1106_v28 }
 0x1d3   : > { %v1037_v39 = vmax.f32 %v905_v32, 0.0  ;;  %v716_v40 = vadd.f32 %v715_v37, %v2823_v57  ;;  %v909_v41 = vadd.f32 %v908_v38, %v2825_v58  ;;  %v717_v42 = vpop.f32.mrb[59].mxu0  ;;  %v910_v43 = vpop.f32.mrb[59].mxu1  ;;  %1515 = vmatmul.mubr.bf16.gmra.mrb[116].mxu0 %v1103_v25  ;;  %1676 = vmatmul.mubr.bf16.gmra.mrb[116].mxu1 %v1105_v26  ;;  %v1035_v47 = vmax.f32 %v712_v31, 0.0  ;;  %v2335_v37 = vld [vmem:[%s2746_s6] sm:$0xff] }
 0x1d4   : > { %v1038_v44 = vmax.f32 %v907_v36, 0.0  ;;  %v718_v45 = vadd.f32 %v717_v42, %v2827_v0  ;;  %v911_v46 = vadd.f32 %v910_v43, %v2829_v59  ;;  %v1036_v50 = vmax.f32 %v714_v35, 0.0 }
 0x1d5   : > { %v1039_v48 = vmax.f32 %v716_v40, 0.0  ;;  %v1041_v49 = vmax.f32 %v909_v41, 0.0 }
 0x1d6   : > { %v1040_v51 = vmax.f32 %v718_v45, 0.0  ;;  %v1042_v52 = vmax.f32 %v911_v46, 0.0 }
 0x1d7   : > { %v1107_v53 = vpack.c.bf16 %v1039_v48, %v1035_v47  ;;  %v1109_v54 = vpack.c.bf16 %v1041_v49, %v1037_v39 }
 0x1d8   : > { %v1108_v55 = vpack.c.bf16 %v1040_v51, %v1036_v50  ;;  %v1110_v56 = vpack.c.bf16 %v1042_v52, %v1038_v44  ;;  %v721_v60 = vpop.f32.mrb[60].mxu0  ;;  %v914_v61 = vpop.f32.mrb[60].mxu1  ;;  %v2336_v44 = vld [vmem:[%s2746_s6 + $0x8] sm:$0xff] }
 0x1d9   : > { %v722_v62 = vadd.f32 %v721_v60, %v2823_v57  ;;  %v915_v63 = vadd.f32 %v914_v61, %v2825_v58  ;;  %v723_v1 = vpop.f32.mrb[61].mxu0  ;;  %v916_v2 = vpop.f32.mrb[61].mxu1  ;;  %v2337_v60 = vld [vmem:[%s2746_s6 + $0x10] sm:$0xff] }
 0x1da   : > { %v724_v3 = vadd.f32 %v723_v1, %v2827_v0  ;;  %v917_v4 = vadd.f32 %v916_v2, %v2829_v59  ;;  %v725_v5 = vpop.f32.mrb[62].mxu0  ;;  %v918_v6 = vpop.f32.mrb[62].mxu1  ;;  %1522 = vmatprep.mubr.bf16.mxu0 %v1108_v55  ;;  %1683 = vmatprep.mubr.bf16.mxu1 %v1110_v56 }
 0x1db   : > { %v1045_v7 = vmax.f32 %v915_v63, 0.0  ;;  %v726_v8 = vadd.f32 %v725_v5, %v2823_v57  ;;  %v919_v9 = vadd.f32 %v918_v6, %v2825_v58  ;;  %v727_v10 = vpop.f32.mrb[63].mxu0  ;;  %v920_v11 = vpop.f32.mrb[63].mxu1  ;;  %1523 = vmatmul.mubr.bf16.gmra.mrb[120].mxu0 %v1107_v53  ;;  %1684 = vmatmul.mubr.bf16.gmra.mrb[120].mxu1 %v1109_v54  ;;  %v1043_v15 = vmax.f32 %v722_v62, 0.0 }
 0x1dc   : > { %v1046_v12 = vmax.f32 %v917_v4, 0.0  ;;  %v728_v13 = vadd.f32 %v727_v10, %v2827_v0  ;;  %v921_v14 = vadd.f32 %v920_v11, %v2829_v59  ;;  %v1044_v18 = vmax.f32 %v724_v3, 0.0  ;;  %v2962_v0 = vld [vmem:[%s3119_s4] ss:$0 sm:$0xff]  ;;  %v2338_v4 = vld [vmem:[%s2746_s6 + $0x18] sm:$0xff] }
 0x1dd   : > { %v1047_v16 = vmax.f32 %v726_v8, 0.0  ;;  %v1049_v17 = vmax.f32 %v919_v9, 0.0 }
 0x1de   : > { %v1048_v19 = vmax.f32 %v728_v13, 0.0  ;;  %v1050_v20 = vmax.f32 %v921_v14, 0.0 }
 0x1df   : > { %v1111_v21 = vpack.c.bf16 %v1047_v16, %v1043_v15  ;;  %v1113_v22 = vpack.c.bf16 %v1049_v17, %v1045_v7  ;;  %v2339_v17 = vld [vmem:[%s2746_s6 + $0x20] sm:$0xff] }
 0x1e0   : > { %v1112_v57 = vpack.c.bf16 %v1048_v19, %v1044_v18  ;;  %v1114_v23 = vpack.c.bf16 %v1050_v20, %v1046_v12 }
 0x1e2   : > { %1530 = vmatprep.mubr.bf16.mxu0 %v1112_v57  ;;  %1691 = vmatprep.mubr.bf16.mxu1 %v1114_v23  ;;  %v2340_v23 = vld [vmem:[%s2746_s6 + $0x28] sm:$0xff] }
 0x1e3   : > { %1531 = vmatmul.mubr.bf16.gmra.mrb[124].mxu0 %v1111_v21  ;;  %1692 = vmatmul.mubr.bf16.gmra.mrb[124].mxu1 %v1113_v22 }
 0x23e   : > { %v1971_v58 = vpop.f32.mrb[64].mxu0  ;;  %v2083_v24 = vpop.f32.mrb[64].mxu1 }
 0x23f   : > { %v1972_v59 = vpop.f32.mrb[65].mxu0  ;;  %v2084_v25 = vpop.f32.mrb[65].mxu1 }
 0x240   : > { %v1973_v26 = vadd.f32 %v1972_v59, %v1971_v58  ;;  %v2085_v27 = vadd.f32 %v2084_v25, %v2083_v24  ;;  %v1974_v28 = vpop.f32.mrb[66].mxu0  ;;  %v2086_v29 = vpop.f32.mrb[66].mxu1 }
 0x241   : > { %v1975_v30 = vpop.f32.mrb[67].mxu0  ;;  %v2087_v31 = vpop.f32.mrb[67].mxu1 }
 0x242   : > { %v1413_v32 = vadd.f32 %v1973_v26, %v2962_v0  ;;  %v1976_v33 = vadd.f32 %v1975_v30, %v1974_v28  ;;  %v2088_v34 = vadd.f32 %v2087_v31, %v2086_v29 }
 0x244   : > { %v1574_v35 = vadd.f32 %v2085_v27, %v1413_v32  ;;  %v1416_v36 = vadd.f32 %v1976_v33, %v2962_v0 }
 0x246   : > { %v1700_v38 = vadd.f32 %v2335_v37, %v1574_v35  ;;  %v1577_v39 = vadd.f32 %v2088_v34, %v1416_v36  ;;  %v1977_v40 = vpop.f32.mrb[68].mxu0  ;;  %v2089_v41 = vpop.f32.mrb[68].mxu1  ;;  %v2341_v34 = vld [vmem:[%s2746_s6 + $0x30] sm:$0xff] }
 0x247   : > { %v1978_v42 = vpop.f32.mrb[69].mxu0  ;;  %v2090_v43 = vpop.f32.mrb[69].mxu1 }
 0x248   : > { %1732 = vst [vmem:[%s2969_s12] sm:$0xff] %v1700_v38  ;;  %v1701_v45 = vadd.f32 %v2336_v44, %v1577_v39  ;;  %v1979_v46 = vadd.f32 %v1978_v42, %v1977_v40  ;;  %v2091_v47 = vadd.f32 %v2090_v43, %v2089_v41  ;;  %v1980_v48 = vpop.f32.mrb[70].mxu0  ;;  %v2092_v49 = vpop.f32.mrb[70].mxu1  ;;  %v2342_v41 = vld [vmem:[%s2746_s6 + $0x38] sm:$0xff] }
 0x249   : > { %v1981_v50 = vpop.f32.mrb[71].mxu0  ;;  %v2093_v51 = vpop.f32.mrb[71].mxu1 }
 0x24a   : > { %1733 = vst [vmem:[%s2969_s12 + $0x8] sm:$0xff] %v1701_v45  ;;  %v1421_v52 = vadd.f32 %v1979_v46, %v2962_v0  ;;  %v1982_v53 = vadd.f32 %v1981_v50, %v1980_v48  ;;  %v2094_v54 = vadd.f32 %v2093_v51, %v2092_v49 }
 0x24c   : > { %v1582_v55 = vadd.f32 %v2091_v47, %v1421_v52  ;;  %v1424_v56 = vadd.f32 %v1982_v53, %v2962_v0 }
 0x24e   : > { %v1702_v61 = vadd.f32 %v2337_v60, %v1582_v55  ;;  %v1585_v62 = vadd.f32 %v2094_v54, %v1424_v56  ;;  %v1983_v63 = vpop.f32.mrb[72].mxu0  ;;  %v2095_v1 = vpop.f32.mrb[72].mxu1  ;;  %v2343_v54 = vld [vmem:[%s2746_s6 + $0x40] sm:$0xff] }
 0x24f   : > { %v1984_v2 = vpop.f32.mrb[73].mxu0  ;;  %v2096_v3 = vpop.f32.mrb[73].mxu1 }
 0x250   : > { %1734 = vst [vmem:[%s2969_s12 + $0x10] sm:$0xff] %v1702_v61  ;;  %v1703_v5 = vadd.f32 %v2338_v4, %v1585_v62  ;;  %v1985_v6 = vadd.f32 %v1984_v2, %v1983_v63  ;;  %v2097_v7 = vadd.f32 %v2096_v3, %v2095_v1  ;;  %v1986_v8 = vpop.f32.mrb[74].mxu0  ;;  %v2098_v9 = vpop.f32.mrb[74].mxu1  ;;  %v2344_v1 = vld [vmem:[%s2746_s6 + $0x48] sm:$0xff] }
 0x251   : > { %v1987_v10 = vpop.f32.mrb[75].mxu0  ;;  %v2099_v11 = vpop.f32.mrb[75].mxu1 }
 0x252   : > { %1735 = vst [vmem:[%s2969_s12 + $0x18] sm:$0xff] %v1703_v5  ;;  %v1429_v12 = vadd.f32 %v1985_v6, %v2962_v0  ;;  %v1988_v13 = vadd.f32 %v1987_v10, %v1986_v8  ;;  %v2100_v14 = vadd.f32 %v2099_v11, %v2098_v9 }
 0x254   : > { %v1590_v15 = vadd.f32 %v2097_v7, %v1429_v12  ;;  %v1432_v16 = vadd.f32 %v1988_v13, %v2962_v0 }
 0x256   : > { %v1704_v18 = vadd.f32 %v2339_v17, %v1590_v15  ;;  %v1593_v19 = vadd.f32 %v2100_v14, %v1432_v16  ;;  %v1989_v20 = vpop.f32.mrb[76].mxu0  ;;  %v2101_v21 = vpop.f32.mrb[76].mxu1  ;;  %v2345_v14 = vld [vmem:[%s2746_s6 + $0x50] sm:$0xff] }
 0x257   : > { %v1990_v22 = vpop.f32.mrb[77].mxu0  ;;  %v2102_v57 = vpop.f32.mrb[77].mxu1 }
 0x258   : > { %1736 = vst [vmem:[%s2969_s12 + $0x20] sm:$0xff] %v1704_v18  ;;  %v1705_v58 = vadd.f32 %v2340_v23, %v1593_v19  ;;  %v1991_v24 = vadd.f32 %v1990_v22, %v1989_v20  ;;  %v2103_v59 = vadd.f32 %v2102_v57, %v2101_v21  ;;  %v1992_v25 = vpop.f32.mrb[78].mxu0  ;;  %v2104_v26 = vpop.f32.mrb[78].mxu1  ;;  %v2346_v21 = vld [vmem:[%s2746_s6 + $0x58] sm:$0xff] }
 0x259   : > { %v1993_v27 = vpop.f32.mrb[79].mxu0  ;;  %v2105_v28 = vpop.f32.mrb[79].mxu1 }
 0x25a   : > { %1737 = vst [vmem:[%s2969_s12 + $0x28] sm:$0xff] %v1705_v58  ;;  %v1437_v29 = vadd.f32 %v1991_v24, %v2962_v0  ;;  %v1994_v30 = vadd.f32 %v1993_v27, %v1992_v25  ;;  %v2106_v31 = vadd.f32 %v2105_v28, %v2104_v26 }
 0x25c   : > { %v1598_v32 = vadd.f32 %v2103_v59, %v1437_v29  ;;  %v1440_v33 = vadd.f32 %v1994_v30, %v2962_v0 }
 0x25e   : > { %v1706_v35 = vadd.f32 %v2341_v34, %v1598_v32  ;;  %v1601_v36 = vadd.f32 %v2106_v31, %v1440_v33  ;;  %v1995_v37 = vpop.f32.mrb[80].mxu0  ;;  %v2107_v38 = vpop.f32.mrb[80].mxu1  ;;  %v2347_v31 = vld [vmem:[%s2746_s6 + $0x60] sm:$0xff] }
 0x25f   : > { %v1996_v39 = vpop.f32.mrb[81].mxu0  ;;  %v2108_v40 = vpop.f32.mrb[81].mxu1 }
 0x260   : > { %1738 = vst [vmem:[%s2969_s12 + $0x30] sm:$0xff] %v1706_v35  ;;  %v1707_v42 = vadd.f32 %v2342_v41, %v1601_v36  ;;  %v1997_v43 = vadd.f32 %v1996_v39, %v1995_v37  ;;  %v2109_v44 = vadd.f32 %v2108_v40, %v2107_v38  ;;  %v1998_v45 = vpop.f32.mrb[82].mxu0  ;;  %v2110_v46 = vpop.f32.mrb[82].mxu1  ;;  %v2348_v38 = vld [vmem:[%s2746_s6 + $0x68] sm:$0xff] }
 0x261   : > { %v1999_v47 = vpop.f32.mrb[83].mxu0  ;;  %v2111_v48 = vpop.f32.mrb[83].mxu1 }
 0x262   : > { %1739 = vst [vmem:[%s2969_s12 + $0x38] sm:$0xff] %v1707_v42  ;;  %v1445_v49 = vadd.f32 %v1997_v43, %v2962_v0  ;;  %v2000_v50 = vadd.f32 %v1999_v47, %v1998_v45  ;;  %v2112_v51 = vadd.f32 %v2111_v48, %v2110_v46 }
 0x264   : > { %v1606_v52 = vadd.f32 %v2109_v44, %v1445_v49  ;;  %v1448_v53 = vadd.f32 %v2000_v50, %v2962_v0 }
 0x266   : > { %v1708_v55 = vadd.f32 %v2343_v54, %v1606_v52  ;;  %v1609_v56 = vadd.f32 %v2112_v51, %v1448_v53  ;;  %v2001_v60 = vpop.f32.mrb[84].mxu0  ;;  %v2113_v61 = vpop.f32.mrb[84].mxu1  ;;  %v2349_v51 = vld [vmem:[%s2746_s6 + $0x70] sm:$0xff] }
 0x267   : > { %v2002_v62 = vpop.f32.mrb[85].mxu0  ;;  %v2114_v63 = vpop.f32.mrb[85].mxu1 }
 0x268   : > { %1740 = vst [vmem:[%s2969_s12 + $0x40] sm:$0xff] %v1708_v55  ;;  %v1709_v2 = vadd.f32 %v2344_v1, %v1609_v56  ;;  %v2003_v3 = vadd.f32 %v2002_v62, %v2001_v60  ;;  %v2115_v4 = vadd.f32 %v2114_v63, %v2113_v61  ;;  %v2004_v5 = vpop.f32.mrb[86].mxu0  ;;  %v2116_v6 = vpop.f32.mrb[86].mxu1  ;;  %v2350_v61 = vld [vmem:[%s2746_s6 + $0x78] sm:$0xff] }
 0x269   : > { %v2005_v7 = vpop.f32.mrb[87].mxu0  ;;  %v2117_v8 = vpop.f32.mrb[87].mxu1 }
 0x26a   : > { %1741 = vst [vmem:[%s2969_s12 + $0x48] sm:$0xff] %v1709_v2  ;;  %v1453_v9 = vadd.f32 %v2003_v3, %v2962_v0  ;;  %v2006_v10 = vadd.f32 %v2005_v7, %v2004_v5  ;;  %v2118_v11 = vadd.f32 %v2117_v8, %v2116_v6 }
 0x26c   : > { %v1614_v12 = vadd.f32 %v2115_v4, %v1453_v9  ;;  %v1456_v13 = vadd.f32 %v2006_v10, %v2962_v0 }
 0x26e   : > { %v1710_v15 = vadd.f32 %v2345_v14, %v1614_v12  ;;  %v1617_v16 = vadd.f32 %v2118_v11, %v1456_v13  ;;  %v2007_v17 = vpop.f32.mrb[88].mxu0  ;;  %v2119_v18 = vpop.f32.mrb[88].mxu1  ;;  %v2351_v11 = vld [vmem:[%s2746_s6 + $0x80] sm:$0xff] }
 0x26f   : > { %v2008_v19 = vpop.f32.mrb[89].mxu0  ;;  %v2120_v20 = vpop.f32.mrb[89].mxu1 }
 0x270   : > { %1742 = vst [vmem:[%s2969_s12 + $0x50] sm:$0xff] %v1710_v15  ;;  %v1711_v22 = vadd.f32 %v2346_v21, %v1617_v16  ;;  %v2009_v57 = vadd.f32 %v2008_v19, %v2007_v17  ;;  %v2121_v23 = vadd.f32 %v2120_v20, %v2119_v18  ;;  %v2010_v58 = vpop.f32.mrb[90].mxu0  ;;  %v2122_v24 = vpop.f32.mrb[90].mxu1  ;;  %v2352_v18 = vld [vmem:[%s2746_s6 + $0x88] sm:$0xff] }
 0x271   : > { %v2011_v59 = vpop.f32.mrb[91].mxu0  ;;  %v2123_v25 = vpop.f32.mrb[91].mxu1 }
 0x272   : > { %1743 = vst [vmem:[%s2969_s12 + $0x58] sm:$0xff] %v1711_v22  ;;  %v1461_v26 = vadd.f32 %v2009_v57, %v2962_v0  ;;  %v2012_v27 = vadd.f32 %v2011_v59, %v2010_v58  ;;  %v2124_v28 = vadd.f32 %v2123_v25, %v2122_v24 }
 0x274   : > { %v1622_v29 = vadd.f32 %v2121_v23, %v1461_v26  ;;  %v1464_v30 = vadd.f32 %v2012_v27, %v2962_v0 }
 0x276   : > { %v1712_v32 = vadd.f32 %v2347_v31, %v1622_v29  ;;  %v1625_v33 = vadd.f32 %v2124_v28, %v1464_v30  ;;  %v2013_v34 = vpop.f32.mrb[92].mxu0  ;;  %v2125_v35 = vpop.f32.mrb[92].mxu1  ;;  %v2353_v28 = vld [vmem:[%s2746_s6 + $0x90] sm:$0xff] }
 0x277   : > { %v2014_v36 = vpop.f32.mrb[93].mxu0  ;;  %v2126_v37 = vpop.f32.mrb[93].mxu1 }
 0x278   : > { %1744 = vst [vmem:[%s2969_s12 + $0x60] sm:$0xff] %v1712_v32  ;;  %v1713_v39 = vadd.f32 %v2348_v38, %v1625_v33  ;;  %v2015_v40 = vadd.f32 %v2014_v36, %v2013_v34  ;;  %v2127_v41 = vadd.f32 %v2126_v37, %v2125_v35  ;;  %v2016_v42 = vpop.f32.mrb[94].mxu0  ;;  %v2128_v43 = vpop.f32.mrb[94].mxu1  ;;  %v2354_v35 = vld [vmem:[%s2746_s6 + $0x98] sm:$0xff] }
 0x279   : > { %v2017_v44 = vpop.f32.mrb[95].mxu0  ;;  %v2129_v45 = vpop.f32.mrb[95].mxu1 }
 0x27a   : > { %1745 = vst [vmem:[%s2969_s12 + $0x68] sm:$0xff] %v1713_v39  ;;  %v1469_v46 = vadd.f32 %v2015_v40, %v2962_v0  ;;  %v2018_v47 = vadd.f32 %v2017_v44, %v2016_v42  ;;  %v2130_v48 = vadd.f32 %v2129_v45, %v2128_v43 }
 0x27c   : > { %v1630_v49 = vadd.f32 %v2127_v41, %v1469_v46  ;;  %v1472_v50 = vadd.f32 %v2018_v47, %v2962_v0 }
 0x27e   : > { %v1714_v52 = vadd.f32 %v2349_v51, %v1630_v49  ;;  %v1633_v53 = vadd.f32 %v2130_v48, %v1472_v50  ;;  %v2019_v54 = vpop.f32.mrb[96].mxu0  ;;  %v2131_v55 = vpop.f32.mrb[96].mxu1  ;;  %v2355_v48 = vld [vmem:[%s2746_s6 + $0xa0] sm:$0xff] }
 0x27f   : > { %v2020_v56 = vpop.f32.mrb[97].mxu0  ;;  %v2132_v60 = vpop.f32.mrb[97].mxu1 }
 0x280   : > { %1746 = vst [vmem:[%s2969_s12 + $0x70] sm:$0xff] %v1714_v52  ;;  %v1715_v62 = vadd.f32 %v2350_v61, %v1633_v53  ;;  %v2021_v63 = vadd.f32 %v2020_v56, %v2019_v54  ;;  %v2133_v1 = vadd.f32 %v2132_v60, %v2131_v55  ;;  %v2022_v2 = vpop.f32.mrb[98].mxu0  ;;  %v2134_v3 = vpop.f32.mrb[98].mxu1  ;;  %v2356_v55 = vld [vmem:[%s2746_s6 + $0xa8] sm:$0xff] }
 0x281   : > { %v2023_v4 = vpop.f32.mrb[99].mxu0  ;;  %v2135_v5 = vpop.f32.mrb[99].mxu1 }
 0x282   : > { %1747 = vst [vmem:[%s2969_s12 + $0x78] sm:$0xff] %v1715_v62  ;;  %v1477_v6 = vadd.f32 %v2021_v63, %v2962_v0  ;;  %v2024_v7 = vadd.f32 %v2023_v4, %v2022_v2  ;;  %v2136_v8 = vadd.f32 %v2135_v5, %v2134_v3 }
 0x284   : > { %v1638_v9 = vadd.f32 %v2133_v1, %v1477_v6  ;;  %v1480_v10 = vadd.f32 %v2024_v7, %v2962_v0 }
 0x286   : > { %v1716_v12 = vadd.f32 %v2351_v11, %v1638_v9  ;;  %v1641_v13 = vadd.f32 %v2136_v8, %v1480_v10  ;;  %v2025_v14 = vpop.f32.mrb[100].mxu0  ;;  %v2137_v15 = vpop.f32.mrb[100].mxu1  ;;  %v2357_v8 = vld [vmem:[%s2746_s6 + $0xb0] sm:$0xff] }
 0x287   : > { %v2026_v16 = vpop.f32.mrb[101].mxu0  ;;  %v2138_v17 = vpop.f32.mrb[101].mxu1 }
 0x288   : > { %1748 = vst [vmem:[%s2969_s12 + $0x80] sm:$0xff] %v1716_v12  ;;  %v1717_v19 = vadd.f32 %v2352_v18, %v1641_v13  ;;  %v2027_v20 = vadd.f32 %v2026_v16, %v2025_v14  ;;  %v2139_v21 = vadd.f32 %v2138_v17, %v2137_v15  ;;  %v2028_v22 = vpop.f32.mrb[102].mxu0  ;;  %v2140_v57 = vpop.f32.mrb[102].mxu1  ;;  %v2358_v15 = vld [vmem:[%s2746_s6 + $0xb8] sm:$0xff] }
 0x289   : > { %v2029_v23 = vpop.f32.mrb[103].mxu0  ;;  %v2141_v58 = vpop.f32.mrb[103].mxu1 }
 0x28a   : > { %1749 = vst [vmem:[%s2969_s12 + $0x88] sm:$0xff] %v1717_v19  ;;  %v1485_v24 = vadd.f32 %v2027_v20, %v2962_v0  ;;  %v2030_v59 = vadd.f32 %v2029_v23, %v2028_v22  ;;  %v2142_v25 = vadd.f32 %v2141_v58, %v2140_v57 }
 0x28c   : > { %v1646_v26 = vadd.f32 %v2139_v21, %v1485_v24  ;;  %v1488_v27 = vadd.f32 %v2030_v59, %v2962_v0 }
 0x28e   : > { %v1718_v29 = vadd.f32 %v2353_v28, %v1646_v26  ;;  %v1649_v30 = vadd.f32 %v2142_v25, %v1488_v27  ;;  %v2031_v31 = vpop.f32.mrb[104].mxu0  ;;  %v2143_v32 = vpop.f32.mrb[104].mxu1  ;;  %v2359_v25 = vld [vmem:[%s2746_s6 + $0xc0] sm:$0xff] }
 0x28f   : > { %v2032_v33 = vpop.f32.mrb[105].mxu0  ;;  %v2144_v34 = vpop.f32.mrb[105].mxu1 }
 0x290   : > { %1750 = vst [vmem:[%s2969_s12 + $0x90] sm:$0xff] %v1718_v29  ;;  %v1719_v36 = vadd.f32 %v2354_v35, %v1649_v30  ;;  %v2033_v37 = vadd.f32 %v2032_v33, %v2031_v31  ;;  %v2145_v38 = vadd.f32 %v2144_v34, %v2143_v32  ;;  %v2034_v39 = vpop.f32.mrb[106].mxu0  ;;  %v2146_v40 = vpop.f32.mrb[106].mxu1  ;;  %v2360_v32 = vld [vmem:[%s2746_s6 + $0xc8] sm:$0xff] }
 0x291   : > { %v2035_v41 = vpop.f32.mrb[107].mxu0  ;;  %v2147_v42 = vpop.f32.mrb[107].mxu1 }
 0x292   : > { %1751 = vst [vmem:[%s2969_s12 + $0x98] sm:$0xff] %v1719_v36  ;;  %v1493_v43 = vadd.f32 %v2033_v37, %v2962_v0  ;;  %v2036_v44 = vadd.f32 %v2035_v41, %v2034_v39  ;;  %v2148_v45 = vadd.f32 %v2147_v42, %v2146_v40 }
 0x294   : > { %v1654_v46 = vadd.f32 %v2145_v38, %v1493_v43  ;;  %v1496_v47 = vadd.f32 %v2036_v44, %v2962_v0 }
 0x296   : > { %v1720_v49 = vadd.f32 %v2355_v48, %v1654_v46  ;;  %v1657_v50 = vadd.f32 %v2148_v45, %v1496_v47  ;;  %v2037_v51 = vpop.f32.mrb[108].mxu0  ;;  %v2149_v52 = vpop.f32.mrb[108].mxu1  ;;  %v2361_v45 = vld [vmem:[%s2746_s6 + $0xd0] sm:$0xff] }
 0x297   : > { %v2038_v53 = vpop.f32.mrb[109].mxu0  ;;  %v2150_v54 = vpop.f32.mrb[109].mxu1 }
 0x298   : > { %1752 = vst [vmem:[%s2969_s12 + $0xa0] sm:$0xff] %v1720_v49  ;;  %v1721_v56 = vadd.f32 %v2356_v55, %v1657_v50  ;;  %v2039_v60 = vadd.f32 %v2038_v53, %v2037_v51  ;;  %v2151_v61 = vadd.f32 %v2150_v54, %v2149_v52  ;;  %v2040_v62 = vpop.f32.mrb[110].mxu0  ;;  %v2152_v63 = vpop.f32.mrb[110].mxu1  ;;  %v2362_v52 = vld [vmem:[%s2746_s6 + $0xd8] sm:$0xff] }
 0x299   : > { %v2041_v1 = vpop.f32.mrb[111].mxu0  ;;  %v2153_v2 = vpop.f32.mrb[111].mxu1 }
 0x29a   : > { %1753 = vst [vmem:[%s2969_s12 + $0xa8] sm:$0xff] %v1721_v56  ;;  %v1501_v3 = vadd.f32 %v2039_v60, %v2962_v0  ;;  %v2042_v4 = vadd.f32 %v2041_v1, %v2040_v62  ;;  %v2154_v5 = vadd.f32 %v2153_v2, %v2152_v63 }
 0x29c   : > { %v1662_v6 = vadd.f32 %v2151_v61, %v1501_v3  ;;  %v1504_v7 = vadd.f32 %v2042_v4, %v2962_v0 }
 0x29e   : > { %v1722_v9 = vadd.f32 %v2357_v8, %v1662_v6  ;;  %v1665_v10 = vadd.f32 %v2154_v5, %v1504_v7  ;;  %v2043_v11 = vpop.f32.mrb[112].mxu0  ;;  %v2155_v12 = vpop.f32.mrb[112].mxu1  ;;  %v2363_v5 = vld [vmem:[%s2746_s6 + $0xe0] sm:$0xff] }
 0x29f   : > { %v2044_v13 = vpop.f32.mrb[113].mxu0  ;;  %v2156_v14 = vpop.f32.mrb[113].mxu1 }
 0x2a0   : > { %1754 = vst [vmem:[%s2969_s12 + $0xb0] sm:$0xff] %v1722_v9  ;;  %v1723_v16 = vadd.f32 %v2358_v15, %v1665_v10  ;;  %v2045_v17 = vadd.f32 %v2044_v13, %v2043_v11  ;;  %v2157_v18 = vadd.f32 %v2156_v14, %v2155_v12  ;;  %v2046_v19 = vpop.f32.mrb[114].mxu0  ;;  %v2158_v20 = vpop.f32.mrb[114].mxu1  ;;  %v2364_v12 = vld [vmem:[%s2746_s6 + $0xe8] sm:$0xff] }
 0x2a1   : > { %v2047_v21 = vpop.f32.mrb[115].mxu0  ;;  %v2159_v22 = vpop.f32.mrb[115].mxu1 }
 0x2a2   : > { %1755 = vst [vmem:[%s2969_s12 + $0xb8] sm:$0xff] %v1723_v16  ;;  %v1509_v57 = vadd.f32 %v2045_v17, %v2962_v0  ;;  %v2048_v23 = vadd.f32 %v2047_v21, %v2046_v19  ;;  %v2160_v58 = vadd.f32 %v2159_v22, %v2158_v20 }
 0x2a4   : > { %v1670_v24 = vadd.f32 %v2157_v18, %v1509_v57  ;;  %v1512_v59 = vadd.f32 %v2048_v23, %v2962_v0 }
 0x2a6   : > { %v1724_v26 = vadd.f32 %v2359_v25, %v1670_v24  ;;  %v1673_v27 = vadd.f32 %v2160_v58, %v1512_v59  ;;  %v2049_v28 = vpop.f32.mrb[116].mxu0  ;;  %v2161_v29 = vpop.f32.mrb[116].mxu1  ;;  %v2365_v58 = vld [vmem:[%s2746_s6 + $0xf0] sm:$0xff]  ;;  %v2366_v25 = vld [vmem:[%s2746_s6 + $0xf8] sm:$0xff] }
 0x2a7   : > { %v2050_v30 = vpop.f32.mrb[117].mxu0  ;;  %v2162_v31 = vpop.f32.mrb[117].mxu1 }
 0x2a8   : > { %1756 = vst [vmem:[%s2969_s12 + $0xc0] sm:$0xff] %v1724_v26  ;;  %v1725_v33 = vadd.f32 %v2360_v32, %v1673_v27  ;;  %v2051_v34 = vadd.f32 %v2050_v30, %v2049_v28  ;;  %v2163_v35 = vadd.f32 %v2162_v31, %v2161_v29  ;;  %v2052_v36 = vpop.f32.mrb[118].mxu0  ;;  %v2164_v37 = vpop.f32.mrb[118].mxu1 }
 0x2a9   : > { %v2053_v38 = vpop.f32.mrb[119].mxu0  ;;  %v2165_v39 = vpop.f32.mrb[119].mxu1 }
 0x2aa   : > { %1757 = vst [vmem:[%s2969_s12 + $0xc8] sm:$0xff] %v1725_v33  ;;  %v1517_v40 = vadd.f32 %v2051_v34, %v2962_v0  ;;  %v2054_v41 = vadd.f32 %v2053_v38, %v2052_v36  ;;  %v2166_v42 = vadd.f32 %v2165_v39, %v2164_v37 }
 0x2ac   : > { %v1678_v43 = vadd.f32 %v2163_v35, %v1517_v40  ;;  %v1520_v44 = vadd.f32 %v2054_v41, %v2962_v0 }
 0x2ae   : > { %v1726_v46 = vadd.f32 %v2361_v45, %v1678_v43  ;;  %v1681_v47 = vadd.f32 %v2166_v42, %v1520_v44  ;;  %v2055_v48 = vpop.f32.mrb[120].mxu0  ;;  %v2167_v49 = vpop.f32.mrb[120].mxu1 }
 0x2af   : > { %v2056_v50 = vpop.f32.mrb[121].mxu0  ;;  %v2168_v51 = vpop.f32.mrb[121].mxu1 }
 0x2b0   : > { %1758 = vst [vmem:[%s2969_s12 + $0xd0] sm:$0xff] %v1726_v46  ;;  %v1727_v53 = vadd.f32 %v2362_v52, %v1681_v47  ;;  %v2057_v54 = vadd.f32 %v2056_v50, %v2055_v48  ;;  %v2169_v55 = vadd.f32 %v2168_v51, %v2167_v49  ;;  %v2058_v56 = vpop.f32.mrb[122].mxu0  ;;  %v2170_v60 = vpop.f32.mrb[122].mxu1 }
 0x2b1   : > { %v2059_v61 = vpop.f32.mrb[123].mxu0  ;;  %v2171_v62 = vpop.f32.mrb[123].mxu1 }
 0x2b2   : > { %1759 = vst [vmem:[%s2969_s12 + $0xd8] sm:$0xff] %v1727_v53  ;;  %v1525_v63 = vadd.f32 %v2057_v54, %v2962_v0  ;;  %v2060_v1 = vadd.f32 %v2059_v61, %v2058_v56  ;;  %v2172_v2 = vadd.f32 %v2171_v62, %v2170_v60 }
 0x2b4   : > { %v1686_v3 = vadd.f32 %v2169_v55, %v1525_v63  ;;  %v1528_v4 = vadd.f32 %v2060_v1, %v2962_v0 }
 0x2b6   : > { %v1728_v6 = vadd.f32 %v2363_v5, %v1686_v3  ;;  %v1689_v7 = vadd.f32 %v2172_v2, %v1528_v4  ;;  %v2061_v8 = vpop.f32.mrb[124].mxu0  ;;  %v2173_v9 = vpop.f32.mrb[124].mxu1 }
 0x2b7   : > { %v2062_v10 = vpop.f32.mrb[125].mxu0  ;;  %v2174_v11 = vpop.f32.mrb[125].mxu1 }
 0x2b8   : > { %1760 = vst [vmem:[%s2969_s12 + $0xe0] sm:$0xff] %v1728_v6  ;;  %v1729_v13 = vadd.f32 %v2364_v12, %v1689_v7  ;;  %v2063_v14 = vadd.f32 %v2062_v10, %v2061_v8  ;;  %v2175_v15 = vadd.f32 %v2174_v11, %v2173_v9  ;;  %v2064_v16 = vpop.f32.mrb[126].mxu0  ;;  %v2176_v17 = vpop.f32.mrb[126].mxu1 }
 0x2b9   : > { %v2065_v18 = vpop.f32.mrb[127].mxu0  ;;  %v2177_v19 = vpop.f32.mrb[127].mxu1 }
 0x2ba   : > { %1761 = vst [vmem:[%s2969_s12 + $0xe8] sm:$0xff] %v1729_v13  ;;  %v1533_v20 = vadd.f32 %v2063_v14, %v2962_v0  ;;  %v2066_v21 = vadd.f32 %v2065_v18, %v2064_v16  ;;  %v2178_v22 = vadd.f32 %v2177_v19, %v2176_v17 }
 0x2bc   : > { %v1694_v57 = vadd.f32 %v2175_v15, %v1533_v20  ;;  %v1536_v23 = vadd.f32 %v2066_v21, %v2962_v0 }
 0x2be   : > { %v1730_v24 = vadd.f32 %v2365_v58, %v1694_v57  ;;  %v1697_v59 = vadd.f32 %v2178_v22, %v1536_v23 }
 0x2c0   : > { %1762 = vst [vmem:[%s2969_s12 + $0xf0] sm:$0xff] %v1730_v24  ;;  %v1731_v26 = vadd.f32 %v2366_v25, %v1697_v59 }
 0x2c2   : > { %1763 = vst [vmem:[%s2969_s12 + $0xf8] sm:$0xff] %v1731_v26 }
 0x2c3   : > { %2466 = shalt.err (!%p2463_p2)
}
 0x2c4   : > { %s2467_s6 = scalar_lea.hbm %s3066_s11, 4096  ;;  %s2471_s10 = scalar_lea.hbm %s3120_s5, 8192 }
 0x2c5   : > { %p2468_p13 = scmp.ne.s32.totalorder %s3066_s11, %s2467_s6  ;;  %p2472_p4 = scmp.lt.u32.totalorder %s3066_s11, %s3120_s5 }
 0x2c6   : > { %p2473_p7 = scmp.lt.u32.totalorder %s2471_s10, %s2467_s6  ;;  %p2475_p11 = scmp.lt.u32.totalorder %s2467_s6, %s3066_s11 }
 0x2c7   : > { %p2469_p6 = pnand %p2468_p13, %p3134_p0 }
 0x2c8   : > { %p2474_p8 = por %p2473_p7, %p2472_p4 }
 0x2c9   : > { %p2470_p10 = pneg %p2469_p6 }
 0x2ca   : > { %p2476_p1 = por %p2475_p11, %p2474_p8 }
 0x2cc   : > { %p2477_p3 = pnand %p2476_p1, %p2470_p10 }
 0x2ce   : > { %2480 = shalt.err (!%p2477_p3)
}
 0x2cf   : > { %s2536_s13 = smov 128   ;;  %s2537_s8 = smov 8  }
 0x2d0   : > { %2189 = dma.vmem_to_hbm [thread:$0]  (%p3134_p0), %s3068_s29, 4096, %s3066_s11, %s1765_s14, %s2536_s13, %s2536_s13, %s2537_s8  }
 0x2d1 PF: > { %s1793_s9 = sand.u32 1, %s2511_s18   ;;  %p3135_p5 = scmp.ne.s32.totalorder %s3125_s25, 0 }
 0x2d2   : > { %p3136_p9 = scmp.ge.s32.totalorder %s2523_s21, 2  ;;  %s1794_s22 = scalar_lea.sflag [#allocation4], %s1793_s9 }
 0x2d4   : > { %p2203_p12 = pnand %p3136_p9, %p3135_p5 }
 0x2d6   : > { %2506 = dma.done.wait (!%p2203_p12), %s1794_s22, 4096  }
 0x2d7   : > { %2508 = vsyncadd (!%p2203_p12), %s1794_s22, 4294963200  ;;  %p19_p2 = scmp.ge.s32.totalorder %s2678_s16, 4   ;;  %s3137_s18 = smov %s2515_s19 }
 0x2d8   : > { %s3138_s19 = smov %s2519_s20  ;;  %s3139_s20 = smov %s2687_s27 }
 0x2d9   : > { %s3140_s21 = smov %s2678_s16  ;;  %21 = sbr.rel (!%p19_p2) target bundleno = 6 (0x6), region = 93 }
 0x2e0   :  { %1799 = vsyncpa [#allocation3], 1 }
 0x2e1   :  { %1801 = vsyncpa [#allocation3 + $0x1], 1 }
 0x2e2   :  { %1802 = vsyncpa [#allocation6], 1 }
 0x2e3   :  { %1803 = vsyncpa [#allocation4], 1 }
 0x2e4   :  { %1805 = vsyncpa [#allocation4 + $0x1], 1 }

</bundles_post_ra>
